<compile_context>
chip_gen: v7x
topology: tpu7x:2x2x1
jax: 0.10.0
libtpu: 0.0.40
codegen_flags: <defaults>
</compile_context>

<pallas_src>
import functools

import numpy as np
import jax
import jax.numpy as jnp
from jax import lax
from jax.experimental import pallas as pl
from jax.experimental.pallas import tpu as pltpu


def _round_up(x, m):
    return (x + m - 1) // m * m


def _conv_out(s):
    # Conv3d(k=3, stride=2, pad=1) output size.
    return (s - 1) // 2 + 1


def _conv_geom(D, H, W):
    """Geometry of one 3x3x3 / stride-2 / pad-1 layer in the fused-kernel layout."""
    Do, Ho, Wo = _conv_out(D), _conv_out(H), _conv_out(W)
    Hp = H + 2 + (H % 2)            # spatially padded, rounded to even for the 2-phase split
    Wp = W + 2 + (W % 2)
    Hp2, Wp2 = Hp // 2, Wp // 2     # Hp2 >= Ho + 1, Wp2 >= Wo + 1
    Lv = (Ho - 1) * Wp2 + Wo        # rows of one fused-layout output plane (row = ho*Wp2 + wo)
    return dict(Do=Do, Ho=Ho, Wo=Wo, Hp=Hp, Wp=Wp, Hp2=Hp2, Wp2=Wp2, Lv=Lv)


# ----------------------------------------------------------------------------
# Generic tiled matmul (+bias, +optional ReLU) used for conv1 (im2col) and fc1.
# Single K step (no scratch, no HBM K padding) whenever K fits one tile.
# ----------------------------------------------------------------------------
def _mm_single_kernel(x_ref, w_ref, b_ref, o_ref, *, relu):
    out = jnp.dot(x_ref[...], w_ref[...], preferred_element_type=jnp.float32)
    out = out + b_ref[...]
    if relu:
        out = jnp.maximum(out, 0.0)
    o_ref[...] = out.astype(o_ref.dtype)


def _mm_multi_kernel(x_ref, w_ref, b_ref, o_ref, acc_ref, *, relu):
    k = pl.program_id(2)

    @pl.when(k == 0)
    def _init():
        acc_ref[...] = jnp.zeros_like(acc_ref)

    acc_ref[...] += jnp.dot(x_ref[...], w_ref[...], preferred_element_type=jnp.float32)

    @pl.when(k == pl.num_programs(2) - 1)
    def _fin():
        out = acc_ref[...] + b_ref[...]
        if relu:
            out = jnp.maximum(out, 0.0)
        o_ref[...] = out.astype(o_ref.dtype)


def matmul_bias_act(x, w, b, *, relu, out_dtype, tm=1024, tn=512, tk=2048):
    """out = relu?(x @ w + b). bf16 MXU operands, fp32 accumulation."""
    M, K = x.shape
    K2, N = w.shape
    assert K == K2
    x = x.astype(jnp.bfloat16)
    w = w.astype(jnp.bfloat16)
    b = b.reshape(1, N).astype(jnp.float32)

    # --- M (sublane) tiling; split in two when there would be a single tile (megacore).
    Mp = _round_up(M, 8)
    tm_eff = Mp if Mp <= tm else tm
    if Mp > 8 and Mp // tm_eff < 2:
        tm_eff = _round_up(max(Mp // 2, 8), 8)
    Mp = _round_up(Mp, tm_eff)
    if Mp != M:
        x = jnp.pad(x, ((0, Mp - M), (0, 0)))
    # --- N (lane) tiling: keep N whole when it fits one tile.
    tn_eff = N if N <= tn else tn
    Np = _round_up(N, tn_eff)
    if Np != N:
        w = jnp.pad(w, ((0, 0), (0, Np - N)))
        b = jnp.pad(b, ((0, 0), (0, Np - N)))

    if K <= tk:
        # Single K step: no accumulator scratch, no HBM-side K padding.
        Kp = K
        grid = (Mp // tm_eff, Np // tn_eff)
        kernel = functools.partial(_mm_single_kernel, relu=relu)
        in_specs = [
            pl.BlockSpec((tm_eff, K), lambda i, j: (i, 0)),
            pl.BlockSpec((K, tn_eff), lambda i, j: (0, j)),
            pl.BlockSpec((1, tn_eff), lambda i, j: (0, j)),
        ]
        out_specs = pl.BlockSpec((tm_eff, tn_eff), lambda i, j: (i, j))
        scratch_shapes = []
        dims = ("parallel", "parallel")
    else:
        # Large-K fallback (e.g. full-volume fc1): tile K with an fp32 VMEM accumulator.
        tk_eff = tk
        Kp = _round_up(K, tk_eff)
        x = jnp.pad(x, ((0, 0), (0, Kp - K)))
        w = jnp.pad(w, ((0, Kp - K), (0, 0)))
        grid = (Mp // tm_eff, Np // tn_eff, Kp // tk_eff)
        kernel = functools.partial(_mm_multi_kernel, relu=relu)
        in_specs = [
            pl.BlockSpec((tm_eff, tk_eff), lambda i, j, k: (i, k)),
            pl.BlockSpec((tk_eff, tn_eff), lambda i, j, k: (k, j)),
            pl.BlockSpec((1, tn_eff), lambda i, j, k: (0, j)),
        ]
        out_specs = pl.BlockSpec((tm_eff, tn_eff), lambda i, j, k: (i, j))
        scratch_shapes = [pltpu.VMEM((tm_eff, tn_eff), jnp.float32)]
        dims = ("parallel", "parallel", "arbitrary")

    out = pl.pallas_call(
        kernel,
        out_shape=jax.ShapeDtypeStruct((Mp, Np), out_dtype),
        grid=grid,
        in_specs=in_specs,
        out_specs=out_specs,
        scratch_shapes=scratch_shapes,
        compiler_params=pltpu.CompilerParams(
            dimension_semantics=dims,
            vmem_limit_bytes=32 * 1024 * 1024,
        ),
        cost_estimate=pl.CostEstimate(
            flops=2 * Mp * Np * Kp,
            transcendentals=0,
            bytes_accessed=(Mp * Kp + Kp * Np) * 2
            + Mp * Np * jnp.dtype(out_dtype).itemsize + Np * 4,
        ),
    )(x, w, b)

    if (Mp, Np) != (M, N):
        out = out[:M, :N]
    return out


# ----------------------------------------------------------------------------
# Fused conv kernel (conv2 / conv3): im2col lives in VMEM, not HBM.
# One grid step = one output depth-plane. The input slab is phase-split so each
# of the 9 (kh, kw) tap groups is a CONTIGUOUS row window; kd & cin are packed
# on lanes so every tap-group matmul contracts over K = 3*Cin.
# ----------------------------------------------------------------------------
def _fused_conv_kernel(slab_ref, w_ref, b_ref, o_ref, *, wp2, lv):
    # slab_ref: (4, Hp2*Wp2, 3*Cin) bf16   w_ref: (9, 3*Cin, Cout) bf16 (resident)
    # b_ref: (1, Cout) f32                 o_ref: (Lv, Cout) bf16
    cout = w_ref.shape[-1]
    acc = jnp.zeros((lv, cout), jnp.float32)
    for kh in range(3):
        qh, ph = kh // 2, kh % 2
        for kw in range(3):
            qw, pw = kw // 2, kw % 2
            lhs = slab_ref[ph * 2 + pw, pl.ds(qh * wp2 + qw, lv), :]
            acc = acc + jnp.dot(lhs, w_ref[kh * 3 + kw],
                                preferred_element_type=jnp.float32)
    out = jnp.maximum(acc + b_ref[...], 0.0)
    o_ref[...] = out.astype(o_ref.dtype)


def fused_conv3d_relu(slabs, w9, b, *, geom, out_dtype=jnp.bfloat16):
    S, P, HW, K3 = slabs.shape
    cout = w9.shape[-1]
    wp2, lv = geom["Wp2"], geom["Lv"]
    kernel = functools.partial(_fused_conv_kernel, wp2=wp2, lv=lv)
    return pl.pallas_call(
        kernel,
        out_shape=jax.ShapeDtypeStruct((S, lv, cout), out_dtype),
        grid=(S,),
        in_specs=[
            pl.BlockSpec((None, P, HW, K3), lambda i: (i, 0, 0, 0)),
            pl.BlockSpec((9, K3, cout), lambda i: (0, 0, 0)),
            pl.BlockSpec((1, cout), lambda i: (0, 0)),
        ],
        out_specs=pl.BlockSpec((None, lv, cout), lambda i: (i, 0, 0)),
        compiler_params=pltpu.CompilerParams(
            dimension_semantics=("parallel",),
            vmem_limit_bytes=32 * 1024 * 1024,
        ),
        cost_estimate=pl.CostEstimate(
            flops=2 * S * 9 * lv * K3 * cout,
            transcendentals=0,
            bytes_accessed=slabs.size * 2 + w9.size * 2 + S * lv * cout * 2,
        ),
    )(slabs, w9.astype(jnp.bfloat16), b.reshape(1, cout).astype(jnp.float32))


def _phase_slabs(x, geom):
    """NDHWC activation -> (N*Do, 4, Hp2*Wp2, 3*C) per-output-plane slabs.

    Axis 1 = (H,W) parity phase, axis 2 = half-resolution (h, w) row, axis 3 packs
    (kd, cin). This single rearrangement (~1x activation bytes, fused by XLA) replaces
    the HBM-resident (M, 27*C) im2col patch matrix of the previous version.
    """
    N, D, H, W, C = x.shape
    g = geom
    xp = jnp.pad(x, ((0, 0), (1, 1), (1, g["Hp"] - H - 1), (1, g["Wp"] - W - 1), (0, 0)))
    xr = xp.reshape(N, D + 2, g["Hp2"], 2, g["Wp2"], 2, C).transpose(0, 1, 3, 5, 2, 4, 6)
    planes = [xr[:, kd: kd + 2 * g["Do"] - 1: 2] for kd in range(3)]   # D planes 2*do + kd
    slabs = jnp.stack(planes, axis=-2)                                  # (N,Do,2,2,Hp2,Wp2,3,C)
    return slabs.reshape(N * g["Do"], 4, g["Hp2"] * g["Wp2"], 3 * C)


def _unpack_fused(y, n, c, geom):
    """(N*Do, Lv, C) fused layout -> (N, Do, Ho, Wo, C) dense activation."""
    g = geom
    y = y.reshape(n, g["Do"], g["Lv"], c)
    y = jnp.pad(y, ((0, 0), (0, 0), (0, g["Ho"] * g["Wp2"] - g["Lv"]), (0, 0)))
    return y.reshape(n, g["Do"], g["Ho"], g["Wp2"], c)[:, :, :, : g["Wo"], :]


def _im2col_3d(x, k=3, stride=2, pad=1):
    """Patch extraction for conv1 (Cin=1): order (kd, kh, kw, cin) matches the weight."""
    N, D, H, W, C = x.shape
    xp = jnp.pad(x, ((0, 0), (pad, pad), (pad, pad), (pad, pad), (0, 0)))
    Do, Ho, Wo = _conv_out(D), _conv_out(H), _conv_out(W)
    cols = []
    for kd in range(k):
        for kh in range(k):
            for kw in range(k):
                cols.append(xp[:, kd:kd + stride * Do:stride,
                                  kh:kh + stride * Ho:stride,
                                  kw:kw + stride * Wo:stride, :])
    patches = jnp.stack(cols, axis=4).reshape(N * Do * Ho * Wo, k * k * k * C)
    return patches, (N, Do, Ho, Wo)


# ----------------------------------------------------------------------------
# Encoder forward: conv1(relu) -> conv2(relu) -> conv3(relu) -> flatten -> fc1
# ----------------------------------------------------------------------------
@jax.jit
def encoder_forward(x_ncdhw, params):
    x = jnp.transpose(x_ncdhw, (0, 2, 3, 4, 1)).astype(jnp.bfloat16)   # NCDHW -> NDHWC bf16
    n = x.shape[0]

    # conv1 (Cin=1): im2col matmul, K=27 unpadded, bf16 output.
    w1, b1 = params["conv1"]
    patches, (_, do1, ho1, wo1) = _im2col_3d(x)
    y1 = matmul_bias_act(patches, w1, b1, relu=True, out_dtype=jnp.bfloat16)
    x = y1.reshape(n, do1, ho1, wo1, w1.shape[-1])

    # conv2 / conv3: fused (im2col-in-VMEM) conv kernel.
    g2 = _conv_geom(*x.shape[1:4])
    w2, b2 = params["conv2"]
    y2 = fused_conv3d_relu(_phase_slabs(x, g2), w2, b2, geom=g2)
    x = _unpack_fused(y2, n, w2.shape[-1], g2)

    g3 = _conv_geom(*x.shape[1:4])
    w3, b3 = params["conv3"]
    y3 = fused_conv3d_relu(_phase_slabs(x, g3), w3, b3, geom=g3)

    # fc1 consumes conv3's fused layout directly (junk rows have zero weight rows).
    fw, fb = params["fc1"]
    flat = y3.reshape(n, -1)
    return matmul_bias_act(flat, fw, fb, relu=False, out_dtype=jnp.float32, tn=512)


# Pure-JAX fp32 reference (PyTorch semantics, incl. NCDHW flatten order for fc1).
def encoder_reference(x_ncdhw, params):
    x = jnp.transpose(x_ncdhw, (0, 2, 3, 4, 1))
    for name in ("conv1", "conv2", "conv3"):
        w, b = params[name]
        x = lax.conv_general_dilated(
            x, w, window_strides=(2, 2, 2), padding=[(1, 1)] * 3,
            dimension_numbers=("NDHWC", "DHWIO", "NDHWC"),
            precision=lax.Precision.HIGHEST)
        x = jnp.maximum(x + b, 0.0)
    n = x.shape[0]
    flat = jnp.transpose(x, (0, 4, 1, 2, 3)).reshape(n, -1)
    fw, fb = params["fc1"]
    return jnp.dot(flat, fw, precision=lax.Precision.HIGHEST) + fb


def init_params(key, in_shape, hidden=512):
    """Deterministic synthetic params. Conv weights DHWIO; fc1 in x@W (feat, hidden) layout."""
    d, h, w = in_shape
    chans = [(1, 32), (32, 64), (64, 128)]
    params = {}
    keys = jax.random.split(key, 8)
    ki = 0
    for li, (cin, cout) in enumerate(chans, start=1):
        fan_in = cin * 27
        wk = jax.random.normal(keys[ki], (3, 3, 3, cin, cout), jnp.float32) / np.sqrt(fan_in)
        bk = 0.01 * jax.random.normal(keys[ki + 1], (cout,), jnp.float32)
        params[f"conv{li}"] = (wk, bk)
        ki += 2
        d, h, w = _conv_out(d), _conv_out(h), _conv_out(w)
    feat = 128 * d * h * w
    fw = jax.random.normal(keys[ki], (feat, hidden), jnp.float32) / np.sqrt(feat)
    fb = 0.01 * jax.random.normal(keys[ki + 1], (hidden,), jnp.float32)
    params["fc1"] = (fw, fb)
    return params


def prepare_kernel_params(params, in_shape):
    """One-time repacking of PyTorch-layout weights into the kernels' layouts (bf16)."""
    g1 = _conv_geom(*in_shape)
    g2 = _conv_geom(g1["Do"], g1["Ho"], g1["Wo"])
    g3 = _conv_geom(g2["Do"], g2["Ho"], g2["Wo"])

    kp = {}
    w1, b1 = params["conv1"]
    kp["conv1"] = (jnp.asarray(w1).reshape(27, w1.shape[-1]).astype(jnp.bfloat16),
                   jnp.asarray(b1, jnp.float32))
    for name in ("conv2", "conv3"):
        wc, bc = params[name]
        cin, cout = wc.shape[-2], wc.shape[-1]
        w9 = jnp.asarray(wc).transpose(1, 2, 0, 3, 4).reshape(9, 3 * cin, cout)
        kp[name] = (w9.astype(jnp.bfloat16), jnp.asarray(bc, jnp.float32))

    # fc1: rows re-indexed from PyTorch (C,D,H,W) flatten order to conv3's fused
    # (do, ho*Wp2+wo, c) output layout; row-padding ("junk") positions get zero rows.
    fw, fb = params["fc1"]
    fw = np.asarray(fw)
    c3 = params["conv3"][0].shape[-1]
    do3, ho3, wo3 = g3["Do"], g3["Ho"], g3["Wo"]
    wp2, lv = g3["Wp2"], g3["Lv"]
    assert fw.shape[0] == c3 * do3 * ho3 * wo3
    r = np.arange(lv)
    ho = r // wp2
    wo = np.minimum(r % wp2, wo3 - 1)
    valid = (r % wp2) < wo3
    do = np.arange(do3)[:, None, None]
    c = np.arange(c3)[None, None, :]
    gidx = ((c * do3 + do) * ho3 + ho[None, :, None]) * wo3 + wo[None, :, None]
    fw_new = fw[gidx] * valid[None, :, None, None].astype(fw.dtype)
    fw_new = fw_new.reshape(do3 * lv * c3, fw.shape[1])
    kp["fc1"] = (jnp.asarray(fw_new, jnp.bfloat16), jnp.asarray(fb, jnp.float32))
    return kp


if __name__ == "__main__":
    key = jax.random.PRNGKey(0)
    k_x, k_p = jax.random.split(key)

    # Small, shape-consistent stand-in for the fMRI volume:
    # batch=2, channels=1, spatial 16^3 -> conv stack -> (128, 2, 2, 2) -> fc1 -> 512.
    in_shape = (16, 16, 16)
    x = jax.random.normal(k_x, (2, 1) + in_shape, jnp.float32)
    params = init_params(k_p, in_shape, hidden=512)
    kparams = prepare_kernel_params(params, in_shape)

    out = jax.block_until_ready(encoder_forward(x, kparams))
    ref = jax.block_until_ready(encoder_reference(x, params))

    assert out.shape == (2, 512), out.shape
    # bf16 MXU operands with fp32 accumulation: allow 2e-2 max relative error.
    err = float(jnp.max(jnp.abs(out - ref)) / (jnp.max(jnp.abs(ref)) + 1e-6))
    assert err < 2e-2, f"relative error too large: {err}"

    print("KERNEL_OK")
</pallas_src>

<mosaic_0001>
module attributes {stable_mosaic.version = 11 : i64} {
  func.func @_mm_single_kernel(%arg0: i32, %arg1: i32, %arg2: memref<512x27xbf16, #tpu.memory_space<vmem>>, %arg3: memref<27x32xbf16, #tpu.memory_space<vmem>>, %arg4: memref<1x32xf32, #tpu.memory_space<vmem>>, %arg5: memref<512x32xbf16, #tpu.memory_space<vmem>>) attributes {dimension_semantics = [#tpu.dimension_semantics<parallel>, #tpu.dimension_semantics<parallel>], iteration_bounds = array<i64: 2, 1>, scalar_prefetch = 0 : i64, scratch_operands = 0 : i64, tpu.core_type = #tpu.core_type<tc>, window_params = [{transform_indices = @transform_0, window_bounds = array<i64: 512, 27>}, {transform_indices = @transform_1, window_bounds = array<i64: 27, 32>}, {transform_indices = @transform_2, window_bounds = array<i64: 1, 32>}, {transform_indices = @transform_3, window_bounds = array<i64: 512, 32>}]} {
    %c0 = arith.constant 0 : index
    %c0_0 = arith.constant 0 : index
    %0 = vector.load %arg2[%c0, %c0_0] : memref<512x27xbf16, #tpu.memory_space<vmem>>, vector<512x27xbf16>
    %c0_1 = arith.constant 0 : index
    %c0_2 = arith.constant 0 : index
    %1 = vector.load %arg3[%c0_1, %c0_2] : memref<27x32xbf16, #tpu.memory_space<vmem>>, vector<27x32xbf16>
    %cst = arith.constant dense<0.000000e+00> : vector<512x32xf32>
    %2 = tpu.matmul %0, %1, %cst {dimension_numbers = #tpu.dot_dimension_numbers<[1], [0], [0], [1], [0, 0, 1, 1], [], []>} : vector<512x27xbf16>, vector<27x32xbf16>, vector<512x32xf32> -> vector<512x32xf32>
    %c0_3 = arith.constant 0 : index
    %c0_4 = arith.constant 0 : index
    %3 = vector.load %arg4[%c0_3, %c0_4] : memref<1x32xf32, #tpu.memory_space<vmem>>, vector<1x32xf32>
    %4 = vector.broadcast %3 : vector<1x32xf32> to vector<512x32xf32>
    %5 = arith.addf %2, %4 : vector<512x32xf32>
    %cst_5 = arith.constant 0.000000e+00 : f32
    %6 = vector.broadcast %cst_5 : f32 to vector<512x32xf32>
    %7 = arith.maximumf %5, %6 : vector<512x32xf32>
    %8 = arith.truncf %7 : vector<512x32xf32> to vector<512x32xbf16>
    %c0_6 = arith.constant 0 : index
    %c0_7 = arith.constant 0 : index
    %9 = vector.load %arg5[%c0_6, %c0_7] : memref<512x32xbf16, #tpu.memory_space<vmem>>, vector<512x32xbf16>
    tpu.vector_store %arg5[%c0_6, %c0_7], %8 {strides = array<i32>} : memref<512x32xbf16, #tpu.memory_space<vmem>>, vector<512x32xbf16>,
    return
  }
  func.func @transform_0(%arg0: i32, %arg1: i32) -> (i32, i32) {
    %c0_i32 = arith.constant 0 : i32
    %c0_i32_0 = arith.constant 0 : i32
    return %arg0, %c0_i32 : i32, i32
  }
  func.func @transform_1(%arg0: i32, %arg1: i32) -> (i32, i32) {
    %c0_i32 = arith.constant 0 : i32
    %c0_i32_0 = arith.constant 0 : i32
    return %c0_i32, %arg1 : i32, i32
  }
  func.func @transform_2(%arg0: i32, %arg1: i32) -> (i32, i32) {
    %c0_i32 = arith.constant 0 : i32
    %c0_i32_0 = arith.constant 0 : i32
    return %c0_i32, %arg1 : i32, i32
  }
  func.func @transform_3(%arg0: i32, %arg1: i32) -> (i32, i32) {
    %c0_i32 = arith.constant 0 : i32
    return %arg0, %arg1 : i32, i32
  }
}

module attributes {stable_mosaic.version = 11 : i64} {
  func.func @_fused_conv_kernel(%arg0: i32, %arg1: memref<1x4x25x96xbf16, #tpu.memory_space<vmem>>, %arg2: memref<9x96x64xbf16, #tpu.memory_space<vmem>>, %arg3: memref<1x64xf32, #tpu.memory_space<vmem>>, %arg4: memref<1x19x64xbf16, #tpu.memory_space<vmem>>) attributes {dimension_semantics = [#tpu.dimension_semantics<parallel>], iteration_bounds = array<i64: 8>, scalar_prefetch = 0 : i64, scratch_operands = 0 : i64, tpu.core_type = #tpu.core_type<tc>, window_params = [{transform_indices = @transform_0, window_bounds = array<i64: 1, 4, 25, 96>}, {pipeline_mode = #tpu.pipeline_mode<synchronous>, transform_indices = @transform_1, window_bounds = array<i64: 9, 96, 64>}, {pipeline_mode = #tpu.pipeline_mode<synchronous>, transform_indices = @transform_2, window_bounds = array<i64: 1, 64>}, {transform_indices = @transform_3, window_bounds = array<i64: 1, 19, 64>}]} {
    %cst = arith.constant 0.000000e+00 : f32
    %0 = vector.broadcast %cst : f32 to vector<19x64xf32>
    %c0 = arith.constant 0 : index
    %c0_0 = arith.constant 0 : index
    %c0_1 = arith.constant 0 : index
    %c0_2 = arith.constant 0 : index
    %1 = vector.load %arg1[%c0, %c0_0, %c0_1, %c0_2] : memref<1x4x25x96xbf16, #tpu.memory_space<vmem>>, vector<1x1x19x96xbf16>
    %2 = vector.shape_cast %1 : vector<1x1x19x96xbf16> to vector<19x96xbf16>
    %c0_3 = arith.constant 0 : index
    %c0_4 = arith.constant 0 : index
    %c0_5 = arith.constant 0 : index
    %3 = vector.load %arg2[%c0_3, %c0_4, %c0_5] : memref<9x96x64xbf16, #tpu.memory_space<vmem>>, vector<1x96x64xbf16>
    %4 = vector.shape_cast %3 : vector<1x96x64xbf16> to vector<96x64xbf16>
    %cst_6 = arith.constant dense<0.000000e+00> : vector<19x64xf32>
    %5 = tpu.matmul %2, %4, %cst_6 {dimension_numbers = #tpu.dot_dimension_numbers<[1], [0], [0], [1], [0, 0, 1, 1], [], []>} : vector<19x96xbf16>, vector<96x64xbf16>, vector<19x64xf32> -> vector<19x64xf32>
    %6 = arith.addf %0, %5 : vector<19x64xf32>
    %c0_7 = arith.constant 0 : index
    %c1 = arith.constant 1 : index
    %c0_8 = arith.constant 0 : index
    %c0_9 = arith.constant 0 : index
    %7 = vector.load %arg1[%c0_7, %c1, %c0_8, %c0_9] : memref<1x4x25x96xbf16, #tpu.memory_space<vmem>>, vector<1x1x19x96xbf16>
    %8 = vector.shape_cast %7 : vector<1x1x19x96xbf16> to vector<19x96xbf16>
    %c1_10 = arith.constant 1 : index
    %c0_11 = arith.constant 0 : index
    %c0_12 = arith.constant 0 : index
    %9 = vector.load %arg2[%c1_10, %c0_11, %c0_12] : memref<9x96x64xbf16, #tpu.memory_space<vmem>>, vector<1x96x64xbf16>
    %10 = vector.shape_cast %9 : vector<1x96x64xbf16> to vector<96x64xbf16>
    %cst_13 = arith.constant dense<0.000000e+00> : vector<19x64xf32>
    %11 = tpu.matmul %8, %10, %cst_13 {dimension_numbers = #tpu.dot_dimension_numbers<[1], [0], [0], [1], [0, 0, 1, 1], [], []>} : vector<19x96xbf16>, vector<96x64xbf16>, vector<19x64xf32> -> vector<19x64xf32>
    %12 = arith.addf %6, %11 : vector<19x64xf32>
    %c0_14 = arith.constant 0 : index
    %c0_15 = arith.constant 0 : index
    %c1_16 = arith.constant 1 : index
    %c0_17 = arith.constant 0 : index
    %13 = vector.load %arg1[%c0_14, %c0_15, %c1_16, %c0_17] : memref<1x4x25x96xbf16, #tpu.memory_space<vmem>>, vector<1x1x19x96xbf16>
    %14 = vector.shape_cast %13 : vector<1x1x19x96xbf16> to vector<19x96xbf16>
    %c2 = arith.constant 2 : index
    %c0_18 = arith.constant 0 : index
    %c0_19 = arith.constant 0 : index
    %15 = vector.load %arg2[%c2, %c0_18, %c0_19] : memref<9x96x64xbf16, #tpu.memory_space<vmem>>, vector<1x96x64xbf16>
    %16 = vector.shape_cast %15 : vector<1x96x64xbf16> to vector<96x64xbf16>
    %cst_20 = arith.constant dense<0.000000e+00> : vector<19x64xf32>
    %17 = tpu.matmul %14, %16, %cst_20 {dimension_numbers = #tpu.dot_dimension_numbers<[1], [0], [0], [1], [0, 0, 1, 1], [], []>} : vector<19x96xbf16>, vector<96x64xbf16>, vector<19x64xf32> -> vector<19x64xf32>
    %18 = arith.addf %12, %17 : vector<19x64xf32>
    %c0_21 = arith.constant 0 : index
    %c2_22 = arith.constant 2 : index
    %c0_23 = arith.constant 0 : index
    %c0_24 = arith.constant 0 : index
    %19 = vector.load %arg1[%c0_21, %c2_22, %c0_23, %c0_24] : memref<1x4x25x96xbf16, #tpu.memory_space<vmem>>, vector<1x1x19x96xbf16>
    %20 = vector.shape_cast %19 : vector<1x1x19x96xbf16> to vector<19x96xbf16>
    %c3 = arith.constant 3 : index
    %c0_25 = arith.constant 0 : index
    %c0_26 = arith.constant 0 : index
    %21 = vector.load %arg2[%c3, %c0_25, %c0_26] : memref<9x96x64xbf16, #tpu.memory_space<vmem>>, vector<1x96x64xbf16>
    %22 = vector.shape_cast %21 : vector<1x96x64xbf16> to vector<96x64xbf16>
    %cst_27 = arith.constant dense<0.000000e+00> : vector<19x64xf32>
    %23 = tpu.matmul %20, %22, %cst_27 {dimension_numbers = #tpu.dot_dimension_numbers<[1], [0], [0], [1], [0, 0, 1, 1], [], []>} : vector<19x96xbf16>, vector<96x64xbf16>, vector<19x64xf32> -> vector<19x64xf32>
    %24 = arith.addf %18, %23 : vector<19x64xf32>
    %c0_28 = arith.constant 0 : index
    %c3_29 = arith.constant 3 : index
    %c0_30 = arith.constant 0 : index
    %c0_31 = arith.constant 0 : index
    %25 = vector.load %arg1[%c0_28, %c3_29, %c0_30, %c0_31] : memref<1x4x25x96xbf16, #tpu.memory_space<vmem>>, vector<1x1x19x96xbf16>
    %26 = vector.shape_cast %25 : vector<1x1x19x96xbf16> to vector<19x96xbf16>
    %c4 = arith.constant 4 : index
    %c0_32 = arith.constant 0 : index
    %c0_33 = arith.constant 0 : index
    %27 = vector.load %arg2[%c4, %c0_32, %c0_33] : memref<9x96x64xbf16, #tpu.memory_space<vmem>>, vector<1x96x64xbf16>
    %28 = vector.shape_cast %27 : vector<1x96x64xbf16> to vector<96x64xbf16>
    %cst_34 = arith.constant dense<0.000000e+00> : vector<19x64xf32>
    %29 = tpu.matmul %26, %28, %cst_34 {dimension_numbers = #tpu.dot_dimension_numbers<[1], [0], [0], [1], [0, 0, 1, 1], [], []>} : vector<19x96xbf16>, vector<96x64xbf16>, vector<19x64xf32> -> vector<19x64xf32>
    %30 = arith.addf %24, %29 : vector<19x64xf32>
    %c0_35 = arith.constant 0 : index
    %c2_36 = arith.constant 2 : index
    %c1_37 = arith.constant 1 : index
    %c0_38 = arith.constant 0 : index
    %31 = vector.load %arg1[%c0_35, %c2_36, %c1_37, %c0_38] : memref<1x4x25x96xbf16, #tpu.memory_space<vmem>>, vector<1x1x19x96xbf16>
    %32 = vector.shape_cast %31 : vector<1x1x19x96xbf16> to vector<19x96xbf16>
    %c5 = arith.constant 5 : index
    %c0_39 = arith.constant 0 : index
    %c0_40 = arith.constant 0 : index
    %33 = vector.load %arg2[%c5, %c0_39, %c0_40] : memref<9x96x64xbf16, #tpu.memory_space<vmem>>, vector<1x96x64xbf16>
    %34 = vector.shape_cast %33 : vector<1x96x64xbf16> to vector<96x64xbf16>
    %cst_41 = arith.constant dense<0.000000e+00> : vector<19x64xf32>
    %35 = tpu.matmul %32, %34, %cst_41 {dimension_numbers = #tpu.dot_dimension_numbers<[1], [0], [0], [1], [0, 0, 1, 1], [], []>} : vector<19x96xbf16>, vector<96x64xbf16>, vector<19x64xf32> -> vector<19x64xf32>
    %36 = arith.addf %30, %35 : vector<19x64xf32>
    %c0_42 = arith.constant 0 : index
    %c0_43 = arith.constant 0 : index
    %c5_44 = arith.constant 5 : index
    %c0_45 = arith.constant 0 : index
    %37 = vector.load %arg1[%c0_42, %c0_43, %c5_44, %c0_45] : memref<1x4x25x96xbf16, #tpu.memory_space<vmem>>, vector<1x1x19x96xbf16>
    %38 = vector.shape_cast %37 : vector<1x1x19x96xbf16> to vector<19x96xbf16>
    %c6 = arith.constant 6 : index
    %c0_46 = arith.constant 0 : index
    %c0_47 = arith.constant 0 : index
    %39 = vector.load %arg2[%c6, %c0_46, %c0_47] : memref<9x96x64xbf16, #tpu.memory_space<vmem>>, vector<1x96x64xbf16>
    %40 = vector.shape_cast %39 : vector<1x96x64xbf16> to vector<96x64xbf16>
    %cst_48 = arith.constant dense<0.000000e+00> : vector<19x64xf32>
    %41 = tpu.matmul %38, %40, %cst_48 {dimension_numbers = #tpu.dot_dimension_numbers<[1], [0], [0], [1], [0, 0, 1, 1], [], []>} : vector<19x96xbf16>, vector<96x64xbf16>, vector<19x64xf32> -> vector<19x64xf32>
    %42 = arith.addf %36, %41 : vector<19x64xf32>
    %c0_49 = arith.constant 0 : index
    %c1_50 = arith.constant 1 : index
    %c5_51 = arith.constant 5 : index
    %c0_52 = arith.constant 0 : index
    %43 = vector.load %arg1[%c0_49, %c1_50, %c5_51, %c0_52] : memref<1x4x25x96xbf16, #tpu.memory_space<vmem>>, vector<1x1x19x96xbf16>
    %44 = vector.shape_cast %43 : vector<1x1x19x96xbf16> to vector<19x96xbf16>
    %c7 = arith.constant 7 : index
    %c0_53 = arith.constant 0 : index
    %c0_54 = arith.constant 0 : index
    %45 = vector.load %arg2[%c7, %c0_53, %c0_54] : memref<9x96x64xbf16, #tpu.memory_space<vmem>>, vector<1x96x64xbf16>
    %46 = vector.shape_cast %45 : vector<1x96x64xbf16> to vector<96x64xbf16>
    %cst_55 = arith.constant dense<0.000000e+00> : vector<19x64xf32>
    %47 = tpu.matmul %44, %46, %cst_55 {dimension_numbers = #tpu.dot_dimension_numbers<[1], [0], [0], [1], [0, 0, 1, 1], [], []>} : vector<19x96xbf16>, vector<96x64xbf16>, vector<19x64xf32> -> vector<19x64xf32>
    %48 = arith.addf %42, %47 : vector<19x64xf32>
    %c0_56 = arith.constant 0 : index
    %c0_57 = arith.constant 0 : index
    %c6_58 = arith.constant 6 : index
    %c0_59 = arith.constant 0 : index
    %49 = vector.load %arg1[%c0_56, %c0_57, %c6_58, %c0_59] : memref<1x4x25x96xbf16, #tpu.memory_space<vmem>>, vector<1x1x19x96xbf16>
    %50 = vector.shape_cast %49 : vector<1x1x19x96xbf16> to vector<19x96xbf16>
    %c8 = arith.constant 8 : index
    %c0_60 = arith.constant 0 : index
    %c0_61 = arith.constant 0 : index
    %51 = vector.load %arg2[%c8, %c0_60, %c0_61] : memref<9x96x64xbf16, #tpu.memory_space<vmem>>, vector<1x96x64xbf16>
    %52 = vector.shape_cast %51 : vector<1x96x64xbf16> to vector<96x64xbf16>
    %cst_62 = arith.constant dense<0.000000e+00> : vector<19x64xf32>
    %53 = tpu.matmul %50, %52, %cst_62 {dimension_numbers = #tpu.dot_dimension_numbers<[1], [0], [0], [1], [0, 0, 1, 1], [], []>} : vector<19x96xbf16>, vector<96x64xbf16>, vector<19x64xf32> -> vector<19x64xf32>
    %54 = arith.addf %48, %53 : vector<19x64xf32>
    %c0_63 = arith.constant 0 : index
    %c0_64 = arith.constant 0 : index
    %55 = vector.load %arg3[%c0_63, %c0_64] : memref<1x64xf32, #tpu.memory_space<vmem>>, vector<1x64xf32>
    %56 = vector.broadcast %55 : vector<1x64xf32> to vector<19x64xf32>
    %57 = arith.addf %54, %56 : vector<19x64xf32>
    %cst_65 = arith.constant 0.000000e+00 : f32
    %58 = vector.broadcast %cst_65 : f32 to vector<19x64xf32>
    %59 = arith.maximumf %57, %58 : vector<19x64xf32>
    %60 = arith.truncf %59 : vector<19x64xf32> to vector<19x64xbf16>
    %c0_66 = arith.constant 0 : index
    %c0_67 = arith.constant 0 : index
    %c0_68 = arith.constant 0 : index
    %61 = vector.load %arg4[%c0_66, %c0_67, %c0_68] : memref<1x19x64xbf16, #tpu.memory_space<vmem>>, vector<1x19x64xbf16>
    %62 = vector.shape_cast %61 : vector<1x19x64xbf16> to vector<19x64xbf16>
    %63 = vector.shape_cast %60 : vector<19x64xbf16> to vector<1x19x64xbf16>
    tpu.vector_store %arg4[%c0_66, %c0_67, %c0_68], %63 {strides = array<i32>} : memref<1x19x64xbf16, #tpu.memory_space<vmem>>, vector<1x19x64xbf16>,
    return
  }
  func.func @transform_0(%arg0: i32) -> (i32, i32, i32, i32) {
    %c0_i32 = arith.constant 0 : i32
    %c0_i32_0 = arith.constant 0 : i32
    %c0_i32_1 = arith.constant 0 : i32
    %c0_i32_2 = arith.constant 0 : i32
    return %arg0, %c0_i32, %c0_i32_0, %c0_i32_1 : i32, i32, i32, i32
  }
  func.func @transform_1(%arg0: i32) -> (i32, i32, i32) {
    %c0_i32 = arith.constant 0 : i32
    %c0_i32_0 = arith.constant 0 : i32
    %c0_i32_1 = arith.constant 0 : i32
    %c0_i32_2 = arith.constant 0 : i32
    return %c0_i32, %c0_i32_0, %c0_i32_1 : i32, i32, i32
  }
  func.func @transform_2(%arg0: i32) -> (i32, i32) {
    %c0_i32 = arith.constant 0 : i32
    %c0_i32_0 = arith.constant 0 : i32
    %c0_i32_1 = arith.constant 0 : i32
    return %c0_i32, %c0_i32_0 : i32, i32
  }
  func.func @transform_3(%arg0: i32) -> (i32, i32, i32) {
    %c0_i32 = arith.constant 0 : i32
    %c0_i32_0 = arith.constant 0 : i32
    %c0_i32_1 = arith.constant 0 : i32
    return %arg0, %c0_i32, %c0_i32_0 : i32, i32, i32
  }
}

module attributes {stable_mosaic.version = 11 : i64} {
  func.func @_fused_conv_kernel(%arg0: i32, %arg1: memref<1x4x9x192xbf16, #tpu.memory_space<vmem>>, %arg2: memref<9x192x128xbf16, #tpu.memory_space<vmem>>, %arg3: memref<1x128xf32, #tpu.memory_space<vmem>>, %arg4: memref<1x5x128xbf16, #tpu.memory_space<vmem>>) attributes {dimension_semantics = [#tpu.dimension_semantics<parallel>], iteration_bounds = array<i64: 4>, scalar_prefetch = 0 : i64, scratch_operands = 0 : i64, tpu.core_type = #tpu.core_type<tc>, window_params = [{transform_indices = @transform_0, window_bounds = array<i64: 1, 4, 9, 192>}, {pipeline_mode = #tpu.pipeline_mode<synchronous>, transform_indices = @transform_1, window_bounds = array<i64: 9, 192, 128>}, {pipeline_mode = #tpu.pipeline_mode<synchronous>, transform_indices = @transform_2, window_bounds = array<i64: 1, 128>}, {transform_indices = @transform_3, window_bounds = array<i64: 1, 5, 128>}]} {
    %cst = arith.constant 0.000000e+00 : f32
    %0 = vector.broadcast %cst : f32 to vector<5x128xf32>
    %c0 = arith.constant 0 : index
    %c0_0 = arith.constant 0 : index
    %c0_1 = arith.constant 0 : index
    %c0_2 = arith.constant 0 : index
    %1 = vector.load %arg1[%c0, %c0_0, %c0_1, %c0_2] : memref<1x4x9x192xbf16, #tpu.memory_space<vmem>>, vector<1x1x5x192xbf16>
    %2 = vector.shape_cast %1 : vector<1x1x5x192xbf16> to vector<5x192xbf16>
    %c0_3 = arith.constant 0 : index
    %c0_4 = arith.constant 0 : index
    %c0_5 = arith.constant 0 : index
    %3 = vector.load %arg2[%c0_3, %c0_4, %c0_5] : memref<9x192x128xbf16, #tpu.memory_space<vmem>>, vector<1x192x128xbf16>
    %4 = vector.shape_cast %3 : vector<1x192x128xbf16> to vector<192x128xbf16>
    %cst_6 = arith.constant dense<0.000000e+00> : vector<5x128xf32>
    %5 = tpu.matmul %2, %4, %cst_6 {dimension_numbers = #tpu.dot_dimension_numbers<[1], [0], [0], [1], [0, 0, 1, 1], [], []>} : vector<5x192xbf16>, vector<192x128xbf16>, vector<5x128xf32> -> vector<5x128xf32>
    %6 = arith.addf %0, %5 : vector<5x128xf32>
    %c0_7 = arith.constant 0 : index
    %c1 = arith.constant 1 : index
    %c0_8 = arith.constant 0 : index
    %c0_9 = arith.constant 0 : index
    %7 = vector.load %arg1[%c0_7, %c1, %c0_8, %c0_9] : memref<1x4x9x192xbf16, #tpu.memory_space<vmem>>, vector<1x1x5x192xbf16>
    %8 = vector.shape_cast %7 : vector<1x1x5x192xbf16> to vector<5x192xbf16>
    %c1_10 = arith.constant 1 : index
    %c0_11 = arith.constant 0 : index
    %c0_12 = arith.constant 0 : index
    %9 = vector.load %arg2[%c1_10, %c0_11, %c0_12] : memref<9x192x128xbf16, #tpu.memory_space<vmem>>, vector<1x192x128xbf16>
    %10 = vector.shape_cast %9 : vector<1x192x128xbf16> to vector<192x128xbf16>
    %cst_13 = arith.constant dense<0.000000e+00> : vector<5x128xf32>
    %11 = tpu.matmul %8, %10, %cst_13 {dimension_numbers = #tpu.dot_dimension_numbers<[1], [0], [0], [1], [0, 0, 1, 1], [], []>} : vector<5x192xbf16>, vector<192x128xbf16>, vector<5x128xf32> -> vector<5x128xf32>
    %12 = arith.addf %6, %11 : vector<5x128xf32>
    %c0_14 = arith.constant 0 : index
    %c0_15 = arith.constant 0 : index
    %c1_16 = arith.constant 1 : index
    %c0_17 = arith.constant 0 : index
    %13 = vector.load %arg1[%c0_14, %c0_15, %c1_16, %c0_17] : memref<1x4x9x192xbf16, #tpu.memory_space<vmem>>, vector<1x1x5x192xbf16>
    %14 = vector.shape_cast %13 : vector<1x1x5x192xbf16> to vector<5x192xbf16>
    %c2 = arith.constant 2 : index
    %c0_18 = arith.constant 0 : index
    %c0_19 = arith.constant 0 : index
    %15 = vector.load %arg2[%c2, %c0_18, %c0_19] : memref<9x192x128xbf16, #tpu.memory_space<vmem>>, vector<1x192x128xbf16>
    %16 = vector.shape_cast %15 : vector<1x192x128xbf16> to vector<192x128xbf16>
    %cst_20 = arith.constant dense<0.000000e+00> : vector<5x128xf32>
    %17 = tpu.matmul %14, %16, %cst_20 {dimension_numbers = #tpu.dot_dimension_numbers<[1], [0], [0], [1], [0, 0, 1, 1], [], []>} : vector<5x192xbf16>, vector<192x128xbf16>, vector<5x128xf32> -> vector<5x128xf32>
    %18 = arith.addf %12, %17 : vector<5x128xf32>
    %c0_21 = arith.constant 0 : index
    %c2_22 = arith.constant 2 : index
    %c0_23 = arith.constant 0 : index
    %c0_24 = arith.constant 0 : index
    %19 = vector.load %arg1[%c0_21, %c2_22, %c0_23, %c0_24] : memref<1x4x9x192xbf16, #tpu.memory_space<vmem>>, vector<1x1x5x192xbf16>
    %20 = vector.shape_cast %19 : vector<1x1x5x192xbf16> to vector<5x192xbf16>
    %c3 = arith.constant 3 : index
    %c0_25 = arith.constant 0 : index
    %c0_26 = arith.constant 0 : index
    %21 = vector.load %arg2[%c3, %c0_25, %c0_26] : memref<9x192x128xbf16, #tpu.memory_space<vmem>>, vector<1x192x128xbf16>
    %22 = vector.shape_cast %21 : vector<1x192x128xbf16> to vector<192x128xbf16>
    %cst_27 = arith.constant dense<0.000000e+00> : vector<5x128xf32>
    %23 = tpu.matmul %20, %22, %cst_27 {dimension_numbers = #tpu.dot_dimension_numbers<[1], [0], [0], [1], [0, 0, 1, 1], [], []>} : vector<5x192xbf16>, vector<192x128xbf16>, vector<5x128xf32> -> vector<5x128xf32>
    %24 = arith.addf %18, %23 : vector<5x128xf32>
    %c0_28 = arith.constant 0 : index
    %c3_29 = arith.constant 3 : index
    %c0_30 = arith.constant 0 : index
    %c0_31 = arith.constant 0 : index
    %25 = vector.load %arg1[%c0_28, %c3_29, %c0_30, %c0_31] : memref<1x4x9x192xbf16, #tpu.memory_space<vmem>>, vector<1x1x5x192xbf16>
    %26 = vector.shape_cast %25 : vector<1x1x5x192xbf16> to vector<5x192xbf16>
    %c4 = arith.constant 4 : index
    %c0_32 = arith.constant 0 : index
    %c0_33 = arith.constant 0 : index
    %27 = vector.load %arg2[%c4, %c0_32, %c0_33] : memref<9x192x128xbf16, #tpu.memory_space<vmem>>, vector<1x192x128xbf16>
    %28 = vector.shape_cast %27 : vector<1x192x128xbf16> to vector<192x128xbf16>
    %cst_34 = arith.constant dense<0.000000e+00> : vector<5x128xf32>
    %29 = tpu.matmul %26, %28, %cst_34 {dimension_numbers = #tpu.dot_dimension_numbers<[1], [0], [0], [1], [0, 0, 1, 1], [], []>} : vector<5x192xbf16>, vector<192x128xbf16>, vector<5x128xf32> -> vector<5x128xf32>
    %30 = arith.addf %24, %29 : vector<5x128xf32>
    %c0_35 = arith.constant 0 : index
    %c2_36 = arith.constant 2 : index
    %c1_37 = arith.constant 1 : index
    %c0_38 = arith.constant 0 : index
    %31 = vector.load %arg1[%c0_35, %c2_36, %c1_37, %c0_38] : memref<1x4x9x192xbf16, #tpu.memory_space<vmem>>, vector<1x1x5x192xbf16>
    %32 = vector.shape_cast %31 : vector<1x1x5x192xbf16> to vector<5x192xbf16>
    %c5 = arith.constant 5 : index
    %c0_39 = arith.constant 0 : index
    %c0_40 = arith.constant 0 : index
    %33 = vector.load %arg2[%c5, %c0_39, %c0_40] : memref<9x192x128xbf16, #tpu.memory_space<vmem>>, vector<1x192x128xbf16>
    %34 = vector.shape_cast %33 : vector<1x192x128xbf16> to vector<192x128xbf16>
    %cst_41 = arith.constant dense<0.000000e+00> : vector<5x128xf32>
    %35 = tpu.matmul %32, %34, %cst_41 {dimension_numbers = #tpu.dot_dimension_numbers<[1], [0], [0], [1], [0, 0, 1, 1], [], []>} : vector<5x192xbf16>, vector<192x128xbf16>, vector<5x128xf32> -> vector<5x128xf32>
    %36 = arith.addf %30, %35 : vector<5x128xf32>
    %c0_42 = arith.constant 0 : index
    %c0_43 = arith.constant 0 : index
    %c3_44 = arith.constant 3 : index
    %c0_45 = arith.constant 0 : index
    %37 = vector.load %arg1[%c0_42, %c0_43, %c3_44, %c0_45] : memref<1x4x9x192xbf16, #tpu.memory_space<vmem>>, vector<1x1x5x192xbf16>
    %38 = vector.shape_cast %37 : vector<1x1x5x192xbf16> to vector<5x192xbf16>
    %c6 = arith.constant 6 : index
    %c0_46 = arith.constant 0 : index
    %c0_47 = arith.constant 0 : index
    %39 = vector.load %arg2[%c6, %c0_46, %c0_47] : memref<9x192x128xbf16, #tpu.memory_space<vmem>>, vector<1x192x128xbf16>
    %40 = vector.shape_cast %39 : vector<1x192x128xbf16> to vector<192x128xbf16>
    %cst_48 = arith.constant dense<0.000000e+00> : vector<5x128xf32>
    %41 = tpu.matmul %38, %40, %cst_48 {dimension_numbers = #tpu.dot_dimension_numbers<[1], [0], [0], [1], [0, 0, 1, 1], [], []>} : vector<5x192xbf16>, vector<192x128xbf16>, vector<5x128xf32> -> vector<5x128xf32>
    %42 = arith.addf %36, %41 : vector<5x128xf32>
    %c0_49 = arith.constant 0 : index
    %c1_50 = arith.constant 1 : index
    %c3_51 = arith.constant 3 : index
    %c0_52 = arith.constant 0 : index
    %43 = vector.load %arg1[%c0_49, %c1_50, %c3_51, %c0_52] : memref<1x4x9x192xbf16, #tpu.memory_space<vmem>>, vector<1x1x5x192xbf16>
    %44 = vector.shape_cast %43 : vector<1x1x5x192xbf16> to vector<5x192xbf16>
    %c7 = arith.constant 7 : index
    %c0_53 = arith.constant 0 : index
    %c0_54 = arith.constant 0 : index
    %45 = vector.load %arg2[%c7, %c0_53, %c0_54] : memref<9x192x128xbf16, #tpu.memory_space<vmem>>, vector<1x192x128xbf16>
    %46 = vector.shape_cast %45 : vector<1x192x128xbf16> to vector<192x128xbf16>
    %cst_55 = arith.constant dense<0.000000e+00> : vector<5x128xf32>
    %47 = tpu.matmul %44, %46, %cst_55 {dimension_numbers = #tpu.dot_dimension_numbers<[1], [0], [0], [1], [0, 0, 1, 1], [], []>} : vector<5x192xbf16>, vector<192x128xbf16>, vector<5x128xf32> -> vector<5x128xf32>
    %48 = arith.addf %42, %47 : vector<5x128xf32>
    %c0_56 = arith.constant 0 : index
    %c0_57 = arith.constant 0 : index
    %c4_58 = arith.constant 4 : index
    %c0_59 = arith.constant 0 : index
    %49 = vector.load %arg1[%c0_56, %c0_57, %c4_58, %c0_59] : memref<1x4x9x192xbf16, #tpu.memory_space<vmem>>, vector<1x1x5x192xbf16>
    %50 = vector.shape_cast %49 : vector<1x1x5x192xbf16> to vector<5x192xbf16>
    %c8 = arith.constant 8 : index
    %c0_60 = arith.constant 0 : index
    %c0_61 = arith.constant 0 : index
    %51 = vector.load %arg2[%c8, %c0_60, %c0_61] : memref<9x192x128xbf16, #tpu.memory_space<vmem>>, vector<1x192x128xbf16>
    %52 = vector.shape_cast %51 : vector<1x192x128xbf16> to vector<192x128xbf16>
    %cst_62 = arith.constant dense<0.000000e+00> : vector<5x128xf32>
    %53 = tpu.matmul %50, %52, %cst_62 {dimension_numbers = #tpu.dot_dimension_numbers<[1], [0], [0], [1], [0, 0, 1, 1], [], []>} : vector<5x192xbf16>, vector<192x128xbf16>, vector<5x128xf32> -> vector<5x128xf32>
    %54 = arith.addf %48, %53 : vector<5x128xf32>
    %c0_63 = arith.constant 0 : index
    %c0_64 = arith.constant 0 : index
    %55 = vector.load %arg3[%c0_63, %c0_64] : memref<1x128xf32, #tpu.memory_space<vmem>>, vector<1x128xf32>
    %56 = vector.broadcast %55 : vector<1x128xf32> to vector<5x128xf32>
    %57 = arith.addf %54, %56 : vector<5x128xf32>
    %cst_65 = arith.constant 0.000000e+00 : f32
    %58 = vector.broadcast %cst_65 : f32 to vector<5x128xf32>
    %59 = arith.maximumf %57, %58 : vector<5x128xf32>
    %60 = arith.truncf %59 : vector<5x128xf32> to vector<5x128xbf16>
    %c0_66 = arith.constant 0 : index
    %c0_67 = arith.constant 0 : index
    %c0_68 = arith.constant 0 : index
    %61 = vector.load %arg4[%c0_66, %c0_67, %c0_68] : memref<1x5x128xbf16, #tpu.memory_space<vmem>>, vector<1x5x128xbf16>
    %62 = vector.shape_cast %61 : vector<1x5x128xbf16> to vector<5x128xbf16>
    %63 = vector.shape_cast %60 : vector<5x128xbf16> to vector<1x5x128xbf16>
    tpu.vector_store %arg4[%c0_66, %c0_67, %c0_68], %63 {strides = array<i32>} : memref<1x5x128xbf16, #tpu.memory_space<vmem>>, vector<1x5x128xbf16>,
    return
  }
  func.func @transform_0(%arg0: i32) -> (i32, i32, i32, i32) {
    %c0_i32 = arith.constant 0 : i32
    %c0_i32_0 = arith.constant 0 : i32
    %c0_i32_1 = arith.constant 0 : i32
    %c0_i32_2 = arith.constant 0 : i32
    return %arg0, %c0_i32, %c0_i32_0, %c0_i32_1 : i32, i32, i32, i32
  }
  func.func @transform_1(%arg0: i32) -> (i32, i32, i32) {
    %c0_i32 = arith.constant 0 : i32
    %c0_i32_0 = arith.constant 0 : i32
    %c0_i32_1 = arith.constant 0 : i32
    %c0_i32_2 = arith.constant 0 : i32
    return %c0_i32, %c0_i32_0, %c0_i32_1 : i32, i32, i32
  }
  func.func @transform_2(%arg0: i32) -> (i32, i32) {
    %c0_i32 = arith.constant 0 : i32
    %c0_i32_0 = arith.constant 0 : i32
    %c0_i32_1 = arith.constant 0 : i32
    return %c0_i32, %c0_i32_0 : i32, i32
  }
  func.func @transform_3(%arg0: i32) -> (i32, i32, i32) {
    %c0_i32 = arith.constant 0 : i32
    %c0_i32_0 = arith.constant 0 : i32
    %c0_i32_1 = arith.constant 0 : i32
    return %arg0, %c0_i32, %c0_i32_0 : i32, i32, i32
  }
}

module attributes {stable_mosaic.version = 11 : i64} {
  func.func @_mm_single_kernel(%arg0: i32, %arg1: i32, %arg2: memref<8x1280xbf16, #tpu.memory_space<vmem>>, %arg3: memref<1280x512xbf16, #tpu.memory_space<vmem>>, %arg4: memref<1x512xf32, #tpu.memory_space<vmem>>, %arg5: memref<8x512xf32, #tpu.memory_space<vmem>>) attributes {dimension_semantics = [#tpu.dimension_semantics<parallel>, #tpu.dimension_semantics<parallel>], iteration_bounds = array<i64: 1, 1>, scalar_prefetch = 0 : i64, scratch_operands = 0 : i64, tpu.core_type = #tpu.core_type<tc>, window_params = [{transform_indices = @transform_0, window_bounds = array<i64: 8, 1280>}, {transform_indices = @transform_1, window_bounds = array<i64: 1280, 512>}, {transform_indices = @transform_2, window_bounds = array<i64: 1, 512>}, {transform_indices = @transform_3, window_bounds = array<i64: 8, 512>}]} {
    %c0 = arith.constant 0 : index
    %c0_0 = arith.constant 0 : index
    %0 = vector.load %arg2[%c0, %c0_0] : memref<8x1280xbf16, #tpu.memory_space<vmem>>, vector<8x1280xbf16>
    %c0_1 = arith.constant 0 : index
    %c0_2 = arith.constant 0 : index
    %1 = vector.load %arg3[%c0_1, %c0_2] : memref<1280x512xbf16, #tpu.memory_space<vmem>>, vector<1280x512xbf16>
    %cst = arith.constant dense<0.000000e+00> : vector<8x512xf32>
    %2 = tpu.matmul %0, %1, %cst {dimension_numbers = #tpu.dot_dimension_numbers<[1], [0], [0], [1], [0, 0, 1, 1], [], []>} : vector<8x1280xbf16>, vector<1280x512xbf16>, vector<8x512xf32> -> vector<8x512xf32>
    %c0_3 = arith.constant 0 : index
    %c0_4 = arith.constant 0 : index
    %3 = vector.load %arg4[%c0_3, %c0_4] : memref<1x512xf32, #tpu.memory_space<vmem>>, vector<1x512xf32>
    %4 = vector.broadcast %3 : vector<1x512xf32> to vector<8x512xf32>
    %5 = arith.addf %2, %4 : vector<8x512xf32>
    %c0_5 = arith.constant 0 : index
    %c0_6 = arith.constant 0 : index
    %6 = vector.load %arg5[%c0_5, %c0_6] : memref<8x512xf32, #tpu.memory_space<vmem>>, vector<8x512xf32>
    tpu.vector_store %arg5[%c0_5, %c0_6], %5 {strides = array<i32>} : memref<8x512xf32, #tpu.memory_space<vmem>>, vector<8x512xf32>,
    return
  }
  func.func @transform_0(%arg0: i32, %arg1: i32) -> (i32, i32) {
    %c0_i32 = arith.constant 0 : i32
    %c0_i32_0 = arith.constant 0 : i32
    return %arg0, %c0_i32 : i32, i32
  }
  func.func @transform_1(%arg0: i32, %arg1: i32) -> (i32, i32) {
    %c0_i32 = arith.constant 0 : i32
    %c0_i32_0 = arith.constant 0 : i32
    return %c0_i32, %arg1 : i32, i32
  }
  func.func @transform_2(%arg0: i32, %arg1: i32) -> (i32, i32) {
    %c0_i32 = arith.constant 0 : i32
    %c0_i32_0 = arith.constant 0 : i32
    return %c0_i32, %arg1 : i32, i32
  }
  func.func @transform_3(%arg0: i32, %arg1: i32) -> (i32, i32) {
    %c0_i32 = arith.constant 0 : i32
    return %arg0, %arg1 : i32, i32
  }
}

</mosaic_0001>

<bundles_post_ra>
// kernel: encoder_forward.4
= control target key start
LH: loop header
LB: loop body
LE: loop exit
PB: predicated region body
PF: predicated region fallthrough
CT: control target
= control target key end

     0   :  { %s1770_s12 = smov 0   ;;  %s1772_s13 = smov 0   ;;  %s2081_s0 = inlined_call_operand.vmem [shape: bf16[1024,27], index: 0, kind: input, shape index: {}]   ;;  %s2082_s1 = inlined_call_operand.vmem [shape: bf16[27,32], index: 1, kind: input, shape index: {}]   ;;  %s2083_s2 = inlined_call_operand.vmem [shape: f32[1,32], index: 2, kind: input, shape index: {}]   ;;  %s2084_s3 = inlined_call_operand.vmem [shape: bf16[1024,32], index: 3, kind: output, shape index: {}]  }
   0x1   :  { %s1774_s14 = smov 0  }
   0x2 LB: > { %s25_s15 = sadd.s32 1, %s1743_s13  ;;  %p1358_p0 = scmp.ge.s32.totalorder %s1747_s14, 1  ;;  %s1747_s14 = sphi %s1774_s14, %s13_s14   ;;  %s1743_s13 = sphi %s1772_s13, %s2086_s13   ;;  %s1739_s12 = sphi %s1770_s12, %s2085_s12  }
   0x3   : > { %p27_p1 = scmp.ge.s32.totalorder %s25_s15, 2  ;;  %p169_p2 = scmp.lt.s32.totalorder %s1747_s14, 3 }
   0x5   : > { %s2088_s15 = smov (%p27_p1, %s25_s15), 0  ;;  %p170_p3 = pnand %p1358_p0, %p169_p2 }
   0x6   : > { %v1691_v0 = vld [vmem:[%s2082_s1] sm:$0xff] (!%p170_p3)   ;;  %vm569_vm0 = vcmask (!%p170_p3), 1044480   ;;  %v1692_v1 = vld [vmem:[%s2082_s1 + $0x8] sm:$0x3f] (!%p170_p3)   ;;  %vm570_vm1 = vcmask (!%p170_p3), 1045504   ;;  %s1359_s20 = sshll.u32 (!%p170_p3), %s1739_s12, 6 }
   0x7   : > { %173 = sbr.rel (%p170_p3) target bundleno = 298 (0x12a), region = 32  ;;  %1594 = vmatprep.subr.bf16.mxu0 (!%p170_p3), %v1691_v0  ;;  %1662 = vmatprep.subr.bf16.mxu1 (!%p170_p3), %v1691_v0  ;;  %v1749_v2 = vmov (!%p170_p3), 65535   ;;  %p204_p4 = scmp.lt.s32.totalorder (!%p170_p3), %s1359_s20, 127  ;;  %vm472_vm2 = vcmask (!%p170_p3), 220160   ;;  %v1871_v38 = vld [vmem:[%s2083_s2] ss:$0 sm:$0xff] (!%p170_p3) }
   0x8   : > { %1595 = vmatpush3.bf16.msra.mxu0 (!%p170_p3), %v1691_v0  ;;  %1664 = vmatpush3.bf16.msra.mxu1 (!%p170_p3), %v1691_v0  ;;  %v571_v3 = vsel (!%p170_p3), %vm569_vm0, 4294967295, %v1749_v2  ;;  %vm1185_vm3 = vcmask (!%p170_p3), 257024  }
   0x9   : > { %v572_v4 = vsel (!%p170_p3), %vm570_vm1, %v571_v3, 0 }
   0xa   : > { %v574_v5 = vand.u32 (!%p170_p3), %v1692_v1, %v572_v4 }
   0xc   : > { %1596 = vmatprep.subr.bf16.mxu0 (!%p170_p3), %v574_v5  ;;  %1663 = vmatprep.subr.bf16.mxu1 (!%p170_p3), %v574_v5 }
   0xd   : > { %1597 = vmatpush3.bf16.msra.mxu0 (!%p170_p3), %v574_v5  ;;  %1665 = vmatpush3.bf16.msra.mxu1 (!%p170_p3), %v574_v5 }
   0xe   : > { %s2090_s20 = smov (!%p204_p4, %s1359_s20), 127 }
   0xf   : > { %s1360_s21 = sshll.u32 %s2090_s20, 2 }
  0x10   : > { %s1802_s24 = scalar_lea.vmem %s2081_s0, %s1360_s21  ;;  %s1883_s29 = scalar_lea.vmem %s2084_s3, %s1360_s21 }
  0x11   : > { %v1693_v6 = vld [vmem:[%s1802_s24] sm:$0xff]   ;;  %v1695_v8 = vld [vmem:[%s1802_s24 + $0x8] sm:$0xff]   ;;  %v1697_v10 = vld [vmem:[%s1802_s24 + $0x10] sm:$0xff]  }
  0x12   : > { %v1694_v7 = vld [vmem:[%s1802_s24 + $0x80] sm:$0xff]   ;;  %1598 = vmatprep.mubr.msk.bf16.mxu0 %vm472_vm2, %v1693_v6  ;;  %v1696_v9 = vld [vmem:[%s1802_s24 + $0x88] sm:$0xff]   ;;  %v1698_v11 = vld [vmem:[%s1802_s24 + $0x90] sm:$0xff]  }
  0x13   : > { %1630 = vmatprep.mubr.msk.bf16.mxu1 %vm472_vm2, %v1694_v7  ;;  %1599 = vmatmul.mubr.msk.bf16.vlgmr.msra.gmra.mrb[0].mxu0 %vm472_vm2, %v1695_v8  ;;  %v1699_v12 = vld [vmem:[%s1802_s24 + $0x18] sm:$0xff]   ;;  %v1701_v14 = vld [vmem:[%s1802_s24 + $0x20] sm:$0xff]   ;;  %v1703_v16 = vld [vmem:[%s1802_s24 + $0x28] sm:$0xff]  }
  0x14   : > { %1631 = vmatmul.mubr.msk.bf16.vlgmr.msra.gmra.mrb[0].mxu1 %vm472_vm2, %v1696_v9  ;;  %1602 = vmatprep.mubr.msk.bf16.mxu0 %vm472_vm2, %v1697_v10  ;;  %v1700_v13 = vld [vmem:[%s1802_s24 + $0x98] sm:$0xff]   ;;  %v1702_v15 = vld [vmem:[%s1802_s24 + $0xa0] sm:$0xff]   ;;  %v1704_v17 = vld [vmem:[%s1802_s24 + $0xa8] sm:$0xff]  }
  0x15   : > { %1634 = vmatprep.mubr.msk.bf16.mxu1 %vm472_vm2, %v1698_v11  ;;  %v1705_v18 = vld [vmem:[%s1802_s24 + $0x30] sm:$0xff]   ;;  %v1707_v20 = vld [vmem:[%s1802_s24 + $0x38] sm:$0xff]   ;;  %v1709_v22 = vld [vmem:[%s1802_s24 + $0x40] sm:$0xff]  }
  0x16   : > { %v1706_v19 = vld [vmem:[%s1802_s24 + $0xb0] sm:$0xff]   ;;  %v1708_v21 = vld [vmem:[%s1802_s24 + $0xb8] sm:$0xff]   ;;  %v1710_v23 = vld [vmem:[%s1802_s24 + $0xc0] sm:$0xff]  }
  0x17   : > { %v1711_v24 = vld [vmem:[%s1802_s24 + $0x48] sm:$0xff]   ;;  %v1713_v26 = vld [vmem:[%s1802_s24 + $0x50] sm:$0xff]   ;;  %v1715_v28 = vld [vmem:[%s1802_s24 + $0x58] sm:$0xff]  }
  0x18   : > { %v1712_v25 = vld [vmem:[%s1802_s24 + $0xc8] sm:$0xff]   ;;  %v1714_v27 = vld [vmem:[%s1802_s24 + $0xd0] sm:$0xff]   ;;  %v1716_v29 = vld [vmem:[%s1802_s24 + $0xd8] sm:$0xff]  }
  0x19   : > { %v1717_v30 = vld [vmem:[%s1802_s24 + $0x60] sm:$0xff]   ;;  %v1719_v32 = vld [vmem:[%s1802_s24 + $0x68] sm:$0xff]   ;;  %v1721_v34 = vld [vmem:[%s1802_s24 + $0x70] sm:$0xff]  }
  0x1a   : > { %v1718_v31 = vld [vmem:[%s1802_s24 + $0xe0] sm:$0xff]   ;;  %v1720_v33 = vld [vmem:[%s1802_s24 + $0xe8] sm:$0xff]   ;;  %v1722_v35 = vld [vmem:[%s1802_s24 + $0xf0] sm:$0xff]  }
  0x1b   : > { %1603 = vmatmul.mubr.msk.bf16.gmra.mrb[4].mxu0 %vm472_vm2, %v1699_v12  ;;  %v1723_v36 = vld [vmem:[%s1802_s24 + $0x78] sm:$0xff]  }
  0x1c   : > { %1635 = vmatmul.mubr.msk.bf16.gmra.mrb[4].mxu1 %vm472_vm2, %v1700_v13  ;;  %1606 = vmatprep.mubr.msk.bf16.mxu0 %vm472_vm2, %v1701_v14  ;;  %v1724_v37 = vld [vmem:[%s1802_s24 + $0xf8] sm:$0xff]  }
  0x1d   : > { %1638 = vmatprep.mubr.msk.bf16.mxu1 %vm472_vm2, %v1702_v15 }
  0x23   : > { %1607 = vmatmul.mubr.msk.bf16.gmra.mrb[8].mxu0 %vm472_vm2, %v1703_v16 }
  0x24   : > { %1639 = vmatmul.mubr.msk.bf16.gmra.mrb[8].mxu1 %vm472_vm2, %v1704_v17  ;;  %1610 = vmatprep.mubr.msk.bf16.mxu0 %vm472_vm2, %v1705_v18 }
  0x25   : > { %1642 = vmatprep.mubr.msk.bf16.mxu1 %vm472_vm2, %v1706_v19 }
  0x2b   : > { %1611 = vmatmul.mubr.msk.bf16.gmra.mrb[12].mxu0 %vm472_vm2, %v1707_v20 }
  0x2c   : > { %1643 = vmatmul.mubr.msk.bf16.gmra.mrb[12].mxu1 %vm472_vm2, %v1708_v21  ;;  %1614 = vmatprep.mubr.msk.bf16.mxu0 %vm472_vm2, %v1709_v22 }
  0x2d   : > { %1646 = vmatprep.mubr.msk.bf16.mxu1 %vm472_vm2, %v1710_v23 }
  0x33   : > { %1615 = vmatmul.mubr.msk.bf16.gmra.mrb[16].mxu0 %vm472_vm2, %v1711_v24 }
  0x34   : > { %1647 = vmatmul.mubr.msk.bf16.gmra.mrb[16].mxu1 %vm472_vm2, %v1712_v25  ;;  %1618 = vmatprep.mubr.msk.bf16.mxu0 %vm472_vm2, %v1713_v26 }
  0x35   : > { %1650 = vmatprep.mubr.msk.bf16.mxu1 %vm472_vm2, %v1714_v27 }
  0x3b   : > { %1619 = vmatmul.mubr.msk.bf16.gmra.mrb[20].mxu0 %vm472_vm2, %v1715_v28 }
  0x3c   : > { %1651 = vmatmul.mubr.msk.bf16.gmra.mrb[20].mxu1 %vm472_vm2, %v1716_v29  ;;  %1622 = vmatprep.mubr.msk.bf16.mxu0 %vm472_vm2, %v1717_v30 }
  0x3d   : > { %1654 = vmatprep.mubr.msk.bf16.mxu1 %vm472_vm2, %v1718_v31 }
  0x43   : > { %1623 = vmatmul.mubr.msk.bf16.gmra.mrb[24].mxu0 %vm472_vm2, %v1719_v32 }
  0x44   : > { %1655 = vmatmul.mubr.msk.bf16.gmra.mrb[24].mxu1 %vm472_vm2, %v1720_v33  ;;  %1626 = vmatprep.mubr.msk.bf16.mxu0 %vm472_vm2, %v1721_v34 }
  0x45   : > { %1658 = vmatprep.mubr.msk.bf16.mxu1 %vm472_vm2, %v1722_v35 }
  0x4b   : > { %1627 = vmatmul.mubr.msk.bf16.gmra.mrb[28].mxu0 %vm472_vm2, %v1723_v36 }
  0x4c   : > { %1659 = vmatmul.mubr.msk.bf16.gmra.mrb[28].mxu1 %vm472_vm2, %v1724_v37 }
  0xe6   : > { %v1600_v39 = vpop.f32.mrb[0].mxu0 }
  0xe7   : > { %v619_v40 = vadd.f32 %v1600_v39, %v1871_v38  ;;  %v1632_v41 = vpop.f32.mrb[0].mxu1  ;;  %v610_v42 = vpop.f32.mrb[1].mxu0 }
  0xe8   : > { %v747_v43 = vadd.f32 %v1632_v41, %v1871_v38  ;;  %v611_v44 = vadd.f32 %v1871_v38, %v610_v42  ;;  %v738_v45 = vpop.f32.mrb[1].mxu1  ;;  %v1601_v46 = vpop.f32.mrb[2].mxu0 }
  0xe9   : > { %v867_v47 = vmax.f32 %v619_v40, 0.0  ;;  %v739_v48 = vadd.f32 %v1871_v38, %v738_v45  ;;  %v622_v49 = vadd.f32 %v1601_v46, %v1871_v38  ;;  %v1633_v50 = vpop.f32.mrb[2].mxu1  ;;  %v613_v51 = vpop.f32.mrb[3].mxu0 }
  0xea   : > { %v899_v52 = vmax.f32 %v747_v43, 0.0  ;;  %v865_v53 = vmax.f32 %v611_v44, 0.0  ;;  %v750_v54 = vadd.f32 %v1633_v50, %v1871_v38  ;;  %v614_v55 = vadd.f32 %v1871_v38, %v613_v51  ;;  %v741_v56 = vpop.f32.mrb[3].mxu1 }
  0xeb   : > { %v1498_v57 = vpack.c.bf16 %v867_v47, %v867_v47  ;;  %v897_v58 = vmax.f32 %v739_v48, 0.0  ;;  %v868_v59 = vmax.f32 %v622_v49, 0.0  ;;  %v742_v60 = vadd.f32 %v1871_v38, %v741_v56 }
  0xec   : > { %v1530_v61 = vpack.c.bf16 %v899_v52, %v899_v52  ;;  %v1496_v62 = vpack.c.bf16 %v865_v53, %v865_v53  ;;  %v900_v63 = vmax.f32 %v750_v54, 0.0  ;;  %v866_v0 = vmax.f32 %v614_v55, 0.0 }
  0xed   : > { %1188 = vst.msk [vmem:[%s1883_s29 + $0x8] sm:$0xf] %vm1185_vm3, %v1498_v57  ;;  %v1528_v1 = vpack.c.bf16 %v897_v58, %v897_v58  ;;  %v1499_v2 = vpack.c.bf16 %v868_v59, %v868_v59  ;;  %v898_v3 = vmax.f32 %v742_v60, 0.0 }
  0xee   : > { %1220 = vst.msk [vmem:[%s1883_s29 + $0x88] sm:$0xf] %vm1185_vm3, %v1530_v61  ;;  %1186 = vst.msk [vmem:[%s1883_s29] sm:$0xf] %vm1185_vm3, %v1496_v62  ;;  %v1531_v4 = vpack.c.bf16 %v900_v63, %v900_v63  ;;  %v1497_v5 = vpack.c.bf16 %v866_v0, %v866_v0  ;;  %v1604_v6 = vpop.f32.mrb[4].mxu0 }
  0xef   : > { %1218 = vst.msk [vmem:[%s1883_s29 + $0x80] sm:$0xf] %vm1185_vm3, %v1528_v1  ;;  %1189 = vst.msk [vmem:[%s1883_s29 + $0xc] sm:$0xf] %vm1185_vm3, %v1499_v2  ;;  %v1529_v7 = vpack.c.bf16 %v898_v3, %v898_v3  ;;  %v635_v8 = vadd.f32 %v1604_v6, %v1871_v38  ;;  %v1636_v9 = vpop.f32.mrb[4].mxu1  ;;  %v626_v10 = vpop.f32.mrb[5].mxu0 }
  0xf0   : > { %1221 = vst.msk [vmem:[%s1883_s29 + $0x8c] sm:$0xf] %vm1185_vm3, %v1531_v4  ;;  %1187 = vst.msk [vmem:[%s1883_s29 + $0x4] sm:$0xf] %vm1185_vm3, %v1497_v5  ;;  %v763_v11 = vadd.f32 %v1636_v9, %v1871_v38  ;;  %v627_v12 = vadd.f32 %v1871_v38, %v626_v10  ;;  %v754_v13 = vpop.f32.mrb[5].mxu1  ;;  %v1605_v14 = vpop.f32.mrb[6].mxu0 }
  0xf1   : > { %1219 = vst.msk [vmem:[%s1883_s29 + $0x84] sm:$0xf] %vm1185_vm3, %v1529_v7  ;;  %v871_v15 = vmax.f32 %v635_v8, 0.0  ;;  %v755_v16 = vadd.f32 %v1871_v38, %v754_v13  ;;  %v638_v17 = vadd.f32 %v1605_v14, %v1871_v38  ;;  %v1637_v18 = vpop.f32.mrb[6].mxu1  ;;  %v629_v19 = vpop.f32.mrb[7].mxu0 }
  0xf2   : > { %v903_v20 = vmax.f32 %v763_v11, 0.0  ;;  %v869_v21 = vmax.f32 %v627_v12, 0.0  ;;  %v766_v22 = vadd.f32 %v1637_v18, %v1871_v38  ;;  %v630_v23 = vadd.f32 %v1871_v38, %v629_v19  ;;  %v757_v24 = vpop.f32.mrb[7].mxu1 }
  0xf3   : > { %v1502_v25 = vpack.c.bf16 %v871_v15, %v871_v15  ;;  %v901_v26 = vmax.f32 %v755_v16, 0.0  ;;  %v872_v27 = vmax.f32 %v638_v17, 0.0  ;;  %v758_v28 = vadd.f32 %v1871_v38, %v757_v24 }
  0xf4   : > { %v1534_v29 = vpack.c.bf16 %v903_v20, %v903_v20  ;;  %v1500_v30 = vpack.c.bf16 %v869_v21, %v869_v21  ;;  %v904_v31 = vmax.f32 %v766_v22, 0.0  ;;  %v870_v32 = vmax.f32 %v630_v23, 0.0 }
  0xf5   : > { %1192 = vst.msk [vmem:[%s1883_s29 + $0x18] sm:$0xf] %vm1185_vm3, %v1502_v25  ;;  %v1532_v33 = vpack.c.bf16 %v901_v26, %v901_v26  ;;  %v1503_v34 = vpack.c.bf16 %v872_v27, %v872_v27  ;;  %v902_v35 = vmax.f32 %v758_v28, 0.0 }
  0xf6   : > { %1224 = vst.msk [vmem:[%s1883_s29 + $0x98] sm:$0xf] %vm1185_vm3, %v1534_v29  ;;  %1190 = vst.msk [vmem:[%s1883_s29 + $0x10] sm:$0xf] %vm1185_vm3, %v1500_v30  ;;  %v1535_v36 = vpack.c.bf16 %v904_v31, %v904_v31  ;;  %v1501_v37 = vpack.c.bf16 %v870_v32, %v870_v32  ;;  %v1608_v39 = vpop.f32.mrb[8].mxu0 }
  0xf7   : > { %1222 = vst.msk [vmem:[%s1883_s29 + $0x90] sm:$0xf] %vm1185_vm3, %v1532_v33  ;;  %1193 = vst.msk [vmem:[%s1883_s29 + $0x1c] sm:$0xf] %vm1185_vm3, %v1503_v34  ;;  %v1533_v40 = vpack.c.bf16 %v902_v35, %v902_v35  ;;  %v651_v41 = vadd.f32 %v1608_v39, %v1871_v38  ;;  %v1640_v42 = vpop.f32.mrb[8].mxu1  ;;  %v642_v43 = vpop.f32.mrb[9].mxu0 }
  0xf8   : > { %1225 = vst.msk [vmem:[%s1883_s29 + $0x9c] sm:$0xf] %vm1185_vm3, %v1535_v36  ;;  %1191 = vst.msk [vmem:[%s1883_s29 + $0x14] sm:$0xf] %vm1185_vm3, %v1501_v37  ;;  %v779_v44 = vadd.f32 %v1640_v42, %v1871_v38  ;;  %v643_v45 = vadd.f32 %v1871_v38, %v642_v43  ;;  %v770_v46 = vpop.f32.mrb[9].mxu1  ;;  %v1609_v47 = vpop.f32.mrb[10].mxu0 }
  0xf9   : > { %1223 = vst.msk [vmem:[%s1883_s29 + $0x94] sm:$0xf] %vm1185_vm3, %v1533_v40  ;;  %v875_v48 = vmax.f32 %v651_v41, 0.0  ;;  %v771_v49 = vadd.f32 %v1871_v38, %v770_v46  ;;  %v654_v50 = vadd.f32 %v1609_v47, %v1871_v38  ;;  %v1641_v51 = vpop.f32.mrb[10].mxu1  ;;  %v645_v52 = vpop.f32.mrb[11].mxu0 }
  0xfa   : > { %v907_v53 = vmax.f32 %v779_v44, 0.0  ;;  %v873_v54 = vmax.f32 %v643_v45, 0.0  ;;  %v782_v55 = vadd.f32 %v1641_v51, %v1871_v38  ;;  %v646_v56 = vadd.f32 %v1871_v38, %v645_v52  ;;  %v773_v57 = vpop.f32.mrb[11].mxu1 }
  0xfb   : > { %v1506_v58 = vpack.c.bf16 %v875_v48, %v875_v48  ;;  %v905_v59 = vmax.f32 %v771_v49, 0.0  ;;  %v876_v60 = vmax.f32 %v654_v50, 0.0  ;;  %v774_v61 = vadd.f32 %v1871_v38, %v773_v57 }
  0xfc   : > { %v1538_v62 = vpack.c.bf16 %v907_v53, %v907_v53  ;;  %v1504_v63 = vpack.c.bf16 %v873_v54, %v873_v54  ;;  %v908_v0 = vmax.f32 %v782_v55, 0.0  ;;  %v874_v1 = vmax.f32 %v646_v56, 0.0 }
  0xfd   : > { %1196 = vst.msk [vmem:[%s1883_s29 + $0x28] sm:$0xf] %vm1185_vm3, %v1506_v58  ;;  %v1536_v2 = vpack.c.bf16 %v905_v59, %v905_v59  ;;  %v1507_v3 = vpack.c.bf16 %v876_v60, %v876_v60  ;;  %v906_v4 = vmax.f32 %v774_v61, 0.0 }
  0xfe   : > { %1228 = vst.msk [vmem:[%s1883_s29 + $0xa8] sm:$0xf] %vm1185_vm3, %v1538_v62  ;;  %1194 = vst.msk [vmem:[%s1883_s29 + $0x20] sm:$0xf] %vm1185_vm3, %v1504_v63  ;;  %v1539_v5 = vpack.c.bf16 %v908_v0, %v908_v0  ;;  %v1505_v6 = vpack.c.bf16 %v874_v1, %v874_v1  ;;  %v1612_v7 = vpop.f32.mrb[12].mxu0 }
  0xff   : > { %1226 = vst.msk [vmem:[%s1883_s29 + $0xa0] sm:$0xf] %vm1185_vm3, %v1536_v2  ;;  %1197 = vst.msk [vmem:[%s1883_s29 + $0x2c] sm:$0xf] %vm1185_vm3, %v1507_v3  ;;  %v1537_v8 = vpack.c.bf16 %v906_v4, %v906_v4  ;;  %v667_v9 = vadd.f32 %v1612_v7, %v1871_v38  ;;  %v1644_v10 = vpop.f32.mrb[12].mxu1  ;;  %v658_v11 = vpop.f32.mrb[13].mxu0 }
 0x100   : > { %1229 = vst.msk [vmem:[%s1883_s29 + $0xac] sm:$0xf] %vm1185_vm3, %v1539_v5  ;;  %1195 = vst.msk [vmem:[%s1883_s29 + $0x24] sm:$0xf] %vm1185_vm3, %v1505_v6  ;;  %v795_v12 = vadd.f32 %v1644_v10, %v1871_v38  ;;  %v659_v13 = vadd.f32 %v1871_v38, %v658_v11  ;;  %v786_v14 = vpop.f32.mrb[13].mxu1  ;;  %v1613_v15 = vpop.f32.mrb[14].mxu0 }
 0x101   : > { %1227 = vst.msk [vmem:[%s1883_s29 + $0xa4] sm:$0xf] %vm1185_vm3, %v1537_v8  ;;  %v879_v16 = vmax.f32 %v667_v9, 0.0  ;;  %v787_v17 = vadd.f32 %v1871_v38, %v786_v14  ;;  %v670_v18 = vadd.f32 %v1613_v15, %v1871_v38  ;;  %v1645_v19 = vpop.f32.mrb[14].mxu1  ;;  %v661_v20 = vpop.f32.mrb[15].mxu0 }
 0x102   : > { %v911_v21 = vmax.f32 %v795_v12, 0.0  ;;  %v877_v22 = vmax.f32 %v659_v13, 0.0  ;;  %v798_v23 = vadd.f32 %v1645_v19, %v1871_v38  ;;  %v662_v24 = vadd.f32 %v1871_v38, %v661_v20  ;;  %v789_v25 = vpop.f32.mrb[15].mxu1 }
 0x103   : > { %v1510_v26 = vpack.c.bf16 %v879_v16, %v879_v16  ;;  %v909_v27 = vmax.f32 %v787_v17, 0.0  ;;  %v880_v28 = vmax.f32 %v670_v18, 0.0  ;;  %v790_v29 = vadd.f32 %v1871_v38, %v789_v25 }
 0x104   : > { %v1542_v30 = vpack.c.bf16 %v911_v21, %v911_v21  ;;  %v1508_v31 = vpack.c.bf16 %v877_v22, %v877_v22  ;;  %v912_v32 = vmax.f32 %v798_v23, 0.0  ;;  %v878_v33 = vmax.f32 %v662_v24, 0.0 }
 0x105   : > { %1200 = vst.msk [vmem:[%s1883_s29 + $0x38] sm:$0xf] %vm1185_vm3, %v1510_v26  ;;  %v1540_v34 = vpack.c.bf16 %v909_v27, %v909_v27  ;;  %v1511_v35 = vpack.c.bf16 %v880_v28, %v880_v28  ;;  %v910_v36 = vmax.f32 %v790_v29, 0.0 }
 0x106   : > { %1232 = vst.msk [vmem:[%s1883_s29 + $0xb8] sm:$0xf] %vm1185_vm3, %v1542_v30  ;;  %1198 = vst.msk [vmem:[%s1883_s29 + $0x30] sm:$0xf] %vm1185_vm3, %v1508_v31  ;;  %v1543_v37 = vpack.c.bf16 %v912_v32, %v912_v32  ;;  %v1509_v39 = vpack.c.bf16 %v878_v33, %v878_v33  ;;  %v1616_v40 = vpop.f32.mrb[16].mxu0 }
 0x107   : > { %1230 = vst.msk [vmem:[%s1883_s29 + $0xb0] sm:$0xf] %vm1185_vm3, %v1540_v34  ;;  %1201 = vst.msk [vmem:[%s1883_s29 + $0x3c] sm:$0xf] %vm1185_vm3, %v1511_v35  ;;  %v1541_v41 = vpack.c.bf16 %v910_v36, %v910_v36  ;;  %v683_v42 = vadd.f32 %v1616_v40, %v1871_v38  ;;  %v1648_v43 = vpop.f32.mrb[16].mxu1  ;;  %v674_v44 = vpop.f32.mrb[17].mxu0 }
 0x108   : > { %1233 = vst.msk [vmem:[%s1883_s29 + $0xbc] sm:$0xf] %vm1185_vm3, %v1543_v37  ;;  %1199 = vst.msk [vmem:[%s1883_s29 + $0x34] sm:$0xf] %vm1185_vm3, %v1509_v39  ;;  %v811_v45 = vadd.f32 %v1648_v43, %v1871_v38  ;;  %v675_v46 = vadd.f32 %v1871_v38, %v674_v44  ;;  %v802_v47 = vpop.f32.mrb[17].mxu1  ;;  %v1617_v48 = vpop.f32.mrb[18].mxu0 }
 0x109   : > { %1231 = vst.msk [vmem:[%s1883_s29 + $0xb4] sm:$0xf] %vm1185_vm3, %v1541_v41  ;;  %v883_v49 = vmax.f32 %v683_v42, 0.0  ;;  %v803_v50 = vadd.f32 %v1871_v38, %v802_v47  ;;  %v686_v51 = vadd.f32 %v1617_v48, %v1871_v38  ;;  %v1649_v52 = vpop.f32.mrb[18].mxu1  ;;  %v677_v53 = vpop.f32.mrb[19].mxu0 }
 0x10a   : > { %v915_v54 = vmax.f32 %v811_v45, 0.0  ;;  %v881_v55 = vmax.f32 %v675_v46, 0.0  ;;  %v814_v56 = vadd.f32 %v1649_v52, %v1871_v38  ;;  %v678_v57 = vadd.f32 %v1871_v38, %v677_v53  ;;  %v805_v58 = vpop.f32.mrb[19].mxu1 }
 0x10b   : > { %v1514_v59 = vpack.c.bf16 %v883_v49, %v883_v49  ;;  %v913_v60 = vmax.f32 %v803_v50, 0.0  ;;  %v884_v61 = vmax.f32 %v686_v51, 0.0  ;;  %v806_v62 = vadd.f32 %v1871_v38, %v805_v58 }
 0x10c   : > { %v1546_v63 = vpack.c.bf16 %v915_v54, %v915_v54  ;;  %v1512_v0 = vpack.c.bf16 %v881_v55, %v881_v55  ;;  %v916_v1 = vmax.f32 %v814_v56, 0.0  ;;  %v882_v2 = vmax.f32 %v678_v57, 0.0 }
 0x10d   : > { %1204 = vst.msk [vmem:[%s1883_s29 + $0x48] sm:$0xf] %vm1185_vm3, %v1514_v59  ;;  %v1544_v3 = vpack.c.bf16 %v913_v60, %v913_v60  ;;  %v1515_v4 = vpack.c.bf16 %v884_v61, %v884_v61  ;;  %v914_v5 = vmax.f32 %v806_v62, 0.0 }
 0x10e   : > { %1236 = vst.msk [vmem:[%s1883_s29 + $0xc8] sm:$0xf] %vm1185_vm3, %v1546_v63  ;;  %1202 = vst.msk [vmem:[%s1883_s29 + $0x40] sm:$0xf] %vm1185_vm3, %v1512_v0  ;;  %v1547_v6 = vpack.c.bf16 %v916_v1, %v916_v1  ;;  %v1513_v7 = vpack.c.bf16 %v882_v2, %v882_v2  ;;  %v1620_v8 = vpop.f32.mrb[20].mxu0 }
 0x10f   : > { %1234 = vst.msk [vmem:[%s1883_s29 + $0xc0] sm:$0xf] %vm1185_vm3, %v1544_v3  ;;  %1205 = vst.msk [vmem:[%s1883_s29 + $0x4c] sm:$0xf] %vm1185_vm3, %v1515_v4  ;;  %v1545_v9 = vpack.c.bf16 %v914_v5, %v914_v5  ;;  %v699_v10 = vadd.f32 %v1620_v8, %v1871_v38  ;;  %v1652_v11 = vpop.f32.mrb[20].mxu1  ;;  %v690_v12 = vpop.f32.mrb[21].mxu0 }
 0x110   : > { %1237 = vst.msk [vmem:[%s1883_s29 + $0xcc] sm:$0xf] %vm1185_vm3, %v1547_v6  ;;  %1203 = vst.msk [vmem:[%s1883_s29 + $0x44] sm:$0xf] %vm1185_vm3, %v1513_v7  ;;  %v827_v13 = vadd.f32 %v1652_v11, %v1871_v38  ;;  %v691_v14 = vadd.f32 %v1871_v38, %v690_v12  ;;  %v818_v15 = vpop.f32.mrb[21].mxu1  ;;  %v1621_v16 = vpop.f32.mrb[22].mxu0 }
 0x111   : > { %1235 = vst.msk [vmem:[%s1883_s29 + $0xc4] sm:$0xf] %vm1185_vm3, %v1545_v9  ;;  %v887_v17 = vmax.f32 %v699_v10, 0.0  ;;  %v819_v18 = vadd.f32 %v1871_v38, %v818_v15  ;;  %v702_v19 = vadd.f32 %v1621_v16, %v1871_v38  ;;  %v1653_v20 = vpop.f32.mrb[22].mxu1  ;;  %v693_v21 = vpop.f32.mrb[23].mxu0 }
 0x112   : > { %v919_v22 = vmax.f32 %v827_v13, 0.0  ;;  %v885_v23 = vmax.f32 %v691_v14, 0.0  ;;  %v830_v24 = vadd.f32 %v1653_v20, %v1871_v38  ;;  %v694_v25 = vadd.f32 %v1871_v38, %v693_v21  ;;  %v821_v26 = vpop.f32.mrb[23].mxu1 }
 0x113   : > { %v1518_v27 = vpack.c.bf16 %v887_v17, %v887_v17  ;;  %v917_v28 = vmax.f32 %v819_v18, 0.0  ;;  %v888_v29 = vmax.f32 %v702_v19, 0.0  ;;  %v822_v30 = vadd.f32 %v1871_v38, %v821_v26 }
 0x114   : > { %v1550_v31 = vpack.c.bf16 %v919_v22, %v919_v22  ;;  %v1516_v32 = vpack.c.bf16 %v885_v23, %v885_v23  ;;  %v920_v33 = vmax.f32 %v830_v24, 0.0  ;;  %v886_v34 = vmax.f32 %v694_v25, 0.0 }
 0x115   : > { %1208 = vst.msk [vmem:[%s1883_s29 + $0x58] sm:$0xf] %vm1185_vm3, %v1518_v27  ;;  %v1548_v35 = vpack.c.bf16 %v917_v28, %v917_v28  ;;  %v1519_v36 = vpack.c.bf16 %v888_v29, %v888_v29  ;;  %v918_v37 = vmax.f32 %v822_v30, 0.0 }
 0x116   : > { %1240 = vst.msk [vmem:[%s1883_s29 + $0xd8] sm:$0xf] %vm1185_vm3, %v1550_v31  ;;  %1206 = vst.msk [vmem:[%s1883_s29 + $0x50] sm:$0xf] %vm1185_vm3, %v1516_v32  ;;  %v1551_v39 = vpack.c.bf16 %v920_v33, %v920_v33  ;;  %v1517_v40 = vpack.c.bf16 %v886_v34, %v886_v34  ;;  %v1624_v41 = vpop.f32.mrb[24].mxu0 }
 0x117   : > { %1238 = vst.msk [vmem:[%s1883_s29 + $0xd0] sm:$0xf] %vm1185_vm3, %v1548_v35  ;;  %1209 = vst.msk [vmem:[%s1883_s29 + $0x5c] sm:$0xf] %vm1185_vm3, %v1519_v36  ;;  %v1549_v42 = vpack.c.bf16 %v918_v37, %v918_v37  ;;  %v715_v43 = vadd.f32 %v1624_v41, %v1871_v38  ;;  %v1656_v44 = vpop.f32.mrb[24].mxu1  ;;  %v706_v45 = vpop.f32.mrb[25].mxu0 }
 0x118   : > { %1241 = vst.msk [vmem:[%s1883_s29 + $0xdc] sm:$0xf] %vm1185_vm3, %v1551_v39  ;;  %1207 = vst.msk [vmem:[%s1883_s29 + $0x54] sm:$0xf] %vm1185_vm3, %v1517_v40  ;;  %v843_v46 = vadd.f32 %v1656_v44, %v1871_v38  ;;  %v707_v47 = vadd.f32 %v1871_v38, %v706_v45  ;;  %v834_v48 = vpop.f32.mrb[25].mxu1  ;;  %v1625_v49 = vpop.f32.mrb[26].mxu0 }
 0x119   : > { %1239 = vst.msk [vmem:[%s1883_s29 + $0xd4] sm:$0xf] %vm1185_vm3, %v1549_v42  ;;  %v891_v50 = vmax.f32 %v715_v43, 0.0  ;;  %v835_v51 = vadd.f32 %v1871_v38, %v834_v48  ;;  %v718_v52 = vadd.f32 %v1625_v49, %v1871_v38  ;;  %v1657_v53 = vpop.f32.mrb[26].mxu1  ;;  %v709_v54 = vpop.f32.mrb[27].mxu0 }
 0x11a   : > { %v923_v55 = vmax.f32 %v843_v46, 0.0  ;;  %v889_v56 = vmax.f32 %v707_v47, 0.0  ;;  %v846_v57 = vadd.f32 %v1657_v53, %v1871_v38  ;;  %v710_v58 = vadd.f32 %v1871_v38, %v709_v54  ;;  %v837_v59 = vpop.f32.mrb[27].mxu1 }
 0x11b   : > { %v1522_v60 = vpack.c.bf16 %v891_v50, %v891_v50  ;;  %v921_v61 = vmax.f32 %v835_v51, 0.0  ;;  %v892_v62 = vmax.f32 %v718_v52, 0.0  ;;  %v838_v63 = vadd.f32 %v1871_v38, %v837_v59 }
 0x11c   : > { %v1554_v0 = vpack.c.bf16 %v923_v55, %v923_v55  ;;  %v1520_v1 = vpack.c.bf16 %v889_v56, %v889_v56  ;;  %v924_v2 = vmax.f32 %v846_v57, 0.0  ;;  %v890_v3 = vmax.f32 %v710_v58, 0.0 }
 0x11d   : > { %1212 = vst.msk [vmem:[%s1883_s29 + $0x68] sm:$0xf] %vm1185_vm3, %v1522_v60  ;;  %v1552_v4 = vpack.c.bf16 %v921_v61, %v921_v61  ;;  %v1523_v5 = vpack.c.bf16 %v892_v62, %v892_v62  ;;  %v922_v6 = vmax.f32 %v838_v63, 0.0 }
 0x11e   : > { %1244 = vst.msk [vmem:[%s1883_s29 + $0xe8] sm:$0xf] %vm1185_vm3, %v1554_v0  ;;  %1210 = vst.msk [vmem:[%s1883_s29 + $0x60] sm:$0xf] %vm1185_vm3, %v1520_v1  ;;  %v1555_v7 = vpack.c.bf16 %v924_v2, %v924_v2  ;;  %v1521_v8 = vpack.c.bf16 %v890_v3, %v890_v3  ;;  %v1628_v9 = vpop.f32.mrb[28].mxu0 }
 0x11f   : > { %1242 = vst.msk [vmem:[%s1883_s29 + $0xe0] sm:$0xf] %vm1185_vm3, %v1552_v4  ;;  %1213 = vst.msk [vmem:[%s1883_s29 + $0x6c] sm:$0xf] %vm1185_vm3, %v1523_v5  ;;  %v1553_v10 = vpack.c.bf16 %v922_v6, %v922_v6  ;;  %v731_v11 = vadd.f32 %v1628_v9, %v1871_v38  ;;  %v1660_v12 = vpop.f32.mrb[28].mxu1  ;;  %v722_v13 = vpop.f32.mrb[29].mxu0 }
 0x120   : > { %1245 = vst.msk [vmem:[%s1883_s29 + $0xec] sm:$0xf] %vm1185_vm3, %v1555_v7  ;;  %1211 = vst.msk [vmem:[%s1883_s29 + $0x64] sm:$0xf] %vm1185_vm3, %v1521_v8  ;;  %v859_v14 = vadd.f32 %v1660_v12, %v1871_v38  ;;  %v723_v15 = vadd.f32 %v1871_v38, %v722_v13  ;;  %v850_v16 = vpop.f32.mrb[29].mxu1  ;;  %v1629_v17 = vpop.f32.mrb[30].mxu0 }
 0x121   : > { %1243 = vst.msk [vmem:[%s1883_s29 + $0xe4] sm:$0xf] %vm1185_vm3, %v1553_v10  ;;  %v895_v18 = vmax.f32 %v731_v11, 0.0  ;;  %v851_v19 = vadd.f32 %v1871_v38, %v850_v16  ;;  %v734_v20 = vadd.f32 %v1629_v17, %v1871_v38  ;;  %v1661_v21 = vpop.f32.mrb[30].mxu1  ;;  %v725_v22 = vpop.f32.mrb[31].mxu0 }
 0x122   : > { %v927_v23 = vmax.f32 %v859_v14, 0.0  ;;  %v893_v24 = vmax.f32 %v723_v15, 0.0  ;;  %v862_v25 = vadd.f32 %v1661_v21, %v1871_v38  ;;  %v726_v26 = vadd.f32 %v1871_v38, %v725_v22  ;;  %v853_v27 = vpop.f32.mrb[31].mxu1 }
 0x123   : > { %v1526_v28 = vpack.c.bf16 %v895_v18, %v895_v18  ;;  %v925_v29 = vmax.f32 %v851_v19, 0.0  ;;  %v896_v30 = vmax.f32 %v734_v20, 0.0  ;;  %v854_v31 = vadd.f32 %v1871_v38, %v853_v27 }
 0x124   : > { %v1558_v32 = vpack.c.bf16 %v927_v23, %v927_v23  ;;  %v1524_v33 = vpack.c.bf16 %v893_v24, %v893_v24  ;;  %v928_v34 = vmax.f32 %v862_v25, 0.0  ;;  %v894_v35 = vmax.f32 %v726_v26, 0.0 }
 0x125   : > { %1216 = vst.msk [vmem:[%s1883_s29 + $0x78] sm:$0xf] %vm1185_vm3, %v1526_v28  ;;  %v1556_v36 = vpack.c.bf16 %v925_v29, %v925_v29  ;;  %v1527_v37 = vpack.c.bf16 %v896_v30, %v896_v30  ;;  %v926_v39 = vmax.f32 %v854_v31, 0.0 }
 0x126   : > { %1248 = vst.msk [vmem:[%s1883_s29 + $0xf8] sm:$0xf] %vm1185_vm3, %v1558_v32  ;;  %1214 = vst.msk [vmem:[%s1883_s29 + $0x70] sm:$0xf] %vm1185_vm3, %v1524_v33  ;;  %v1559_v40 = vpack.c.bf16 %v928_v34, %v928_v34  ;;  %v1525_v41 = vpack.c.bf16 %v894_v35, %v894_v35 }
 0x127   : > { %1246 = vst.msk [vmem:[%s1883_s29 + $0xf0] sm:$0xf] %vm1185_vm3, %v1556_v36  ;;  %1217 = vst.msk [vmem:[%s1883_s29 + $0x7c] sm:$0xf] %vm1185_vm3, %v1527_v37  ;;  %v1557_v38 = vpack.c.bf16 %v926_v39, %v926_v39 }
 0x128   : > { %1249 = vst.msk [vmem:[%s1883_s29 + $0xfc] sm:$0xf] %vm1185_vm3, %v1559_v40  ;;  %1215 = vst.msk [vmem:[%s1883_s29 + $0x74] sm:$0xf] %vm1185_vm3, %v1525_v41 }
 0x129   : > { %1247 = vst.msk [vmem:[%s1883_s29 + $0xf4] sm:$0xf] %vm1185_vm3, %v1557_v38 }
 0x12a PF: > { %s13_s14 = sadd.s32 1, %s1747_s14   ;;  %s2085_s12 = smov %s1743_s13 }
 0x12b   : > { %p10_p5 = scmp.ge.s32.totalorder %s13_s14, 4   ;;  %s2086_s13 = smov %s2088_s15 }
 0x12d   :  { %12 = sbr.rel (!%p10_p5) target bundleno = 2 (0x2), region = 68 }

// kernel: encoder_forward.5
= control target key start
LH: loop header
LB: loop body
LE: loop exit
PB: predicated region body
PF: predicated region fallthrough
CT: control target
= control target key end

     0   :  { %s1885_s12 = smov 0   ;;  %s2131_s0 = inlined_call_operand.vmem [shape: bf16[8,4,25,96], index: 0, kind: input, shape index: {}]   ;;  %s2132_s1 = inlined_call_operand.vmem [shape: bf16[9,96,64], index: 1, kind: input, shape index: {}]   ;;  %s2133_s2 = inlined_call_operand.vmem [shape: f32[1,64], index: 2, kind: input, shape index: {}]   ;;  %s2134_s3 = inlined_call_operand.vmem [shape: bf16[8,19,64], index: 3, kind: output, shape index: {}]  }
   0x1 LB: > { %s1353_s13 = sadd.s32 4294967295, %s1863_s12   ;;  %p1357_p0 = scmp.ge.s32.totalorder %s1863_s12, 1  ;;  %s1863_s12 = sphi %s1885_s12, %s13_s12  }
   0x2   : > { %p137_p1 = scmp.lt.s32.totalorder %s1863_s12, 9 }
   0x4   : > { %p138_p2 = pnand %p1357_p0, %p137_p1 }
   0x5   : > { %v1789_v0 = vld [vmem:[%s2132_s1 + $0x30] sm:$0xff] (!%p138_p2)   ;;  %p161_p3 = scmp.lt.s32.totalorder (!%p138_p2), %s1353_s13, 7  ;;  %v1790_v1 = vld [vmem:[%s2132_s1] sm:$0xff] (!%p138_p2)   ;;  %v1791_v2 = vld [vmem:[%s2132_s1 + $0x38] sm:$0xff] (!%p138_p2)   ;;  %vm248_vm0 = vcmask (!%p138_p2), 785408   ;;  %vm1166_vm3 = vcmask (!%p138_p2), 1044480  }
   0x6   : > { %141 = sbr.rel (%p138_p2) target bundleno = 350 (0x15e), region = 32  ;;  %1636 = vmatprep.subr.bf16.mxu0 (!%p138_p2), %v1789_v0  ;;  %1652 = vmatprep.subr.bf16.mxu1 (!%p138_p2), %v1790_v1  ;;  %v1792_v3 = vld [vmem:[%s2132_s1 + $0x8] sm:$0xff] (!%p138_p2)   ;;  %v1793_v4 = vld [vmem:[%s2132_s1 + $0x40] sm:$0xff] (!%p138_p2)   ;;  %v1794_v5 = vld [vmem:[%s2132_s1 + $0x10] sm:$0xff] (!%p138_p2)   ;;  %vm414_vm1 = vsmask.f32 (!%p138_p2), 7424 }
   0x7   : > { %1637 = vmatpush3.bf16.msra.mxu0 (!%p138_p2), %v1789_v0  ;;  %1653 = vmatpush3.bf16.msra.mxu1 (!%p138_p2), %v1790_v1  ;;  %v1795_v6 = vld [vmem:[%s2132_s1 + $0x48] sm:$0xff] (!%p138_p2)   ;;  %v1796_v7 = vld [vmem:[%s2132_s1 + $0x18] sm:$0xff] (!%p138_p2)   ;;  %v1797_v8 = vld [vmem:[%s2132_s1 + $0x50] sm:$0xff] (!%p138_p2)   ;;  %vm897_vm2 = vsmask.f32 (!%p138_p2), 5376  ;;  %vm1292_vm4 = vcmask (!%p138_p2), 517120  }
   0x8   : > { %1638 = vmatprep.subr.bf16.mxu0 (!%p138_p2), %v1791_v2  ;;  %1654 = vmatprep.subr.bf16.mxu1 (!%p138_p2), %v1792_v3  ;;  %v1798_v11 = vld [vmem:[%s2132_s1 + $0x20] sm:$0xff] (!%p138_p2)   ;;  %v1799_v16 = vld [vmem:[%s2132_s1 + $0x58] sm:$0xff] (!%p138_p2)   ;;  %v1800_v17 = vld [vmem:[%s2132_s1 + $0x28] sm:$0xff] (!%p138_p2)   ;;  %vm1293_vm5 = vsmask.f32 (!%p138_p2), 1280  ;;  %vm1289_vm7 = vcmask (!%p138_p2), 519168  }
   0x9   : > { %v1807_v21 = vld [vmem:[%s2132_s1 + $0x60] sm:$0xff] (!%p138_p2)   ;;  %v1808_v23 = vld [vmem:[%s2132_s1 + $0x90] sm:$0xff] (!%p138_p2)   ;;  %v1809_v26 = vld [vmem:[%s2132_s1 + $0x68] sm:$0xff] (!%p138_p2)  }
   0xa   : > { %v1810_v27 = vld [vmem:[%s2132_s1 + $0x98] sm:$0xff] (!%p138_p2)   ;;  %v1811_v30 = vld [vmem:[%s2132_s1 + $0x70] sm:$0xff] (!%p138_p2)   ;;  %v1812_v31 = vld [vmem:[%s2132_s1 + $0xa0] sm:$0xff] (!%p138_p2)  }
   0xb   : > { %1639 = vmatpush3.bf16.msra.mxu0 (!%p138_p2), %v1791_v2  ;;  %1655 = vmatpush3.bf16.msra.mxu1 (!%p138_p2), %v1792_v3  ;;  %v1813_v34 = vld [vmem:[%s2132_s1 + $0x78] sm:$0xff] (!%p138_p2)   ;;  %v1814_v35 = vld [vmem:[%s2132_s1 + $0xa8] sm:$0xff] (!%p138_p2)   ;;  %v1815_v36 = vld [vmem:[%s2132_s1 + $0x80] sm:$0xff] (!%p138_p2)  }
   0xc   : > { %1640 = vmatprep.subr.bf16.mxu0 (!%p138_p2), %v1793_v4  ;;  %1656 = vmatprep.subr.bf16.mxu1 (!%p138_p2), %v1794_v5  ;;  %v1816_v37 = vld [vmem:[%s2132_s1 + $0xb0] sm:$0xff] (!%p138_p2)   ;;  %v1817_v40 = vld [vmem:[%s2132_s1 + $0x88] sm:$0xff] (!%p138_p2)   ;;  %v1818_v41 = vld [vmem:[%s2132_s1 + $0xb8] sm:$0xff] (!%p138_p2)  }
   0xd   : > { %s2136_s13 = smov (!%p161_p3, %s1353_s13), 7  ;;  %v1819_v46 = vld [vmem:[%s2132_s1 + $0xc0] sm:$0xff]   ;;  %v1822_v47 = vld [vmem:[%s2132_s1 + $0xf0] sm:$0xff]   ;;  %v1823_v49 = vld [vmem:[%s2132_s1 + $0xc8] sm:$0xff]  }
   0xe   : > { %s1560_s26 = sshll.u32 %s2136_s13, 6  ;;  %v1824_v52 = vld [vmem:[%s2132_s1 + $0xf8] sm:$0xff]   ;;  %v1825_v57 = vld [vmem:[%s2132_s1 + $0xd0] sm:$0xff]   ;;  %v1826_v59 = vld [vmem:[%s2132_s1 + $0x100] sm:$0xff]   ;;  %s1780_s28 = smul.u32 12, %s2136_s13 }
   0xf   : > { %s1923_s6 = scalar_lea.vmem %s2131_s0, %s1560_s26  ;;  %1641 = vmatpush3.bf16.msra.mxu0 %v1793_v4  ;;  %1657 = vmatpush3.bf16.msra.mxu1 %v1794_v5  ;;  %v1827_v61 = vld [vmem:[%s2132_s1 + $0xd8] sm:$0xff]   ;;  %v1828_v63 = vld [vmem:[%s2132_s1 + $0x108] sm:$0xff]   ;;  %v1829_v3 = vld [vmem:[%s2132_s1 + $0xe0] sm:$0xff]  }
  0x10   : > { %1642 = vmatprep.subr.bf16.mxu0 %v1795_v6  ;;  %v1361_v9 = vld [vmem:[%s1923_s6 + $0x10] sm:$0xf]  ;;  %v1930_v10 = vld [vmem:[%s1923_s6 + $0x14] sm:$0xf]  ;;  %1658 = vmatprep.subr.bf16.mxu1 %v1796_v7  ;;  %v172_v13 = vld [vmem:[%s1923_s6] sm:$0xf]  ;;  %s170_s7 = scalar_lea.vmem %s2134_s3, %s1780_s28 }
  0x11   : > { %v1376_v12 = vcombine.low %v1361_v9, %v1930_v10  ;;  %v1938_v14 = vld [vmem:[%s1923_s6 + $0x4] sm:$0xf]  ;;  %v1950_v19 = vld [vmem:[%s1923_s6 + $0x8] ss:$0 sps:$4 sm:$0x33]   ;;  %v1833_v53 = vld [vmem:[%s1923_s6 + $0x30] sm:$0xff]  }
  0x12   : > { %v1386_v15 = vcombine.low %v172_v13, %v1938_v14  ;;  %v1805_v20 = vld [vmem:[%s1923_s6 + $0x18] ss:$0 sps:$4 sm:$0x33]   ;;  %v421_v25 = vshll.u32 %v1950_v19, 16  ;;  %v1820_v33 = vld [vmem:[%s1923_s6 + $0x20] sm:$0xff]   ;;  %v425_v42 = vshrl.u32 %v1950_v19, 16  ;;  %vm1294_vm6 = vmand %vm1292_vm4, %vm1293_vm5 }
  0x13   : > { %1643 = vmatpush3.bf16.msra.mxu0 %v1795_v6  ;;  %1648 = vmatprep.mubr.msk.bf16.mxu0 %vm248_vm0, %v1376_v12  ;;  %v1992_v38 = vld [vmem:[%s1923_s6 + $0x28] ss:$0 sps:$4 sm:$0x33]   ;;  %v772_v39 = vshll.u32 %v1820_v33, 16  ;;  %v770_v43 = vshrl.u32 %v1820_v33, 16 }
  0x14   : > { %1659 = vmatpush3.bf16.msra.mxu1 %v1796_v7  ;;  %1644 = vmatprep.subr.bf16.mxu0 %v1797_v8  ;;  %v417_v18 = vshll.u32 %v1386_v15, 16  ;;  %v415_v22 = vshrl.u32 %v1386_v15, 16  ;;  %v423_v29 = vrot.slane %v421_v25, 1  ;;  %v776_v45 = vshll.u32 %v1992_v38, 16  ;;  %v1508_v54 = vld [vmem:[%s1923_s6 + $0x10] sm:$0xc] }
  0x15   : > { %1660 = vmatprep.subr.bf16.mxu1 %v1798_v11  ;;  %1664 = vmatprep.mubr.msk.bf16.mxu1 %vm248_vm0, %v1386_v15  ;;  %v774_v44 = vrot.slane %v772_v39, 1  ;;  %v876_v55 = vld [vmem:[%s1923_s6] sm:$0xc]  ;;  %v1522_v58 = vcombine.low %v1508_v54, %v1930_v10  ;;  %v1847_v0 = vld [vmem:[%s1923_s6 + $0x8] ss:$0 sps:$4 sm:$0xff]   ;;  %v1830_v7 = vld [vmem:[%s2132_s1 + $0x110] sm:$0xff]  }
  0x16   : > { %v419_v24 = vrot.slane %v417_v18, 1  ;;  %v427_v48 = vor.u32 %v425_v42, %v423_v29  ;;  %v2011_v51 = vrot.slane %v776_v45, 1  ;;  %v1498_v60 = vcombine.low %v876_v55, %v1938_v14  ;;  %v1849_v2 = vld [vmem:[%s1923_s6 + $0x18] ss:$0 sps:$4 sm:$0xff]   ;;  %v1844_v39 = vld [vmem:[%s2132_s1 + $0x170] sm:$0xff]  }
  0x17   : > { %1645 = vmatpush3.bf16.msra.mxu0 %v1797_v8  ;;  %v775_v50 = vor.u32 %v774_v44, %v770_v43  ;;  %v1030_v62 = vshrl.u32 %v1522_v58, 16  ;;  %v1033_v5 = vshll.u32 %v1522_v58, 16  ;;  %v907_v8 = vshrl.u32 %v1847_v0, 16  ;;  %v1832_v15 = vld [vmem:[%s2132_s1 + $0x118] sm:$0xff]   ;;  %v1855_v42 = vld [vmem:[%s1923_s6] sm:$0xf8]  }
  0x18   : > { %1661 = vmatpush3.bf16.msra.mxu1 %v1798_v11  ;;  %1646 = vmatprep.subr.bf16.mxu0 %v1799_v16  ;;  %v420_v28 = vor.u32 %v419_v24, %v415_v22  ;;  %v899_v1 = vshrl.u32 %v1498_v60, 16  ;;  %v902_v6 = vshll.u32 %v1498_v60, 16  ;;  %v910_v9 = vshll.u32 %v1847_v0, 16  ;;  %v1831_v11 = vld [vmem:[%s2132_s1 + $0xe8] sm:$0xff]   ;;  %v1835_v22 = vld [vmem:[%s2132_s1 + $0x120] sm:$0xff]  }
  0x19   : > { %1662 = vmatprep.subr.bf16.mxu1 %v1800_v17  ;;  %v779_v56 = vsel %vm414_vm1, %v775_v50, %v2011_v51  ;;  %v1032_v4 = vrot.slane %v1030_v62, 2  ;;  %v1038_v12 = vshrl.u32 %v1849_v2, 16  ;;  %v1041_v13 = vshll.u32 %v1849_v2, 16  ;;  %v1834_v24 = vld [vmem:[%s1923_s6 + $0x38] ss:$0 sps:$4 sm:$0x33]  }
  0x1a   : > { %v424_v32 = vsel %vm414_vm1, %v420_v28, %v423_v29  ;;  %v901_v10 = vrot.slane %v899_v1, 2  ;;  %v904_v14 = vrot.slane %v902_v6, 3  ;;  %v1035_v18 = vrot.slane %v1033_v5, 3  ;;  %v1856_v43 = vld [vmem:[%s1923_s6 + $0x8] sm:$0x1f]   ;;  %v1848_v44 = vld [vmem:[%s2132_s1 + $0x180] sm:$0xff]  }
  0x1b   : > { %1647 = vmatpush3.bf16.msra.mxu0 %v1799_v16  ;;  %v909_v16 = vrot.slane %v907_v8, 2  ;;  %v1167_v45 = vrot.slane %v1855_v42, 3  ;;  %v1852_v50 = vld [vmem:[%s2132_s1 + $0x198] sm:$0xff]  }
  0x1c   : > { %1663 = vmatpush3.bf16.msra.mxu1 %v1800_v17  ;;  %1668 = vmatprep.subr.bf16.mxu0 %v1807_v21  ;;  %v912_v17 = vrot.slane %v910_v9, 3  ;;  %v905_v25 = vor.u32 %v904_v14, %v901_v10  ;;  %v1036_v28 = vor.u32 %v1035_v18, %v1032_v4 }
  0x1d   : > { %1684 = vmatprep.subr.bf16.mxu1 %v1808_v23 }
  0x1e   : > { %1649 = vmatmul.mubr.msk.bf16.vlgmr.msra.gmra.mrb[0].mxu0 %vm248_vm0, %v1805_v20  ;;  %v1040_v20 = vrot.slane %v1038_v12, 2 }
  0x1f   : > { %1665 = vmatmul.mubr.msk.bf16.vlgmr.msra.gmra.mrb[0].mxu1 %vm248_vm0, %v1950_v19  ;;  %1669 = vmatpush3.bf16.msra.mxu0 %v1807_v21  ;;  %v780_v19 = vshrl.u32 %v1992_v38, 16  ;;  %v1043_v21 = vrot.slane %v1041_v13, 3 }
  0x20   : > { %1685 = vmatpush3.bf16.msra.mxu1 %v1808_v23  ;;  %1670 = vmatprep.subr.bf16.mxu0 %v1809_v26  ;;  %v1836_v23 = vld [vmem:[%s2132_s1 + $0x150] sm:$0xff]  }
  0x21   : > { %1686 = vmatprep.subr.bf16.mxu1 %v1810_v27  ;;  %1680 = vmatprep.mubr.msk.bf16.mxu0 %vm248_vm0, %v424_v32  ;;  %v1044_v29 = vor.u32 %v1043_v21, %v1040_v20 }
  0x22   : > { %1696 = vmatprep.mubr.msk.bf16.mxu1 %vm248_vm0, %v1820_v33 }
  0x23   : > { %1671 = vmatpush3.bf16.msra.mxu0 %v1809_v26  ;;  %v913_v26 = vor.u32 %v912_v17, %v909_v16  ;;  %v1045_v33 = vsel %vm897_vm2, %v1036_v28, %v1044_v29 }
  0x24   : > { %1687 = vmatpush3.bf16.msra.mxu1 %v1810_v27  ;;  %1672 = vmatprep.subr.bf16.mxu0 %v1811_v30  ;;  %v782_v27 = vor.u32 %v780_v19, %v2011_v51  ;;  %v1853_v51 = vld [vmem:[%s2132_s1 + $0x1a0] sm:$0xff]  }
  0x25   : > { %1688 = vmatprep.subr.bf16.mxu1 %v1812_v31  ;;  %v914_v32 = vsel %vm897_vm2, %v905_v25, %v913_v26 }
  0x27   : > { %1673 = vmatpush3.bf16.msra.mxu0 %v1811_v30  ;;  %v1837_v30 = vld [vmem:[%s2132_s1 + $0x128] sm:$0xff]  }
  0x28   : > { %1689 = vmatpush3.bf16.msra.mxu1 %v1812_v31  ;;  %1674 = vmatprep.subr.bf16.mxu0 %v1813_v34  ;;  %v1838_v31 = vld [vmem:[%s2132_s1 + $0x158] sm:$0xff]  }
  0x29   : > { %1690 = vmatprep.subr.bf16.mxu1 %v1814_v35 }
  0x2b   : > { %1675 = vmatpush3.bf16.msra.mxu0 %v1813_v34  ;;  %v1839_v34 = vld [vmem:[%s2132_s1 + $0x130] sm:$0xff]  }
  0x2c   : > { %1691 = vmatpush3.bf16.msra.mxu1 %v1814_v35  ;;  %1676 = vmatprep.subr.bf16.mxu0 %v1815_v36  ;;  %v1840_v35 = vld [vmem:[%s2132_s1 + $0x160] sm:$0xff]  }
  0x2d   : > { %1692 = vmatprep.subr.bf16.mxu1 %v1816_v37 }
  0x2f   : > { %1677 = vmatpush3.bf16.msra.mxu0 %v1815_v36  ;;  %v1841_v36 = vld [vmem:[%s2132_s1 + $0x138] sm:$0xff]  }
  0x30   : > { %1693 = vmatpush3.bf16.msra.mxu1 %v1816_v37  ;;  %1678 = vmatprep.subr.bf16.mxu0 %v1817_v40  ;;  %v1842_v37 = vld [vmem:[%s2132_s1 + $0x168] sm:$0xff]  }
  0x31   : > { %1694 = vmatprep.subr.bf16.mxu1 %v1818_v41 }
  0x33   : > { %1679 = vmatpush3.bf16.msra.mxu0 %v1817_v40  ;;  %v1845_v40 = vld [vmem:[%s2132_s1 + $0x148] sm:$0xff]  }
  0x34   : > { %1695 = vmatpush3.bf16.msra.mxu1 %v1818_v41  ;;  %1700 = vmatprep.subr.bf16.mxu0 %v1819_v46  ;;  %v1846_v41 = vld [vmem:[%s2132_s1 + $0x178] sm:$0xff]  }
  0x35   : > { %1716 = vmatprep.subr.bf16.mxu1 %v1822_v47 }
  0x36   : > { %1681 = vmatmul.mubr.msk.bf16.vlgmr.msra.gmra.mrb[4].mxu0 %vm248_vm0, %v427_v48 }
  0x37   : > { %1701 = vmatpush3.bf16.msra.mxu0 %v1819_v46  ;;  %1697 = vmatmul.mubr.msk.bf16.vlgmr.msra.gmra.mrb[4].mxu1 %vm248_vm0, %v1992_v38  ;;  %v1843_v38 = vld [vmem:[%s2132_s1 + $0x140] sm:$0xff]   ;;  %v1168_v46 = vrot.slane %v1856_v43, 3 }
  0x38   : > { %1717 = vmatpush3.bf16.msra.mxu1 %v1822_v47  ;;  %1702 = vmatprep.subr.bf16.mxu0 %v1823_v49  ;;  %v1850_v47 = vld [vmem:[%s2132_s1 + $0x188] sm:$0xff]   ;;  %v1554_v43 = vld [vmem:[%s2133_s2] ss:$0 sm:$0xff] }
  0x39   : > { %1718 = vmatprep.subr.bf16.mxu1 %v1824_v52  ;;  %1712 = vmatprep.mubr.msk.bf16.mxu0 %vm248_vm0, %v1833_v53  ;;  %v1169_v48 = vsel %vm1166_vm3, %v1167_v45, %v1168_v46 }
  0x3a   : > { %1728 = vmatprep.mubr.msk.bf16.mxu1 %vm248_vm0, %v779_v56 }
  0x3b   : > { %1703 = vmatpush3.bf16.msra.mxu0 %v1823_v49  ;;  %v1851_v49 = vld [vmem:[%s2132_s1 + $0x190] sm:$0xff]  }
  0x3c   : > { %1719 = vmatpush3.bf16.msra.mxu1 %v1824_v52  ;;  %1704 = vmatprep.subr.bf16.mxu0 %v1825_v57  ;;  %v1854_v52 = vld [vmem:[%s2132_s1 + $0x1a8] sm:$0xff]  }
  0x3d   : > { %1720 = vmatprep.subr.bf16.mxu1 %v1826_v59 }
  0x3f   : > { %1705 = vmatpush3.bf16.msra.mxu0 %v1825_v57 }
  0x40   : > { %1721 = vmatpush3.bf16.msra.mxu1 %v1826_v59  ;;  %1706 = vmatprep.subr.bf16.mxu0 %v1827_v61 }
  0x41   : > { %1722 = vmatprep.subr.bf16.mxu1 %v1828_v63 }
  0x43   : > { %1707 = vmatpush3.bf16.msra.mxu0 %v1827_v61 }
  0x44   : > { %1723 = vmatpush3.bf16.msra.mxu1 %v1828_v63  ;;  %1708 = vmatprep.subr.bf16.mxu0 %v1829_v3 }
  0x45   : > { %1724 = vmatprep.subr.bf16.mxu1 %v1830_v7 }
  0x47   : > { %1709 = vmatpush3.bf16.msra.mxu0 %v1829_v3 }
  0x48   : > { %1725 = vmatpush3.bf16.msra.mxu1 %v1830_v7  ;;  %1710 = vmatprep.subr.bf16.mxu0 %v1831_v11 }
  0x49   : > { %1726 = vmatprep.subr.bf16.mxu1 %v1832_v15 }
  0x4b   : > { %1711 = vmatpush3.bf16.msra.mxu0 %v1831_v11 }
  0x4c   : > { %1727 = vmatpush3.bf16.msra.mxu1 %v1832_v15  ;;  %1732 = vmatprep.subr.bf16.mxu0 %v1835_v22 }
  0x4d   : > { %1748 = vmatprep.subr.bf16.mxu1 %v1836_v23 }
  0x4e   : > { %1713 = vmatmul.mubr.msk.bf16.vlgmr.msra.gmra.mrb[8].mxu0 %vm248_vm0, %v1834_v24 }
  0x4f   : > { %1733 = vmatpush3.bf16.msra.mxu0 %v1835_v22  ;;  %1729 = vmatmul.mubr.msk.bf16.vlgmr.msra.gmra.mrb[8].mxu1 %vm248_vm0, %v782_v27 }
  0x50   : > { %1749 = vmatpush3.bf16.msra.mxu1 %v1836_v23  ;;  %1734 = vmatprep.subr.bf16.mxu0 %v1837_v30 }
  0x51   : > { %1750 = vmatprep.subr.bf16.mxu1 %v1838_v31  ;;  %1744 = vmatprep.mubr.msk.bf16.mxu0 %vm248_vm0, %v914_v32 }
  0x52   : > { %1760 = vmatprep.mubr.msk.bf16.mxu1 %vm248_vm0, %v1045_v33 }
  0x53   : > { %1735 = vmatpush3.bf16.msra.mxu0 %v1837_v30 }
  0x54   : > { %1751 = vmatpush3.bf16.msra.mxu1 %v1838_v31  ;;  %1736 = vmatprep.subr.bf16.mxu0 %v1839_v34 }
  0x55   : > { %1752 = vmatprep.subr.bf16.mxu1 %v1840_v35 }
  0x57   : > { %1737 = vmatpush3.bf16.msra.mxu0 %v1839_v34 }
  0x58   : > { %1753 = vmatpush3.bf16.msra.mxu1 %v1840_v35  ;;  %1738 = vmatprep.subr.bf16.mxu0 %v1841_v36 }
  0x59   : > { %1754 = vmatprep.subr.bf16.mxu1 %v1842_v37 }
  0x5b   : > { %1739 = vmatpush3.bf16.msra.mxu0 %v1841_v36 }
  0x5c   : > { %1755 = vmatpush3.bf16.msra.mxu1 %v1842_v37  ;;  %1740 = vmatprep.subr.bf16.mxu0 %v1843_v38 }
  0x5d   : > { %1756 = vmatprep.subr.bf16.mxu1 %v1844_v39 }
  0x5f   : > { %1741 = vmatpush3.bf16.msra.mxu0 %v1843_v38 }
  0x60   : > { %1757 = vmatpush3.bf16.msra.mxu1 %v1844_v39  ;;  %1742 = vmatprep.subr.bf16.mxu0 %v1845_v40 }
  0x61   : > { %1758 = vmatprep.subr.bf16.mxu1 %v1846_v41 }
  0x63   : > { %1743 = vmatpush3.bf16.msra.mxu0 %v1845_v40 }
  0x64   : > { %1759 = vmatpush3.bf16.msra.mxu1 %v1846_v41  ;;  %1764 = vmatprep.subr.bf16.mxu0 %v1848_v44 }
  0x66   : > { %1745 = vmatmul.mubr.msk.bf16.vlgmr.msra.gmra.mrb[12].mxu0 %vm248_vm0, %v913_v26 }
  0x67   : > { %1765 = vmatpush3.bf16.msra.mxu0 %v1848_v44  ;;  %1761 = vmatmul.mubr.msk.bf16.vlgmr.msra.gmra.mrb[12].mxu1 %vm248_vm0, %v1044_v29 }
  0x68   : > { %1766 = vmatprep.subr.bf16.mxu0 %v1850_v47  ;;  %1776 = vmatprep.mubr.msk.bf16.mxu0 %vm248_vm0, %v1169_v48 }
  0x6b   : > { %1767 = vmatpush3.bf16.msra.mxu0 %v1850_v47 }
  0x6c   : > { %1768 = vmatprep.subr.bf16.mxu0 %v1851_v49 }
  0x6f   : > { %1769 = vmatpush3.bf16.msra.mxu0 %v1851_v49 }
  0x70   : > { %1770 = vmatprep.subr.bf16.mxu0 %v1852_v50 }
  0x73   : > { %1771 = vmatpush3.bf16.msra.mxu0 %v1852_v50 }
  0x74   : > { %1772 = vmatprep.subr.bf16.mxu0 %v1853_v51 }
  0x77   : > { %1773 = vmatpush3.bf16.msra.mxu0 %v1853_v51 }
  0x78   : > { %1774 = vmatprep.subr.bf16.mxu0 %v1854_v52 }
  0x7b   : > { %1775 = vmatpush3.bf16.msra.mxu0 %v1854_v52 }
  0x7e   : > { %1777 = vmatmul.mubr.msk.bf16.vlgmr.msra.gmra.mrb[16].mxu0 %vm248_vm0, %v1168_v46 }
  0xf1   : > { %v1650_v53 = vpop.f32.mrb[0].mxu0 }
  0xf2   : > { %v1666_v54 = vpop.f32.mrb[0].mxu1  ;;  %v289_v55 = vpop.f32.mrb[1].mxu0 }
  0xf3   : > { %v396_v56 = vadd.f32 %v1666_v54, %v1650_v53  ;;  %v387_v57 = vpop.f32.mrb[1].mxu1  ;;  %v1651_v58 = vpop.f32.mrb[2].mxu0  ;;  %v1295_v53 = vld [vmem:[%s170_s7 + $0x8] sm:$0x3] }
  0xf4   : > { %v388_v59 = vadd.f32 %v387_v57, %v289_v55  ;;  %v1667_v60 = vpop.f32.mrb[2].mxu1  ;;  %v292_v61 = vpop.f32.mrb[3].mxu0 }
  0xf5   : > { %v390_v62 = vpop.f32.mrb[3].mxu1 }
  0xf6   : > { %v391_v63 = vadd.f32 %v390_v62, %v292_v61 }
 0x109   : > { %v1682_v0 = vpop.f32.mrb[4].mxu0 }
 0x10a   : > { %v520_v1 = vadd.f32 %v1682_v0, %v396_v56  ;;  %v504_v2 = vpop.f32.mrb[5].mxu0  ;;  %v1698_v3 = vpop.f32.mrb[4].mxu1 }
 0x10b   : > { %v518_v4 = vadd.f32 %v504_v2, %v388_v59  ;;  %v1683_v5 = vpop.f32.mrb[6].mxu0  ;;  %v622_v6 = vpop.f32.mrb[5].mxu1 }
 0x10c   : > { %v638_v7 = vadd.f32 %v1698_v3, %v520_v1  ;;  %v507_v8 = vpop.f32.mrb[7].mxu0  ;;  %v1699_v9 = vpop.f32.mrb[6].mxu1 }
 0x10d   : > { %v519_v10 = vadd.f32 %v507_v8, %v391_v63  ;;  %v636_v11 = vadd.f32 %v622_v6, %v518_v4  ;;  %v625_v12 = vpop.f32.mrb[7].mxu1 }
 0x10f   : > { %v637_v13 = vadd.f32 %v625_v12, %v519_v10 }
 0x121   : > { %v1714_v14 = vpop.f32.mrb[8].mxu0 }
 0x122   : > { %v756_v15 = vadd.f32 %v1714_v14, %v638_v7  ;;  %v740_v16 = vpop.f32.mrb[9].mxu0  ;;  %v1730_v17 = vpop.f32.mrb[8].mxu1 }
 0x123   : > { %v754_v18 = vadd.f32 %v740_v16, %v636_v11  ;;  %v1715_v19 = vpop.f32.mrb[10].mxu0  ;;  %v859_v20 = vpop.f32.mrb[9].mxu1 }
 0x124   : > { %v875_v21 = vadd.f32 %v1730_v17, %v756_v15  ;;  %v743_v22 = vpop.f32.mrb[11].mxu0  ;;  %v1731_v23 = vpop.f32.mrb[10].mxu1 }
 0x125   : > { %v755_v24 = vadd.f32 %v743_v22, %v637_v13  ;;  %v873_v25 = vadd.f32 %v859_v20, %v754_v18  ;;  %v862_v26 = vpop.f32.mrb[11].mxu1 }
 0x127   : > { %v874_v27 = vadd.f32 %v862_v26, %v755_v24 }
 0x139   : > { %v1746_v28 = vpop.f32.mrb[12].mxu0 }
 0x13a   : > { %v1007_v29 = vadd.f32 %v1746_v28, %v875_v21  ;;  %v991_v30 = vpop.f32.mrb[13].mxu0  ;;  %v1762_v31 = vpop.f32.mrb[12].mxu1 }
 0x13b   : > { %v1005_v32 = vadd.f32 %v991_v30, %v873_v25  ;;  %v1747_v33 = vpop.f32.mrb[14].mxu0  ;;  %v1122_v34 = vpop.f32.mrb[13].mxu1 }
 0x13c   : > { %v1138_v35 = vadd.f32 %v1762_v31, %v1007_v29  ;;  %v994_v36 = vpop.f32.mrb[15].mxu0  ;;  %v1763_v37 = vpop.f32.mrb[14].mxu1 }
 0x13d   : > { %v1006_v38 = vadd.f32 %v994_v36, %v874_v27  ;;  %v1136_v39 = vadd.f32 %v1122_v34, %v1005_v32  ;;  %v1125_v40 = vpop.f32.mrb[15].mxu1 }
 0x13f   : > { %v1137_v41 = vadd.f32 %v1125_v40, %v1006_v38 }
 0x151   : > { %v1778_v42 = vpop.f32.mrb[16].mxu0 }
 0x152   : > { %v1262_v44 = vadd.f32 %v1778_v42, %v1138_v35  ;;  %v1246_v45 = vpop.f32.mrb[17].mxu0 }
 0x153   : > { %v1260_v46 = vadd.f32 %v1246_v45, %v1136_v39  ;;  %v1779_v47 = vpop.f32.mrb[18].mxu0 }
 0x154   : > { %v1272_v48 = vadd.f32 %v1554_v43, %v1262_v44  ;;  %v1249_v49 = vpop.f32.mrb[19].mxu0 }
 0x155   : > { %v1270_v50 = vadd.f32 %v1554_v43, %v1260_v46  ;;  %v1261_v51 = vadd.f32 %v1249_v49, %v1137_v41 }
 0x156   : > { %v1275_v52 = vmax.f32 %v1272_v48, 0.0 }
 0x157   : > { %v1273_v54 = vmax.f32 %v1270_v50, 0.0  ;;  %v1271_v55 = vadd.f32 %v1554_v43, %v1261_v51 }
 0x158   : > { %v1563_v56 = vpack.c.bf16 %v1275_v52, %v1275_v52 }
 0x159   : > { %v1561_v57 = vpack.c.bf16 %v1273_v54, %v1273_v54  ;;  %v1274_v58 = vmax.f32 %v1271_v55, 0.0 }
 0x15a   : > { %v1296_v59 = vsel %vm1294_vm6, %v1563_v56, %v1295_v53 }
 0x15b   : > { %1297 = vst [vmem:[%s170_s7 + $0x8] sm:$0x3] %v1296_v59  ;;  %1290 = vst.msk [vmem:[%s170_s7] sm:$0xf] %vm1289_vm7, %v1561_v57  ;;  %v1562_v60 = vpack.c.bf16 %v1274_v58, %v1274_v58 }
 0x15d   : > { %1291 = vst.msk [vmem:[%s170_s7 + $0x4] sm:$0xf] %vm1289_vm7, %v1562_v60 }
 0x15e PF: > { %s13_s12 = sadd.s32 1, %s1863_s12  }
 0x15f   : > { %p10_p4 = scmp.ge.s32.totalorder %s13_s12, 10  }
 0x161   :  { %12 = sbr.rel (!%p10_p4) target bundleno = 1 (0x1), region = 73 }

// kernel: encoder_forward.6
= control target key start
LH: loop header
LB: loop body
LE: loop exit
PB: predicated region body
PF: predicated region fallthrough
CT: control target
= control target key end

     0   :  { %s2124_s12 = smov 0   ;;  %s2642_s0 = inlined_call_operand.vmem [shape: bf16[4,4,9,192], index: 0, kind: input, shape index: {}]   ;;  %s2643_s1 = inlined_call_operand.vmem [shape: bf16[9,192,128], index: 1, kind: input, shape index: {}]   ;;  %s2644_s2 = inlined_call_operand.vmem [shape: f32[1,128], index: 2, kind: input, shape index: {}]   ;;  %s2645_s3 = inlined_call_operand.vmem [shape: bf16[4,5,128], index: 3, kind: output, shape index: {}]  }
   0x1 LB: > { %s1624_s13 = sadd.s32 4294967295, %s2101_s12   ;;  %p1628_p0 = scmp.ge.s32.totalorder %s2101_s12, 1  ;;  %s2101_s12 = sphi %s2124_s12, %s13_s12  }
   0x2   : > { %p137_p1 = scmp.lt.s32.totalorder %s2101_s12, 5 }
   0x4   : > { %p138_p2 = pnand %p1628_p0, %p137_p1 }
   0x5   : > { %v1972_v0 = vld [vmem:[%s2643_s1 + $0x60] sm:$0xff] (!%p138_p2)   ;;  %v2103_v1 = vmov (!%p138_p2), 0   ;;  %v1974_v3 = vld [vmem:[%s2643_s1 + $0x68] sm:$0xff] (!%p138_p2)   ;;  %v1976_v5 = vld [vmem:[%s2643_s1 + $0x70] sm:$0xff] (!%p138_p2)   ;;  %p160_p3 = scmp.lt.s32.totalorder (!%p138_p2), %s1624_s13, 3  ;;  %vm300_vm0 = vcmask (!%p138_p2), 523264  }
   0x6   : > { %141 = sbr.rel (%p138_p2) target bundleno = 468 (0x1d4), region = 32  ;;  %304 = vmatprep.subr.bf16.mxu0 (!%p138_p2), %v2103_v1  ;;  %425 = vmatprep.subr.bf16.mxu1 (!%p138_p2), %v2103_v1  ;;  %v1973_v2 = vld [vmem:[%s2643_s1] sm:$0xff] (!%p138_p2)   ;;  %v1975_v4 = vld [vmem:[%s2643_s1 + $0x8] sm:$0xff] (!%p138_p2)   ;;  %v1977_v6 = vld [vmem:[%s2643_s1 + $0x10] sm:$0xff] (!%p138_p2)   ;;  %vm1565_vm1 = vcmask (!%p138_p2), 1042432  }
   0x7   : > { %305 = vmatpush1.bf16.msra.mxu0 (!%p138_p2), %v1972_v0  ;;  %426 = vmatpush1.bf16.msra.mxu1 (!%p138_p2), %v1973_v2  ;;  %v1978_v7 = vld [vmem:[%s2643_s1 + $0x78] sm:$0xff] (!%p138_p2)   ;;  %v1980_v9 = vld [vmem:[%s2643_s1 + $0x80] sm:$0xff] (!%p138_p2)   ;;  %v1982_v11 = vld [vmem:[%s2643_s1 + $0x88] sm:$0xff] (!%p138_p2)   ;;  %vm1566_vm2 = vsmask.f32 (!%p138_p2), 2304 }
   0x8   : > { %306 = vmatprep.subr.bf16.mxu0 (!%p138_p2), %v2103_v1  ;;  %427 = vmatprep.subr.bf16.mxu1 (!%p138_p2), %v2103_v1  ;;  %v1979_v8 = vld [vmem:[%s2643_s1 + $0x18] sm:$0xff] (!%p138_p2)   ;;  %v1981_v10 = vld [vmem:[%s2643_s1 + $0x20] sm:$0xff] (!%p138_p2)   ;;  %v1983_v12 = vld [vmem:[%s2643_s1 + $0x28] sm:$0xff] (!%p138_p2)  }
   0x9   : > { %v1984_v13 = vld [vmem:[%s2643_s1 + $0x90] sm:$0xff] (!%p138_p2)   ;;  %v1986_v19 = vld [vmem:[%s2643_s1 + $0x98] sm:$0xff] (!%p138_p2)   ;;  %v1988_v21 = vld [vmem:[%s2643_s1 + $0xa0] sm:$0xff] (!%p138_p2)  }
   0xa   : > { %v1985_v14 = vld [vmem:[%s2643_s1 + $0x30] sm:$0xff] (!%p138_p2)   ;;  %v1987_v20 = vld [vmem:[%s2643_s1 + $0x38] sm:$0xff] (!%p138_p2)   ;;  %v1989_v22 = vld [vmem:[%s2643_s1 + $0x40] sm:$0xff] (!%p138_p2)  }
   0xb   : > { %307 = vmatpush1.bf16.msra.mxu0 (!%p138_p2), %v1974_v3  ;;  %428 = vmatpush1.bf16.msra.mxu1 (!%p138_p2), %v1975_v4  ;;  %v1990_v23 = vld [vmem:[%s2643_s1 + $0xa8] sm:$0xff] (!%p138_p2)   ;;  %v1992_v25 = vld [vmem:[%s2643_s1 + $0xb0] sm:$0xff] (!%p138_p2)   ;;  %v1994_v28 = vld [vmem:[%s2643_s1 + $0xb8] sm:$0xff] (!%p138_p2)  }
   0xc   : > { %308 = vmatprep.subr.bf16.mxu0 (!%p138_p2), %v2103_v1  ;;  %429 = vmatprep.subr.bf16.mxu1 (!%p138_p2), %v2103_v1  ;;  %v1991_v24 = vld [vmem:[%s2643_s1 + $0x48] sm:$0xff] (!%p138_p2)   ;;  %v1993_v26 = vld [vmem:[%s2643_s1 + $0x50] sm:$0xff] (!%p138_p2)   ;;  %v1995_v29 = vld [vmem:[%s2643_s1 + $0x58] sm:$0xff] (!%p138_p2)  }
   0xd   : > { %s2647_s13 = smov (!%p160_p3, %s1624_s13), 3  ;;  %v2000_v34 = vld [vmem:[%s2643_s1 + $0xc0] sm:$0xff]   ;;  %v2002_v38 = vld [vmem:[%s2643_s1 + $0xc8] sm:$0xff]   ;;  %v2004_v41 = vld [vmem:[%s2643_s1 + $0xd0] sm:$0xff]  }
   0xe   : > { %s1962_s9 = sshll.u32 %s2647_s13, 6  ;;  %v2001_v35 = vld [vmem:[%s2643_s1 + $0x120] sm:$0xff]   ;;  %v2003_v40 = vld [vmem:[%s2643_s1 + $0x128] sm:$0xff]   ;;  %v2005_v42 = vld [vmem:[%s2643_s1 + $0x130] sm:$0xff]  }
   0xf   : > { %309 = vmatpush1.bf16.msra.mxu0 %v1976_v5  ;;  %430 = vmatpush1.bf16.msra.mxu1 %v1977_v6  ;;  %s2190_s16 = scalar_lea.vmem %s2642_s0, %s1962_s9  ;;  %v2006_v43 = vld [vmem:[%s2643_s1 + $0xd8] sm:$0xff]   ;;  %v2008_v45 = vld [vmem:[%s2643_s1 + $0xe0] sm:$0xff]   ;;  %v2010_v47 = vld [vmem:[%s2643_s1 + $0xe8] sm:$0xff]  }
  0x10   : > { %310 = vmatprep.subr.bf16.mxu0 %v2103_v1  ;;  %431 = vmatprep.subr.bf16.mxu1 %v2103_v1  ;;  %v1632_v15 = vld [vmem:[%s2190_s16 + $0x10] sm:$0x77]  ;;  %v170_v16 = vld [vmem:[%s2190_s16] sm:$0x77]  ;;  %v2007_v44 = vld [vmem:[%s2643_s1 + $0x138] sm:$0xff]  }
  0x11   : > { %v1658_v17 = vcombine.high %v1632_v15, %v1632_v15  ;;  %v1673_v18 = vcombine.high %v170_v16, %v170_v16  ;;  %v1657_v32 = vcombine.low %v1632_v15, %v1632_v15  ;;  %v2244_v33 = vcombine.low %v170_v16, %v170_v16  ;;  %v2255_v37 = vld [vmem:[%s2190_s16 + $0x20] sm:$0x77]  ;;  %v2011_v48 = vld [vmem:[%s2643_s1 + $0x148] sm:$0xff]   ;;  %v2012_v49 = vld [vmem:[%s2643_s1 + $0xf0] sm:$0xff]  }
  0x12   : > { %v2263_v39 = vcombine.high %v2255_v37, %v2255_v37  ;;  %v2009_v46 = vld [vmem:[%s2643_s1 + $0x140] sm:$0xff]   ;;  %v2013_v50 = vld [vmem:[%s2643_s1 + $0x150] sm:$0xff]   ;;  %v2014_v51 = vld [vmem:[%s2643_s1 + $0xf8] sm:$0xff]  }
  0x13   : > { %311 = vmatpush1.bf16.msra.mxu0 %v1978_v7  ;;  %432 = vmatpush1.bf16.msra.mxu1 %v1979_v8  ;;  %v499_v27 = vshll.u32 %v1673_v18, 16  ;;  %v497_v30 = vshrl.u32 %v1673_v18, 16  ;;  %v2015_v52 = vld [vmem:[%s2643_s1 + $0x158] sm:$0xff]   ;;  %v2016_v53 = vld [vmem:[%s2643_s1 + $0x100] sm:$0xff]   ;;  %v2018_v55 = vld [vmem:[%s2643_s1 + $0x108] sm:$0xff]   ;;  %v493_v57 = vshll.u32 %v2244_v33, 16  ;;  %v2365_v7 = vcombine.low %v2255_v37, %v2255_v37 }
  0x14   : > { %312 = vmatprep.subr.bf16.mxu0 %v2103_v1  ;;  %433 = vmatprep.subr.bf16.mxu1 %v2103_v1  ;;  %v2017_v54 = vld [vmem:[%s2643_s1 + $0x160] sm:$0xff]   ;;  %v2019_v56 = vld [vmem:[%s2643_s1 + $0x168] sm:$0xff]   ;;  %v2020_v58 = vld [vmem:[%s2643_s1 + $0x110] sm:$0xff]   ;;  %v952_v60 = vshll.u32 %v2263_v39, 16  ;;  %v491_v61 = vshrl.u32 %v2244_v33, 16  ;;  %v950_v2 = vshrl.u32 %v2263_v39, 16 }
  0x15   : > { %1671 = vmatprep.mubr.msk.bf16.mxu0 %vm300_vm0, %v1658_v17  ;;  %1686 = vmatprep.mubr.msk.bf16.mxu1 %vm300_vm0, %v1673_v18  ;;  %v501_v31 = vrot.slane %v499_v27, 1  ;;  %v2021_v59 = vld [vmem:[%s2643_s1 + $0x170] sm:$0xff]   ;;  %v495_v62 = vrot.slane %v493_v57, 1  ;;  %v2022_v63 = vld [vmem:[%s2643_s1 + $0x118] sm:$0xff]   ;;  %v2025_v6 = vld [vmem:[%s2643_s1 + $0x180] sm:$0xff]  }
  0x16   : > { %v2023_v0 = vld [vmem:[%s2643_s1 + $0x178] sm:$0xff]   ;;  %v954_v3 = vrot.slane %v952_v60, 1  ;;  %v2358_v5 = vld [vmem:[%s2190_s16 + $0x30] sm:$0x77]  ;;  %v2027_v8 = vld [vmem:[%s2643_s1 + $0x1e0] sm:$0xff]  }
  0x17   : > { %313 = vmatpush1.bf16.msra.mxu0 %v1980_v9  ;;  %434 = vmatpush1.bf16.msra.mxu1 %v1981_v10  ;;  %v502_v36 = vor.u32 %v501_v31, %v497_v30  ;;  %v496_v4 = vor.u32 %v495_v62, %v491_v61  ;;  %v1790_v9 = vcombine.high %v2358_v5, %v2358_v5  ;;  %v2032_v15 = vld [vmem:[%s2643_s1 + $0x198] sm:$0xff]   ;;  %v2034_v17 = vld [vmem:[%s2643_s1 + $0x1a0] sm:$0xff]   ;;  %v2045_v30 = vld [vmem:[%s2643_s1 + $0x228] sm:$0xff]  }
  0x18   : > { %314 = vmatprep.subr.bf16.mxu0 %v2103_v1  ;;  %435 = vmatprep.subr.bf16.mxu1 %v2103_v1  ;;  %v955_v10 = vor.u32 %v954_v3, %v950_v2  ;;  %v2033_v16 = vld [vmem:[%s2643_s1 + $0x1f8] sm:$0xff]   ;;  %v2035_v18 = vld [vmem:[%s2643_s1 + $0x200] sm:$0xff]   ;;  %v2057_v57 = vld [vmem:[%s2643_s1 + $0x2b0] sm:$0xff]  }
  0x19   : > { %v2442_v27 = vld [vmem:[%s2190_s16] sm:$0xee]  ;;  %v2062_v62 = vld [vmem:[%s2643_s1 + $0x268] sm:$0xff]   ;;  %v2065_v2 = vld [vmem:[%s2643_s1 + $0x2d0] sm:$0xff]  }
  0x1a   : > { %v1866_v31 = vcombine.high %v2442_v27, %v2442_v27  ;;  %v2060_v60 = vld [vmem:[%s2643_s1 + $0x260] sm:$0xff]   ;;  %v2066_v3 = vld [vmem:[%s2643_s1 + $0x278] sm:$0xff]   ;;  %vm1567_vm3 = vmand %vm1565_vm1, %vm1566_vm2 }
  0x1b   : > { %315 = vmatpush1.bf16.msra.mxu0 %v1982_v11  ;;  %436 = vmatpush1.bf16.msra.mxu1 %v1983_v12  ;;  %v2028_v11 = vld [vmem:[%s2643_s1 + $0x188] sm:$0xff]   ;;  %v2061_v61 = vld [vmem:[%s2643_s1 + $0x2c0] sm:$0xff]  }
  0x1c   : > { %316 = vmatprep.subr.bf16.mxu0 %v2103_v1  ;;  %437 = vmatprep.subr.bf16.mxu1 %v2103_v1  ;;  %v2029_v12 = vld [vmem:[%s2643_s1 + $0x1e8] sm:$0xff]   ;;  %v1116_v37 = vshll.u32 %v1866_v31, 16 }
  0x1f   : > { %317 = vmatpush1.bf16.msra.mxu0 %v1984_v13  ;;  %438 = vmatpush1.bf16.msra.mxu1 %v1985_v14  ;;  %v2030_v13 = vld [vmem:[%s2643_s1 + $0x190] sm:$0xff]  }
  0x20   : > { %318 = vmatprep.subr.bf16.mxu0 %v2103_v1  ;;  %439 = vmatprep.subr.bf16.mxu1 %v2103_v1  ;;  %v2031_v14 = vld [vmem:[%s2643_s1 + $0x1f0] sm:$0xff]  }
  0x23   : > { %319 = vmatpush1.bf16.msra.mxu0 %v1986_v19  ;;  %440 = vmatpush1.bf16.msra.mxu1 %v1987_v20  ;;  %v2036_v19 = vld [vmem:[%s2643_s1 + $0x1a8] sm:$0xff]  }
  0x24   : > { %320 = vmatprep.subr.bf16.mxu0 %v2103_v1  ;;  %441 = vmatprep.subr.bf16.mxu1 %v2103_v1  ;;  %v2037_v20 = vld [vmem:[%s2643_s1 + $0x208] sm:$0xff]  }
  0x27   : > { %321 = vmatpush1.bf16.msra.mxu0 %v1988_v21  ;;  %442 = vmatpush1.bf16.msra.mxu1 %v1989_v22  ;;  %v2038_v21 = vld [vmem:[%s2643_s1 + $0x1b0] sm:$0xff]  }
  0x28   : > { %322 = vmatprep.subr.bf16.mxu0 %v2103_v1  ;;  %443 = vmatprep.subr.bf16.mxu1 %v2103_v1  ;;  %v2039_v22 = vld [vmem:[%s2643_s1 + $0x210] sm:$0xff]  }
  0x2b   : > { %323 = vmatpush1.bf16.msra.mxu0 %v1990_v23  ;;  %444 = vmatpush1.bf16.msra.mxu1 %v1991_v24  ;;  %v2040_v23 = vld [vmem:[%s2643_s1 + $0x1b8] sm:$0xff]  }
  0x2c   : > { %324 = vmatprep.subr.bf16.mxu0 %v2103_v1  ;;  %445 = vmatprep.subr.bf16.mxu1 %v2103_v1  ;;  %v2041_v24 = vld [vmem:[%s2643_s1 + $0x218] sm:$0xff]  }
  0x2f   : > { %325 = vmatpush1.bf16.msra.mxu0 %v1992_v25  ;;  %446 = vmatpush1.bf16.msra.mxu1 %v1993_v26  ;;  %v2042_v25 = vld [vmem:[%s2643_s1 + $0x1c0] sm:$0xff]  }
  0x30   : > { %326 = vmatprep.subr.bf16.mxu0 %v2103_v1  ;;  %447 = vmatprep.subr.bf16.mxu1 %v2103_v1  ;;  %v2043_v26 = vld [vmem:[%s2643_s1 + $0x220] sm:$0xff]  }
  0x33   : > { %327 = vmatpush1.bf16.msra.mxu0 %v1994_v28  ;;  %448 = vmatpush1.bf16.msra.mxu1 %v1995_v29  ;;  %v2044_v28 = vld [vmem:[%s2643_s1 + $0x1c8] sm:$0xff]   ;;  %v2448_v29 = vld [vmem:[%s2190_s16 + $0x10] sm:$0xee] }
  0x34   : > { %579 = vmatprep.subr.bf16.mxu0 %v2103_v1  ;;  %728 = vmatprep.subr.bf16.mxu1 %v2103_v1 }
  0x36   : > { %337 = vmatmul.mubr.bf16.vlgmr.msra.gmra.mrb[0].mxu0 %v1657_v32  ;;  %458 = vmatmul.mubr.bf16.vlgmr.msra.gmra.mrb[0].mxu1 %v2244_v33  ;;  %v1906_v32 = vcombine.high %v2448_v29, %v2448_v29  ;;  %v2046_v33 = vld [vmem:[%s2643_s1 + $0x1d0] sm:$0xff]  }
  0x37   : > { %580 = vmatpush1.bf16.msra.mxu0 %v2000_v34  ;;  %729 = vmatpush1.bf16.msra.mxu1 %v2001_v35  ;;  %v946_v34 = vshll.u32 %v2365_v7, 16  ;;  %v2047_v35 = vld [vmem:[%s2643_s1 + $0x230] sm:$0xff]  }
  0x38   : > { %581 = vmatprep.subr.bf16.mxu0 %v2103_v1  ;;  %730 = vmatprep.subr.bf16.mxu1 %v2103_v1 }
  0x39   : > { %1723 = vmatprep.mubr.msk.bf16.mxu0 %vm300_vm0, %v502_v36  ;;  %1763 = vmatprep.mubr.msk.bf16.mxu1 %vm300_vm0, %v2263_v39  ;;  %v1113_v36 = vshrl.u32 %v1866_v31, 16  ;;  %v1280_v39 = vshll.u32 %v1906_v32, 16  ;;  %v2084_v31 = vld [vmem:[%s2643_s1 + $0x320] sm:$0xff]  }
  0x3b   : > { %582 = vmatpush1.bf16.msra.mxu0 %v2002_v38  ;;  %731 = vmatpush1.bf16.msra.mxu1 %v2003_v40  ;;  %v1277_v38 = vshrl.u32 %v1906_v32, 16  ;;  %v2048_v40 = vld [vmem:[%s2643_s1 + $0x1d8] sm:$0xff]   ;;  %v2085_v32 = vld [vmem:[%s2643_s1 + $0x328] sm:$0xff]  }
  0x3c   : > { %583 = vmatprep.subr.bf16.mxu0 %v2103_v1  ;;  %732 = vmatprep.subr.bf16.mxu1 %v2103_v1 }
  0x3f   : > { %584 = vmatpush1.bf16.msra.mxu0 %v2004_v41  ;;  %733 = vmatpush1.bf16.msra.mxu1 %v2005_v42  ;;  %v944_v41 = vshrl.u32 %v2365_v7, 16  ;;  %v948_v42 = vrot.slane %v946_v34, 1  ;;  %v2087_v34 = vld [vmem:[%s2643_s1 + $0x338] sm:$0xff]  }
  0x40   : > { %585 = vmatprep.subr.bf16.mxu0 %v2103_v1  ;;  %734 = vmatprep.subr.bf16.mxu1 %v2103_v1 }
  0x43   : > { %586 = vmatpush1.bf16.msra.mxu0 %v2006_v43  ;;  %735 = vmatpush1.bf16.msra.mxu1 %v2007_v44  ;;  %v2050_v43 = vld [vmem:[%s2643_s1 + $0x238] sm:$0xff]   ;;  %v1115_v44 = vrot.slane %v1113_v36, 1  ;;  %v2089_v36 = vld [vmem:[%s2643_s1 + $0x348] sm:$0xff]  }
  0x44   : > { %587 = vmatprep.subr.bf16.mxu0 %v2103_v1  ;;  %736 = vmatprep.subr.bf16.mxu1 %v2103_v1 }
  0x47   : > { %588 = vmatpush1.bf16.msra.mxu0 %v2008_v45  ;;  %737 = vmatpush1.bf16.msra.mxu1 %v2009_v46  ;;  %v1118_v45 = vrot.slane %v1116_v37, 2  ;;  %v1789_v46 = vcombine.low %v2358_v5, %v2358_v5  ;;  %v2068_v5 = vld [vmem:[%s2643_s1 + $0x280] sm:$0xff]   ;;  %v2090_v37 = vld [vmem:[%s2643_s1 + $0x350] sm:$0xff]  }
  0x48   : > { %589 = vmatprep.subr.bf16.mxu0 %v2103_v1  ;;  %738 = vmatprep.subr.bf16.mxu1 %v2103_v1 }
  0x4b   : > { %590 = vmatpush1.bf16.msra.mxu0 %v2010_v47  ;;  %739 = vmatpush1.bf16.msra.mxu1 %v2011_v48  ;;  %v1279_v47 = vrot.slane %v1277_v38, 1  ;;  %v1282_v48 = vrot.slane %v1280_v39, 2  ;;  %v2094_v38 = vld [vmem:[%s2190_s16] ss:$8 sps:$4 sm:$0x1c]   ;;  %v2091_v39 = vld [vmem:[%s2643_s1 + $0x358] sm:$0xff]  }
  0x4c   : > { %591 = vmatprep.subr.bf16.mxu0 %v2103_v1  ;;  %740 = vmatprep.subr.bf16.mxu1 %v2103_v1 }
  0x4f   : > { %592 = vmatpush1.bf16.msra.mxu0 %v2012_v49  ;;  %741 = vmatpush1.bf16.msra.mxu1 %v2013_v50  ;;  %v2052_v49 = vld [vmem:[%s2643_s1 + $0x240] sm:$0xff]   ;;  %v949_v50 = vor.u32 %v948_v42, %v944_v41 }
  0x50   : > { %593 = vmatprep.subr.bf16.mxu0 %v2103_v1  ;;  %742 = vmatprep.subr.bf16.mxu1 %v2103_v1 }
  0x53   : > { %594 = vmatpush1.bf16.msra.mxu0 %v2014_v51  ;;  %743 = vmatpush1.bf16.msra.mxu1 %v2015_v52  ;;  %v2053_v51 = vld [vmem:[%s2643_s1 + $0x2a0] sm:$0xff]   ;;  %v1119_v52 = vor.u32 %v1118_v45, %v1115_v44 }
  0x54   : > { %595 = vmatprep.subr.bf16.mxu0 %v2103_v1  ;;  %744 = vmatprep.subr.bf16.mxu1 %v2103_v1 }
  0x57   : > { %596 = vmatpush1.bf16.msra.mxu0 %v2016_v53  ;;  %745 = vmatpush1.bf16.msra.mxu1 %v2017_v54  ;;  %v1283_v53 = vor.u32 %v1282_v48, %v1279_v47  ;;  %v2054_v54 = vld [vmem:[%s2643_s1 + $0x248] sm:$0xff]  }
  0x58   : > { %597 = vmatprep.subr.bf16.mxu0 %v2103_v1  ;;  %746 = vmatprep.subr.bf16.mxu1 %v2103_v1 }
  0x5b   : > { %598 = vmatpush1.bf16.msra.mxu0 %v2018_v55  ;;  %747 = vmatpush1.bf16.msra.mxu1 %v2019_v56  ;;  %v2055_v55 = vld [vmem:[%s2643_s1 + $0x2a8] sm:$0xff]   ;;  %v2056_v56 = vld [vmem:[%s2643_s1 + $0x250] sm:$0xff]  }
  0x5c   : > { %599 = vmatprep.subr.bf16.mxu0 %v2103_v1  ;;  %748 = vmatprep.subr.bf16.mxu1 %v2103_v1 }
  0x5f   : > { %600 = vmatpush1.bf16.msra.mxu0 %v2020_v58  ;;  %749 = vmatpush1.bf16.msra.mxu1 %v2021_v59  ;;  %v2058_v58 = vld [vmem:[%s2643_s1 + $0x258] sm:$0xff]  }
  0x60   : > { %601 = vmatprep.subr.bf16.mxu0 %v2103_v1  ;;  %750 = vmatprep.subr.bf16.mxu1 %v2103_v1  ;;  %v2059_v59 = vld [vmem:[%s2643_s1 + $0x2b8] sm:$0xff]  }
  0x63   : > { %602 = vmatpush1.bf16.msra.mxu0 %v2022_v63  ;;  %751 = vmatpush1.bf16.msra.mxu1 %v2023_v0  ;;  %v2063_v63 = vld [vmem:[%s2643_s1 + $0x2c8] sm:$0xff]   ;;  %v2064_v0 = vld [vmem:[%s2643_s1 + $0x270] sm:$0xff]  }
  0x64   : > { %877 = vmatprep.subr.bf16.mxu0 %v2103_v1  ;;  %1032 = vmatprep.subr.bf16.mxu1 %v2103_v1 }
  0x66   : > { %612 = vmatmul.mubr.bf16.vlgmr.msra.gmra.mrb[4].mxu0 %v496_v4  ;;  %761 = vmatmul.mubr.bf16.vlgmr.msra.gmra.mrb[4].mxu1 %v2365_v7  ;;  %v2067_v4 = vld [vmem:[%s2643_s1 + $0x2d8] sm:$0xff]   ;;  %v1865_v7 = vcombine.low %v2442_v27, %v2442_v27 }
  0x67   : > { %878 = vmatpush1.bf16.msra.mxu0 %v2025_v6  ;;  %1033 = vmatpush1.bf16.msra.mxu1 %v2027_v8  ;;  %v2069_v6 = vld [vmem:[%s2643_s1 + $0x2e0] sm:$0xff]   ;;  %v2070_v8 = vld [vmem:[%s2643_s1 + $0x288] sm:$0xff]  }
  0x68   : > { %879 = vmatprep.subr.bf16.mxu0 %v2103_v1  ;;  %1034 = vmatprep.subr.bf16.mxu1 %v2103_v1 }
  0x69   : > { %1803 = vmatprep.mubr.msk.bf16.mxu0 %vm300_vm0, %v1790_v9  ;;  %1840 = vmatprep.mubr.msk.bf16.mxu1 %vm300_vm0, %v955_v10  ;;  %v1905_v9 = vcombine.low %v2448_v29, %v2448_v29  ;;  %v2071_v10 = vld [vmem:[%s2643_s1 + $0x2e8] sm:$0xff]   ;;  %v2082_v29 = vld [vmem:[%s2643_s1 + $0x310] sm:$0xff]  }
  0x6b   : > { %880 = vmatpush1.bf16.msra.mxu0 %v2028_v11  ;;  %1035 = vmatpush1.bf16.msra.mxu1 %v2029_v12  ;;  %v1105_v11 = vshrl.u32 %v1865_v7, 16  ;;  %v1108_v12 = vshll.u32 %v1865_v7, 16 }
  0x6c   : > { %881 = vmatprep.subr.bf16.mxu0 %v2103_v1  ;;  %1036 = vmatprep.subr.bf16.mxu1 %v2103_v1 }
  0x6f   : > { %882 = vmatpush1.bf16.msra.mxu0 %v2030_v13  ;;  %1037 = vmatpush1.bf16.msra.mxu1 %v2031_v14  ;;  %v2072_v13 = vld [vmem:[%s2643_s1 + $0x290] sm:$0xff]   ;;  %v1269_v14 = vshrl.u32 %v1905_v9, 16 }
  0x70   : > { %883 = vmatprep.subr.bf16.mxu0 %v2103_v1  ;;  %1038 = vmatprep.subr.bf16.mxu1 %v2103_v1 }
  0x73   : > { %884 = vmatpush1.bf16.msra.mxu0 %v2032_v15  ;;  %1039 = vmatpush1.bf16.msra.mxu1 %v2033_v16  ;;  %v1272_v15 = vshll.u32 %v1905_v9, 16  ;;  %v2073_v16 = vld [vmem:[%s2643_s1 + $0x2f0] sm:$0xff]  }
  0x74   : > { %885 = vmatprep.subr.bf16.mxu0 %v2103_v1  ;;  %1040 = vmatprep.subr.bf16.mxu1 %v2103_v1 }
  0x77   : > { %886 = vmatpush1.bf16.msra.mxu0 %v2034_v17  ;;  %1041 = vmatpush1.bf16.msra.mxu1 %v2035_v18  ;;  %v1107_v17 = vrot.slane %v1105_v11, 1  ;;  %v1110_v18 = vrot.slane %v1108_v12, 2 }
  0x78   : > { %887 = vmatprep.subr.bf16.mxu0 %v2103_v1  ;;  %1042 = vmatprep.subr.bf16.mxu1 %v2103_v1 }
  0x7b   : > { %888 = vmatpush1.bf16.msra.mxu0 %v2036_v19  ;;  %1043 = vmatpush1.bf16.msra.mxu1 %v2037_v20  ;;  %v2074_v19 = vld [vmem:[%s2643_s1 + $0x298] sm:$0xff]   ;;  %v1271_v20 = vrot.slane %v1269_v14, 1 }
  0x7c   : > { %889 = vmatprep.subr.bf16.mxu0 %v2103_v1  ;;  %1044 = vmatprep.subr.bf16.mxu1 %v2103_v1 }
  0x7f   : > { %890 = vmatpush1.bf16.msra.mxu0 %v2038_v21  ;;  %1045 = vmatpush1.bf16.msra.mxu1 %v2039_v22  ;;  %v1274_v21 = vrot.slane %v1272_v15, 2  ;;  %v2076_v22 = vld [vmem:[%s2643_s1 + $0x2f8] sm:$0xff]  }
  0x80   : > { %891 = vmatprep.subr.bf16.mxu0 %v2103_v1  ;;  %1046 = vmatprep.subr.bf16.mxu1 %v2103_v1 }
  0x83   : > { %892 = vmatpush1.bf16.msra.mxu0 %v2040_v23  ;;  %1047 = vmatpush1.bf16.msra.mxu1 %v2041_v24  ;;  %v2092_v23 = vld [vmem:[%s2190_s16 + $0x4] ss:$8 sps:$4 sm:$0x1c]   ;;  %v1111_v24 = vor.u32 %v1110_v18, %v1107_v17  ;;  %s1631_s16 = sshll.u32 %s2647_s13, 2  ;;  %v1959_v17 = vld [vmem:[%s2644_s2] ss:$0 sm:$0xff] }
  0x84   : > { %893 = vmatprep.subr.bf16.mxu0 %v2103_v1  ;;  %1048 = vmatprep.subr.bf16.mxu1 %v2103_v1  ;;  %v1437_v27 = vrot.slane %v2092_v23, 2  ;;  %s168_s21 = scalar_lea.vmem %s2645_s3, %s1631_s16 }
  0x87   : > { %894 = vmatpush1.bf16.msra.mxu0 %v2042_v25  ;;  %1049 = vmatpush1.bf16.msra.mxu1 %v2043_v26  ;;  %v2079_v25 = vld [vmem:[%s2643_s1 + $0x300] sm:$0xff]   ;;  %v1275_v26 = vor.u32 %v1274_v21, %v1271_v20 }
  0x88   : > { %895 = vmatprep.subr.bf16.mxu0 %v2103_v1  ;;  %1050 = vmatprep.subr.bf16.mxu1 %v2103_v1 }
  0x8b   : > { %896 = vmatpush1.bf16.msra.mxu0 %v2044_v28  ;;  %1051 = vmatpush1.bf16.msra.mxu1 %v2045_v30  ;;  %v2081_v28 = vld [vmem:[%s2643_s1 + $0x308] sm:$0xff]   ;;  %v2083_v30 = vld [vmem:[%s2643_s1 + $0x318] sm:$0xff]  }
  0x8c   : > { %897 = vmatprep.subr.bf16.mxu0 %v2103_v1  ;;  %1052 = vmatprep.subr.bf16.mxu1 %v2103_v1 }
  0x8f   : > { %898 = vmatpush1.bf16.msra.mxu0 %v2046_v33  ;;  %1053 = vmatpush1.bf16.msra.mxu1 %v2047_v35  ;;  %v2086_v33 = vld [vmem:[%s2643_s1 + $0x330] sm:$0xff]   ;;  %v2088_v35 = vld [vmem:[%s2643_s1 + $0x340] sm:$0xff]  }
  0x90   : > { %899 = vmatprep.subr.bf16.mxu0 %v2103_v1  ;;  %1054 = vmatprep.subr.bf16.mxu1 %v2103_v1 }
  0x93   : > { %900 = vmatpush1.bf16.msra.mxu0 %v2048_v40  ;;  %1055 = vmatpush1.bf16.msra.mxu1 %v2050_v43  ;;  %v1436_v40 = vrot.slane %v2094_v38, 2 }
  0x94   : > { %1196 = vmatprep.subr.bf16.mxu0 %v2103_v1  ;;  %1360 = vmatprep.subr.bf16.mxu1 %v2103_v1 }
  0x96   : > { %910 = vmatmul.mubr.bf16.vlgmr.msra.gmra.mrb[8].mxu0 %v1789_v46  ;;  %1065 = vmatmul.mubr.bf16.vlgmr.msra.gmra.mrb[8].mxu1 %v949_v50 }
  0x97   : > { %1197 = vmatpush1.bf16.msra.mxu0 %v2052_v49  ;;  %1361 = vmatpush1.bf16.msra.mxu1 %v2053_v51 }
  0x98   : > { %1198 = vmatprep.subr.bf16.mxu0 %v2103_v1  ;;  %1362 = vmatprep.subr.bf16.mxu1 %v2103_v1 }
  0x99   : > { %1879 = vmatprep.mubr.msk.bf16.mxu0 %vm300_vm0, %v1119_v52  ;;  %1919 = vmatprep.mubr.msk.bf16.mxu1 %vm300_vm0, %v1283_v53 }
  0x9b   : > { %1199 = vmatpush1.bf16.msra.mxu0 %v2054_v54  ;;  %1363 = vmatpush1.bf16.msra.mxu1 %v2055_v55 }
  0x9c   : > { %1200 = vmatprep.subr.bf16.mxu0 %v2103_v1  ;;  %1364 = vmatprep.subr.bf16.mxu1 %v2103_v1 }
  0x9f   : > { %1201 = vmatpush1.bf16.msra.mxu0 %v2056_v56  ;;  %1365 = vmatpush1.bf16.msra.mxu1 %v2057_v57 }
  0xa0   : > { %1202 = vmatprep.subr.bf16.mxu0 %v2103_v1  ;;  %1366 = vmatprep.subr.bf16.mxu1 %v2103_v1 }
  0xa3   : > { %1203 = vmatpush1.bf16.msra.mxu0 %v2058_v58  ;;  %1367 = vmatpush1.bf16.msra.mxu1 %v2059_v59 }
  0xa4   : > { %1204 = vmatprep.subr.bf16.mxu0 %v2103_v1  ;;  %1368 = vmatprep.subr.bf16.mxu1 %v2103_v1 }
  0xa7   : > { %1205 = vmatpush1.bf16.msra.mxu0 %v2060_v60  ;;  %1369 = vmatpush1.bf16.msra.mxu1 %v2061_v61 }
  0xa8   : > { %1206 = vmatprep.subr.bf16.mxu0 %v2103_v1  ;;  %1370 = vmatprep.subr.bf16.mxu1 %v2103_v1 }
  0xab   : > { %1207 = vmatpush1.bf16.msra.mxu0 %v2062_v62  ;;  %1371 = vmatpush1.bf16.msra.mxu1 %v2063_v63 }
  0xac   : > { %1208 = vmatprep.subr.bf16.mxu0 %v2103_v1  ;;  %1372 = vmatprep.subr.bf16.mxu1 %v2103_v1 }
  0xaf   : > { %1209 = vmatpush1.bf16.msra.mxu0 %v2064_v0  ;;  %1373 = vmatpush1.bf16.msra.mxu1 %v2065_v2 }
  0xb0   : > { %1210 = vmatprep.subr.bf16.mxu0 %v2103_v1  ;;  %1374 = vmatprep.subr.bf16.mxu1 %v2103_v1 }
  0xb3   : > { %1211 = vmatpush1.bf16.msra.mxu0 %v2066_v3  ;;  %1375 = vmatpush1.bf16.msra.mxu1 %v2067_v4 }
  0xb4   : > { %1212 = vmatprep.subr.bf16.mxu0 %v2103_v1  ;;  %1376 = vmatprep.subr.bf16.mxu1 %v2103_v1 }
  0xb7   : > { %1213 = vmatpush1.bf16.msra.mxu0 %v2068_v5  ;;  %1377 = vmatpush1.bf16.msra.mxu1 %v2069_v6 }
  0xb8   : > { %1214 = vmatprep.subr.bf16.mxu0 %v2103_v1  ;;  %1378 = vmatprep.subr.bf16.mxu1 %v2103_v1 }
  0xbb   : > { %1215 = vmatpush1.bf16.msra.mxu0 %v2070_v8  ;;  %1379 = vmatpush1.bf16.msra.mxu1 %v2071_v10 }
  0xbc   : > { %1216 = vmatprep.subr.bf16.mxu0 %v2103_v1  ;;  %1380 = vmatprep.subr.bf16.mxu1 %v2103_v1 }
  0xbf   : > { %1217 = vmatpush1.bf16.msra.mxu0 %v2072_v13  ;;  %1381 = vmatpush1.bf16.msra.mxu1 %v2073_v16 }
  0xc0   : > { %1218 = vmatprep.subr.bf16.mxu0 %v2103_v1  ;;  %1382 = vmatprep.subr.bf16.mxu1 %v2103_v1 }
  0xc3   : > { %1219 = vmatpush1.bf16.msra.mxu0 %v2074_v19  ;;  %1383 = vmatpush1.bf16.msra.mxu1 %v2076_v22 }
  0xc4   : > { %1514 = vmatprep.subr.bf16.mxu0 %v2103_v1 }
  0xc6   : > { %1229 = vmatmul.mubr.bf16.vlgmr.msra.gmra.mrb[12].mxu0 %v1111_v24  ;;  %1393 = vmatmul.mubr.bf16.vlgmr.msra.gmra.mrb[12].mxu1 %v1275_v26  ;;  %v1568_v24 = vld [vmem:[%s168_s21] sm:$0x7] }
  0xc7   : > { %1515 = vmatpush1.bf16.msra.mxu0 %v2079_v25  ;;  %1958 = vmatprep.mubr.msk.bf16.mxu0 %vm300_vm0, %v1437_v27 }
  0xc8   : > { %1516 = vmatprep.subr.bf16.mxu0 %v2103_v1 }
  0xcb   : > { %1517 = vmatpush1.bf16.msra.mxu0 %v2081_v28 }
  0xcc   : > { %1518 = vmatprep.subr.bf16.mxu0 %v2103_v1 }
  0xcf   : > { %1519 = vmatpush1.bf16.msra.mxu0 %v2082_v29 }
  0xd0   : > { %1520 = vmatprep.subr.bf16.mxu0 %v2103_v1 }
  0xd3   : > { %1521 = vmatpush1.bf16.msra.mxu0 %v2083_v30 }
  0xd4   : > { %1522 = vmatprep.subr.bf16.mxu0 %v2103_v1 }
  0xd7   : > { %1523 = vmatpush1.bf16.msra.mxu0 %v2084_v31 }
  0xd8   : > { %1524 = vmatprep.subr.bf16.mxu0 %v2103_v1 }
  0xdb   : > { %1525 = vmatpush1.bf16.msra.mxu0 %v2085_v32 }
  0xdc   : > { %1526 = vmatprep.subr.bf16.mxu0 %v2103_v1 }
  0xdf   : > { %1527 = vmatpush1.bf16.msra.mxu0 %v2086_v33 }
  0xe0   : > { %1528 = vmatprep.subr.bf16.mxu0 %v2103_v1 }
  0xe3   : > { %1529 = vmatpush1.bf16.msra.mxu0 %v2087_v34 }
  0xe4   : > { %1530 = vmatprep.subr.bf16.mxu0 %v2103_v1 }
  0xe7   : > { %1531 = vmatpush1.bf16.msra.mxu0 %v2088_v35 }
  0xe8   : > { %1532 = vmatprep.subr.bf16.mxu0 %v2103_v1 }
  0xeb   : > { %1533 = vmatpush1.bf16.msra.mxu0 %v2089_v36 }
  0xec   : > { %1534 = vmatprep.subr.bf16.mxu0 %v2103_v1 }
  0xef   : > { %1535 = vmatpush1.bf16.msra.mxu0 %v2090_v37 }
  0xf0   : > { %1536 = vmatprep.subr.bf16.mxu0 %v2103_v1 }
  0xf3   : > { %1537 = vmatpush1.bf16.msra.mxu0 %v2091_v39 }
  0xf6   : > { %1547 = vmatmul.mubr.bf16.vlgmr.msra.gmra.mrb[16].mxu0 %v1436_v40 }
 0x109   : > { %v338_v41 = vpop.f32.mrb[0].mxu0  ;;  %v459_v43 = vpop.f32.mrb[0].mxu1 }
 0x10a   : > { %v340_v42 = vpop.f32.mrb[1].mxu0  ;;  %v460_v44 = vadd.f32 %v459_v43, %v338_v41  ;;  %v461_v46 = vpop.f32.mrb[1].mxu1 }
 0x10b   : > { %v341_v45 = vpop.f32.mrb[2].mxu0  ;;  %v462_v48 = vpop.f32.mrb[2].mxu1 }
 0x10c   : > { %v342_v47 = vpop.f32.mrb[3].mxu0  ;;  %v463_v49 = vpop.f32.mrb[3].mxu1 }
 0x139   : > { %v613_v50 = vpop.f32.mrb[4].mxu0  ;;  %v762_v53 = vpop.f32.mrb[4].mxu1 }
 0x13a   : > { %v619_v51 = vadd.f32 %v613_v50, %v460_v44  ;;  %v615_v52 = vpop.f32.mrb[5].mxu0  ;;  %v764_v55 = vpop.f32.mrb[5].mxu1 }
 0x13b   : > { %v616_v54 = vpop.f32.mrb[6].mxu0  ;;  %v765_v57 = vpop.f32.mrb[6].mxu1 }
 0x13c   : > { %v768_v56 = vadd.f32 %v762_v53, %v619_v51  ;;  %v617_v1 = vpop.f32.mrb[7].mxu0  ;;  %v766_v58 = vpop.f32.mrb[7].mxu1 }
 0x169   : > { %v911_v59 = vpop.f32.mrb[8].mxu0  ;;  %v1066_v62 = vpop.f32.mrb[8].mxu1 }
 0x16a   : > { %v917_v60 = vadd.f32 %v911_v59, %v768_v56  ;;  %v913_v61 = vpop.f32.mrb[9].mxu0  ;;  %v1068_v0 = vpop.f32.mrb[9].mxu1 }
 0x16b   : > { %v914_v63 = vpop.f32.mrb[10].mxu0  ;;  %v1069_v4 = vpop.f32.mrb[10].mxu1 }
 0x16c   : > { %v1072_v2 = vadd.f32 %v1066_v62, %v917_v60  ;;  %v915_v3 = vpop.f32.mrb[11].mxu0  ;;  %v1070_v5 = vpop.f32.mrb[11].mxu1 }
 0x199   : > { %v1230_v6 = vpop.f32.mrb[12].mxu0  ;;  %v1394_v9 = vpop.f32.mrb[12].mxu1 }
 0x19a   : > { %v1236_v7 = vadd.f32 %v1230_v6, %v1072_v2  ;;  %v1232_v8 = vpop.f32.mrb[13].mxu0  ;;  %v1396_v11 = vpop.f32.mrb[13].mxu1 }
 0x19b   : > { %v1233_v10 = vpop.f32.mrb[14].mxu0  ;;  %v1397_v14 = vpop.f32.mrb[14].mxu1 }
 0x19c   : > { %v1400_v12 = vadd.f32 %v1394_v9, %v1236_v7  ;;  %v1234_v13 = vpop.f32.mrb[15].mxu0  ;;  %v1398_v15 = vpop.f32.mrb[15].mxu1 }
 0x1c9   : > { %v1548_v16 = vpop.f32.mrb[16].mxu0 }
 0x1ca   : > { %v1554_v18 = vadd.f32 %v1548_v16, %v1400_v12  ;;  %v1550_v19 = vpop.f32.mrb[17].mxu0 }
 0x1cb   : > { %v1551_v20 = vpop.f32.mrb[18].mxu0 }
 0x1cc   : > { %v1562_v21 = vadd.f32 %v1959_v17, %v1554_v18  ;;  %v1552_v22 = vpop.f32.mrb[19].mxu0 }
 0x1ce   : > { %v1563_v23 = vmax.f32 %v1562_v21, 0.0 }
 0x1d0   : > { %v1564_v25 = vpack.c.bf16 %v1563_v23, %v1563_v23 }
 0x1d2   : > { %v1569_v26 = vsel %vm1567_vm3, %v1564_v25, %v1568_v24 }
 0x1d3   : > { %1570 = vst [vmem:[%s168_s21] sm:$0x7] %v1569_v26 }
 0x1d4 PF: > { %s13_s12 = sadd.s32 1, %s2101_s12  }
 0x1d5   : > { %p10_p4 = scmp.ge.s32.totalorder %s13_s12, 6  }
 0x1d7   :  { %12 = sbr.rel (!%p10_p4) target bundleno = 1 (0x1), region = 73 }

// kernel: encoder_forward.7
= control target key start
LH: loop header
LB: loop body
LE: loop exit
PB: predicated region body
PF: predicated region fallthrough
CT: control target
= control target key end

     0   :  { %s4304_s1 = inlined_call_operand.vmem [shape: bf16[1280,512], index: 1, kind: input, shape index: {}]   ;;  %s4305_s0 = inlined_call_operand.vmem [shape: bf16[8,1280], index: 0, kind: input, shape index: {}]   ;;  %s4306_s2 = inlined_call_operand.vmem [shape: f32[1,512], index: 2, kind: input, shape index: {}]   ;;  %s4307_s3 = inlined_call_operand.vmem [shape: f32[8,512], index: 3, kind: output, shape index: {}]  }
   0x1   :  { %v2780_v0 = vld [vmem:[%s4304_s1 + $0x4] ss:$16 sps:$4 sm:$0xff]   ;;  %v2782_v1 = vld [vmem:[%s4304_s1 + $0xc] ss:$16 sps:$4 sm:$0xff]   ;;  %v2784_v2 = vld [vmem:[%s4304_s1] ss:$16 sps:$4 sm:$0xff]  }
   0x2   :  { %1996 = vmatprep.subr.bf16.mxu0 %v2780_v0  ;;  %v2785_v3 = vld [vmem:[%s4304_s1 + $0x8] ss:$16 sps:$4 sm:$0xff]   ;;  %2201 = vmatprep.subr.bf16.mxu1 %v2782_v1  ;;  %v2786_v4 = vld [vmem:[%s4304_s1 + $0x24] ss:$16 sps:$4 sm:$0xff]   ;;  %v2788_v5 = vld [vmem:[%s4304_s1 + $0x2c] ss:$16 sps:$4 sm:$0xff]  }
   0x3   :  { %1997 = vmatpush1.bf16.msra.mxu0 %v2784_v2  ;;  %2202 = vmatpush1.bf16.msra.mxu1 %v2785_v3  ;;  %v2790_v6 = vld [vmem:[%s4304_s1 + $0x20] ss:$16 sps:$4 sm:$0xff]   ;;  %v2791_v7 = vld [vmem:[%s4304_s1 + $0x28] ss:$16 sps:$4 sm:$0xff]   ;;  %v2792_v8 = vld [vmem:[%s4304_s1 + $0x44] ss:$16 sps:$4 sm:$0xff]  }
   0x4   :  { %1998 = vmatprep.subr.bf16.mxu0 %v2786_v4  ;;  %2203 = vmatprep.subr.bf16.mxu1 %v2788_v5  ;;  %v2794_v9 = vld [vmem:[%s4304_s1 + $0x4c] ss:$16 sps:$4 sm:$0xff]   ;;  %v2796_v10 = vld [vmem:[%s4304_s1 + $0x40] ss:$16 sps:$4 sm:$0xff]   ;;  %v2797_v11 = vld [vmem:[%s4304_s1 + $0x48] ss:$16 sps:$4 sm:$0xff]  }
   0x5   :  { %v2798_v12 = vld [vmem:[%s4304_s1 + $0x64] ss:$16 sps:$4 sm:$0xff]   ;;  %v2800_v13 = vld [vmem:[%s4304_s1 + $0x6c] ss:$16 sps:$4 sm:$0xff]   ;;  %v2802_v14 = vld [vmem:[%s4304_s1 + $0x60] ss:$16 sps:$4 sm:$0xff]  }
   0x6   :  { %v2803_v15 = vld [vmem:[%s4304_s1 + $0x68] ss:$16 sps:$4 sm:$0xff]   ;;  %v2804_v16 = vld [vmem:[%s4304_s1 + $0x84] ss:$16 sps:$4 sm:$0xff]   ;;  %v2806_v17 = vld [vmem:[%s4304_s1 + $0x8c] ss:$16 sps:$4 sm:$0xff]  }
   0x7   :  { %1999 = vmatpush1.bf16.msra.mxu0 %v2790_v6  ;;  %2204 = vmatpush1.bf16.msra.mxu1 %v2791_v7  ;;  %v2808_v18 = vld [vmem:[%s4304_s1 + $0x80] ss:$16 sps:$4 sm:$0xff]   ;;  %v2809_v19 = vld [vmem:[%s4304_s1 + $0x88] ss:$16 sps:$4 sm:$0xff]   ;;  %v2810_v20 = vld [vmem:[%s4304_s1 + $0xa4] ss:$16 sps:$4 sm:$0xff]  }
   0x8   :  { %2000 = vmatprep.subr.bf16.mxu0 %v2792_v8  ;;  %2205 = vmatprep.subr.bf16.mxu1 %v2794_v9  ;;  %v2812_v21 = vld [vmem:[%s4304_s1 + $0xac] ss:$16 sps:$4 sm:$0xff]   ;;  %v2814_v22 = vld [vmem:[%s4304_s1 + $0xa0] ss:$16 sps:$4 sm:$0xff]   ;;  %v2815_v23 = vld [vmem:[%s4304_s1 + $0xa8] ss:$16 sps:$4 sm:$0xff]  }
   0x9   :  { %v2816_v24 = vld [vmem:[%s4304_s1 + $0xc4] ss:$16 sps:$4 sm:$0xff]   ;;  %v2818_v25 = vld [vmem:[%s4304_s1 + $0xcc] ss:$16 sps:$4 sm:$0xff]   ;;  %v2820_v26 = vld [vmem:[%s4304_s1 + $0xc0] ss:$16 sps:$4 sm:$0xff]  }
   0xa   :  { %v2821_v27 = vld [vmem:[%s4304_s1 + $0xc8] ss:$16 sps:$4 sm:$0xff]   ;;  %v2822_v28 = vld [vmem:[%s4304_s1 + $0xe4] ss:$16 sps:$4 sm:$0xff]   ;;  %v2824_v29 = vld [vmem:[%s4304_s1 + $0xec] ss:$16 sps:$4 sm:$0xff]  }
   0xb   :  { %2001 = vmatpush1.bf16.msra.mxu0 %v2796_v10  ;;  %2206 = vmatpush1.bf16.msra.mxu1 %v2797_v11  ;;  %v2826_v30 = vld [vmem:[%s4304_s1 + $0xe0] ss:$16 sps:$4 sm:$0xff]   ;;  %v2827_v31 = vld [vmem:[%s4304_s1 + $0xe8] ss:$16 sps:$4 sm:$0xff]   ;;  %v2828_v32 = vld [vmem:[%s4304_s1 + $0x104] ss:$16 sps:$4 sm:$0xff]  }
   0xc   :  { %2002 = vmatprep.subr.bf16.mxu0 %v2798_v12  ;;  %2207 = vmatprep.subr.bf16.mxu1 %v2800_v13  ;;  %v2830_v33 = vld [vmem:[%s4304_s1 + $0x10c] ss:$16 sps:$4 sm:$0xff]   ;;  %v2832_v34 = vld [vmem:[%s4304_s1 + $0x100] ss:$16 sps:$4 sm:$0xff]   ;;  %v2833_v35 = vld [vmem:[%s4304_s1 + $0x108] ss:$16 sps:$4 sm:$0xff]  }
   0xd   :  { %v2834_v36 = vld [vmem:[%s4304_s1 + $0x124] ss:$16 sps:$4 sm:$0xff]   ;;  %v2836_v37 = vld [vmem:[%s4304_s1 + $0x12c] ss:$16 sps:$4 sm:$0xff]   ;;  %v2838_v38 = vld [vmem:[%s4304_s1 + $0x120] ss:$16 sps:$4 sm:$0xff]  }
   0xe   :  { %v2839_v39 = vld [vmem:[%s4304_s1 + $0x128] ss:$16 sps:$4 sm:$0xff]   ;;  %v2840_v40 = vld [vmem:[%s4304_s1 + $0x144] ss:$16 sps:$4 sm:$0xff]   ;;  %v2842_v41 = vld [vmem:[%s4304_s1 + $0x14c] ss:$16 sps:$4 sm:$0xff]  }
   0xf   :  { %2003 = vmatpush1.bf16.msra.mxu0 %v2802_v14  ;;  %2208 = vmatpush1.bf16.msra.mxu1 %v2803_v15  ;;  %v2844_v42 = vld [vmem:[%s4304_s1 + $0x140] ss:$16 sps:$4 sm:$0xff]   ;;  %v2845_v43 = vld [vmem:[%s4304_s1 + $0x148] ss:$16 sps:$4 sm:$0xff]   ;;  %v2846_v44 = vld [vmem:[%s4304_s1 + $0x164] ss:$16 sps:$4 sm:$0xff]  }
  0x10   :  { %2004 = vmatprep.subr.bf16.mxu0 %v2804_v16  ;;  %2209 = vmatprep.subr.bf16.mxu1 %v2806_v17  ;;  %v2848_v45 = vld [vmem:[%s4304_s1 + $0x16c] ss:$16 sps:$4 sm:$0xff]   ;;  %v14_v46 = vld [vmem:[%s4305_s0] sm:$0xff]  ;;  %v2851_v49 = vld [vmem:[%s4304_s1 + $0x168] ss:$16 sps:$4 sm:$0xff]  }
  0x11   :  { %v2850_v47 = vld [vmem:[%s4304_s1 + $0x160] ss:$16 sps:$4 sm:$0xff]   ;;  %v2415_v48 = vcombine.high %v14_v46, %v14_v46  ;;  %v2852_v50 = vld [vmem:[%s4304_s1 + $0x184] ss:$16 sps:$4 sm:$0xff]   ;;  %v2854_v51 = vld [vmem:[%s4304_s1 + $0x18c] ss:$16 sps:$4 sm:$0xff]   ;;  %v2414_v4 = vcombine.low %v14_v46, %v14_v46 }
  0x12   :  { %v2856_v52 = vld [vmem:[%s4304_s1 + $0x180] ss:$16 sps:$4 sm:$0xff]   ;;  %v2857_v53 = vld [vmem:[%s4304_s1 + $0x188] ss:$16 sps:$4 sm:$0xff]   ;;  %v2858_v54 = vld [vmem:[%s4304_s1 + $0x1a4] ss:$16 sps:$4 sm:$0xff]  }
  0x13   :  { %2005 = vmatpush1.bf16.msra.mxu0 %v2808_v18  ;;  %2210 = vmatpush1.bf16.msra.mxu1 %v2809_v19  ;;  %v2860_v55 = vld [vmem:[%s4304_s1 + $0x1ac] ss:$16 sps:$4 sm:$0xff]   ;;  %v2862_v56 = vld [vmem:[%s4304_s1 + $0x1a0] ss:$16 sps:$4 sm:$0xff]   ;;  %v2863_v57 = vld [vmem:[%s4304_s1 + $0x1a8] ss:$16 sps:$4 sm:$0xff]  }
  0x14   :  { %2006 = vmatprep.subr.bf16.mxu0 %v2810_v20  ;;  %2211 = vmatprep.subr.bf16.mxu1 %v2812_v21  ;;  %v2864_v58 = vld [vmem:[%s4304_s1 + $0x1c4] ss:$16 sps:$4 sm:$0xff]   ;;  %v2866_v59 = vld [vmem:[%s4304_s1 + $0x1cc] ss:$16 sps:$4 sm:$0xff]   ;;  %v2868_v60 = vld [vmem:[%s4304_s1 + $0x1c0] ss:$16 sps:$4 sm:$0xff]  }
  0x15   :  { %2028 = vmatprep.mubr.bf16.mxu0 %v2415_v48  ;;  %2233 = vmatprep.mubr.bf16.mxu1 %v2415_v48  ;;  %v2869_v61 = vld [vmem:[%s4304_s1 + $0x1c8] ss:$16 sps:$4 sm:$0xff]   ;;  %v2870_v62 = vld [vmem:[%s4304_s1 + $0x1e4] ss:$16 sps:$4 sm:$0xff]   ;;  %v2872_v63 = vld [vmem:[%s4304_s1 + $0x1ec] ss:$16 sps:$4 sm:$0xff]  }
  0x16   :  { %v2874_v0 = vld [vmem:[%s4304_s1 + $0x1e0] ss:$16 sps:$4 sm:$0xff]   ;;  %v2875_v1 = vld [vmem:[%s4304_s1 + $0x1e8] ss:$16 sps:$4 sm:$0xff]   ;;  %v2880_v2 = vld [vmem:[%s4304_s1 + $0x204] ss:$16 sps:$4 sm:$0xff]  }
  0x17   :  { %2007 = vmatpush1.bf16.msra.mxu0 %v2814_v22  ;;  %2212 = vmatpush1.bf16.msra.mxu1 %v2815_v23  ;;  %v2883_v3 = vld [vmem:[%s4304_s1 + $0x20c] ss:$16 sps:$4 sm:$0xff]   ;;  %v2878_v5 = vld [vmem:[%s4304_s1 + $0x200] ss:$16 sps:$4 sm:$0xff]   ;;  %v2881_v6 = vld [vmem:[%s4304_s1 + $0x208] ss:$16 sps:$4 sm:$0xff]  }
  0x18   :  { %2008 = vmatprep.subr.bf16.mxu0 %v2816_v24  ;;  %2213 = vmatprep.subr.bf16.mxu1 %v2818_v25  ;;  %v2886_v7 = vld [vmem:[%s4304_s1 + $0x224] ss:$16 sps:$4 sm:$0xff]   ;;  %v2889_v8 = vld [vmem:[%s4304_s1 + $0x22c] ss:$16 sps:$4 sm:$0xff]   ;;  %v2884_v9 = vld [vmem:[%s4304_s1 + $0x220] ss:$16 sps:$4 sm:$0xff]  }
  0x19   :  { %v2887_v10 = vld [vmem:[%s4304_s1 + $0x228] ss:$16 sps:$4 sm:$0xff]   ;;  %v2892_v11 = vld [vmem:[%s4304_s1 + $0x244] ss:$16 sps:$4 sm:$0xff]   ;;  %v2895_v12 = vld [vmem:[%s4304_s1 + $0x24c] ss:$16 sps:$4 sm:$0xff]  }
  0x1a   :  { %v2890_v13 = vld [vmem:[%s4304_s1 + $0x240] ss:$16 sps:$4 sm:$0xff]   ;;  %v2893_v14 = vld [vmem:[%s4304_s1 + $0x248] ss:$16 sps:$4 sm:$0xff]   ;;  %v2898_v15 = vld [vmem:[%s4304_s1 + $0x264] ss:$16 sps:$4 sm:$0xff]  }
  0x1b   :  { %2009 = vmatpush1.bf16.msra.mxu0 %v2820_v26  ;;  %2214 = vmatpush1.bf16.msra.mxu1 %v2821_v27  ;;  %v2901_v16 = vld [vmem:[%s4304_s1 + $0x26c] ss:$16 sps:$4 sm:$0xff]   ;;  %v2896_v17 = vld [vmem:[%s4304_s1 + $0x260] ss:$16 sps:$4 sm:$0xff]   ;;  %v2899_v18 = vld [vmem:[%s4304_s1 + $0x268] ss:$16 sps:$4 sm:$0xff]  }
  0x1c   :  { %2010 = vmatprep.subr.bf16.mxu0 %v2822_v28  ;;  %2215 = vmatprep.subr.bf16.mxu1 %v2824_v29  ;;  %v2904_v19 = vld [vmem:[%s4304_s1 + $0x284] ss:$16 sps:$4 sm:$0xff]   ;;  %v2907_v20 = vld [vmem:[%s4304_s1 + $0x28c] ss:$16 sps:$4 sm:$0xff]   ;;  %v2902_v21 = vld [vmem:[%s4304_s1 + $0x280] ss:$16 sps:$4 sm:$0xff]  }
  0x1d   :  { %v2905_v22 = vld [vmem:[%s4304_s1 + $0x288] ss:$16 sps:$4 sm:$0xff]   ;;  %v2910_v23 = vld [vmem:[%s4304_s1 + $0x2a4] ss:$16 sps:$4 sm:$0xff]   ;;  %v2913_v24 = vld [vmem:[%s4304_s1 + $0x2ac] ss:$16 sps:$4 sm:$0xff]  }
  0x1e   :  { %v2908_v25 = vld [vmem:[%s4304_s1 + $0x2a0] ss:$16 sps:$4 sm:$0xff]   ;;  %v2911_v26 = vld [vmem:[%s4304_s1 + $0x2a8] ss:$16 sps:$4 sm:$0xff]   ;;  %v2916_v27 = vld [vmem:[%s4304_s1 + $0x2c4] ss:$16 sps:$4 sm:$0xff]  }
  0x1f   :  { %2011 = vmatpush1.bf16.msra.mxu0 %v2826_v30  ;;  %2216 = vmatpush1.bf16.msra.mxu1 %v2827_v31  ;;  %v2919_v28 = vld [vmem:[%s4304_s1 + $0x2cc] ss:$16 sps:$4 sm:$0xff]   ;;  %v2914_v31 = vld [vmem:[%s4304_s1 + $0x2c0] ss:$16 sps:$4 sm:$0xff]   ;;  %v2941_v48 = vld [vmem:[%s4304_s1 + $0x348] ss:$16 sps:$4 sm:$0xff]  }
  0x20   :  { %2012 = vmatprep.subr.bf16.mxu0 %v2828_v32  ;;  %2217 = vmatprep.subr.bf16.mxu1 %v2830_v33  ;;  %v3566_v29 = vld [vmem:[%s4305_s0 + $0x8] sm:$0xff]  ;;  %v2922_v33 = vld [vmem:[%s4304_s1 + $0x2e4] ss:$16 sps:$4 sm:$0xff]  }
  0x21   :  { %v2417_v30 = vcombine.high %v3566_v29, %v3566_v29  ;;  %v2917_v32 = vld [vmem:[%s4304_s1 + $0x2c8] ss:$16 sps:$4 sm:$0xff]   ;;  %v2943_v46 = vld [vmem:[%s4304_s1 + $0x34c] ss:$16 sps:$4 sm:$0xff]  }
  0x23   :  { %2013 = vmatpush1.bf16.msra.mxu0 %v2832_v34  ;;  %2218 = vmatpush1.bf16.msra.mxu1 %v2833_v35  ;;  %v2925_v34 = vld [vmem:[%s4304_s1 + $0x2ec] ss:$16 sps:$4 sm:$0xff]   ;;  %v2920_v35 = vld [vmem:[%s4304_s1 + $0x2e0] ss:$16 sps:$4 sm:$0xff]  }
  0x24   :  { %2014 = vmatprep.subr.bf16.mxu0 %v2834_v36  ;;  %2219 = vmatprep.subr.bf16.mxu1 %v2836_v37  ;;  %v2923_v36 = vld [vmem:[%s4304_s1 + $0x2e8] ss:$16 sps:$4 sm:$0xff]   ;;  %v2928_v37 = vld [vmem:[%s4304_s1 + $0x304] ss:$16 sps:$4 sm:$0xff]  }
  0x27   :  { %2015 = vmatpush1.bf16.msra.mxu0 %v2838_v38  ;;  %2220 = vmatpush1.bf16.msra.mxu1 %v2839_v39  ;;  %v2931_v38 = vld [vmem:[%s4304_s1 + $0x30c] ss:$16 sps:$4 sm:$0xff]   ;;  %v2926_v39 = vld [vmem:[%s4304_s1 + $0x300] ss:$16 sps:$4 sm:$0xff]  }
  0x28   :  { %2016 = vmatprep.subr.bf16.mxu0 %v2840_v40  ;;  %2221 = vmatprep.subr.bf16.mxu1 %v2842_v41  ;;  %v2929_v40 = vld [vmem:[%s4304_s1 + $0x308] ss:$16 sps:$4 sm:$0xff]   ;;  %v2934_v41 = vld [vmem:[%s4304_s1 + $0x324] ss:$16 sps:$4 sm:$0xff]  }
  0x2b   :  { %2017 = vmatpush1.bf16.msra.mxu0 %v2844_v42  ;;  %2222 = vmatpush1.bf16.msra.mxu1 %v2845_v43  ;;  %v2937_v42 = vld [vmem:[%s4304_s1 + $0x32c] ss:$16 sps:$4 sm:$0xff]   ;;  %v2932_v43 = vld [vmem:[%s4304_s1 + $0x320] ss:$16 sps:$4 sm:$0xff]  }
  0x2c   :  { %2018 = vmatprep.subr.bf16.mxu0 %v2846_v44  ;;  %2223 = vmatprep.subr.bf16.mxu1 %v2848_v45  ;;  %v2935_v44 = vld [vmem:[%s4304_s1 + $0x328] ss:$16 sps:$4 sm:$0xff]   ;;  %v2940_v45 = vld [vmem:[%s4304_s1 + $0x344] ss:$16 sps:$4 sm:$0xff]  }
  0x2f   :  { %2019 = vmatpush1.bf16.msra.mxu0 %v2850_v47  ;;  %2224 = vmatpush1.bf16.msra.mxu1 %v2851_v49  ;;  %v2938_v47 = vld [vmem:[%s4304_s1 + $0x340] ss:$16 sps:$4 sm:$0xff]   ;;  %v2946_v49 = vld [vmem:[%s4304_s1 + $0x364] ss:$16 sps:$4 sm:$0xff]  }
  0x30   :  { %2020 = vmatprep.subr.bf16.mxu0 %v2852_v50  ;;  %2225 = vmatprep.subr.bf16.mxu1 %v2854_v51  ;;  %v2949_v50 = vld [vmem:[%s4304_s1 + $0x36c] ss:$16 sps:$4 sm:$0xff]   ;;  %v2944_v51 = vld [vmem:[%s4304_s1 + $0x360] ss:$16 sps:$4 sm:$0xff]  }
  0x33   :  { %2021 = vmatpush1.bf16.msra.mxu0 %v2856_v52  ;;  %2226 = vmatpush1.bf16.msra.mxu1 %v2857_v53  ;;  %v2947_v52 = vld [vmem:[%s4304_s1 + $0x368] ss:$16 sps:$4 sm:$0xff]   ;;  %v2952_v53 = vld [vmem:[%s4304_s1 + $0x384] ss:$16 sps:$4 sm:$0xff]  }
  0x34   :  { %2022 = vmatprep.subr.bf16.mxu0 %v2858_v54  ;;  %2227 = vmatprep.subr.bf16.mxu1 %v2860_v55  ;;  %v2955_v54 = vld [vmem:[%s4304_s1 + $0x38c] ss:$16 sps:$4 sm:$0xff]   ;;  %v2950_v55 = vld [vmem:[%s4304_s1 + $0x380] ss:$16 sps:$4 sm:$0xff]  }
  0x37   :  { %2023 = vmatpush1.bf16.msra.mxu0 %v2862_v56  ;;  %2228 = vmatpush1.bf16.msra.mxu1 %v2863_v57  ;;  %v2953_v56 = vld [vmem:[%s4304_s1 + $0x388] ss:$16 sps:$4 sm:$0xff]   ;;  %v2958_v57 = vld [vmem:[%s4304_s1 + $0x3a4] ss:$16 sps:$4 sm:$0xff]  }
  0x38   :  { %2024 = vmatprep.subr.bf16.mxu0 %v2864_v58  ;;  %2229 = vmatprep.subr.bf16.mxu1 %v2866_v59  ;;  %v2961_v58 = vld [vmem:[%s4304_s1 + $0x3ac] ss:$16 sps:$4 sm:$0xff]   ;;  %v2956_v59 = vld [vmem:[%s4304_s1 + $0x3a0] ss:$16 sps:$4 sm:$0xff]  }
  0x3b   :  { %2025 = vmatpush1.bf16.msra.mxu0 %v2868_v60  ;;  %2230 = vmatpush1.bf16.msra.mxu1 %v2869_v61  ;;  %v2959_v60 = vld [vmem:[%s4304_s1 + $0x3a8] ss:$16 sps:$4 sm:$0xff]   ;;  %v2964_v61 = vld [vmem:[%s4304_s1 + $0x3c4] ss:$16 sps:$4 sm:$0xff]  }
  0x3c   :  { %2026 = vmatprep.subr.bf16.mxu0 %v2870_v62  ;;  %2231 = vmatprep.subr.bf16.mxu1 %v2872_v63  ;;  %v2967_v62 = vld [vmem:[%s4304_s1 + $0x3cc] ss:$16 sps:$4 sm:$0xff]   ;;  %v2962_v63 = vld [vmem:[%s4304_s1 + $0x3c0] ss:$16 sps:$4 sm:$0xff]  }
  0x3f   :  { %2027 = vmatpush1.bf16.msra.mxu0 %v2874_v0  ;;  %2232 = vmatpush1.bf16.msra.mxu1 %v2875_v1  ;;  %v2965_v0 = vld [vmem:[%s4304_s1 + $0x3c8] ss:$16 sps:$4 sm:$0xff]   ;;  %v2970_v1 = vld [vmem:[%s4304_s1 + $0x3e4] ss:$16 sps:$4 sm:$0xff]  }
  0x40   :  { %2037 = vmatprep.subr.bf16.mxu0 %v2880_v2  ;;  %2242 = vmatprep.subr.bf16.mxu1 %v2883_v3  ;;  %v2973_v2 = vld [vmem:[%s4304_s1 + $0x3ec] ss:$16 sps:$4 sm:$0xff]   ;;  %v2968_v3 = vld [vmem:[%s4304_s1 + $0x3e0] ss:$16 sps:$4 sm:$0xff]  }
  0x42   :  { %2029 = vmatmul.mubr.bf16.vlgmr.msra.gmra.mrb[0].mxu0 %v2414_v4  ;;  %2234 = vmatmul.mubr.bf16.vlgmr.msra.gmra.mrb[0].mxu1 %v2414_v4  ;;  %v2971_v4 = vld [vmem:[%s4304_s1 + $0x3e8] ss:$16 sps:$4 sm:$0xff]  }
  0x43   :  { %2038 = vmatpush1.bf16.msra.mxu0 %v2878_v5  ;;  %2243 = vmatpush1.bf16.msra.mxu1 %v2881_v6  ;;  %v2978_v5 = vld [vmem:[%s4304_s1 + $0x404] ss:$16 sps:$4 sm:$0xff]   ;;  %v2981_v6 = vld [vmem:[%s4304_s1 + $0x40c] ss:$16 sps:$4 sm:$0xff]  }
  0x44   :  { %2039 = vmatprep.subr.bf16.mxu0 %v2886_v7  ;;  %2244 = vmatprep.subr.bf16.mxu1 %v2889_v8  ;;  %v2416_v7 = vcombine.low %v3566_v29, %v3566_v29  ;;  %v2976_v8 = vld [vmem:[%s4304_s1 + $0x400] ss:$16 sps:$4 sm:$0xff]   ;;  %v3011_v29 = vld [vmem:[%s4304_s1 + $0x4ac] ss:$16 sps:$4 sm:$0xff]  }
  0x45   :  { %2069 = vmatprep.mubr.bf16.mxu0 %v2417_v30  ;;  %2274 = vmatprep.mubr.bf16.mxu1 %v2417_v30  ;;  %v3006_v30 = vld [vmem:[%s4304_s1 + $0x4a0] ss:$16 sps:$4 sm:$0xff]  }
  0x47   :  { %2040 = vmatpush1.bf16.msra.mxu0 %v2884_v9  ;;  %2245 = vmatpush1.bf16.msra.mxu1 %v2887_v10  ;;  %v2979_v9 = vld [vmem:[%s4304_s1 + $0x408] ss:$16 sps:$4 sm:$0xff]   ;;  %v2984_v10 = vld [vmem:[%s4304_s1 + $0x424] ss:$16 sps:$4 sm:$0xff]  }
  0x48   :  { %2041 = vmatprep.subr.bf16.mxu0 %v2892_v11  ;;  %2246 = vmatprep.subr.bf16.mxu1 %v2895_v12  ;;  %v3704_v11 = vld [vmem:[%s4305_s0 + $0x10] sm:$0xff]  ;;  %v2987_v12 = vld [vmem:[%s4304_s1 + $0x42c] ss:$16 sps:$4 sm:$0xff]  }
  0x4b   :  { %2042 = vmatpush1.bf16.msra.mxu0 %v2890_v13  ;;  %2247 = vmatpush1.bf16.msra.mxu1 %v2893_v14  ;;  %v2419_v13 = vcombine.high %v3704_v11, %v3704_v11  ;;  %v2982_v14 = vld [vmem:[%s4304_s1 + $0x420] ss:$16 sps:$4 sm:$0xff]  }
  0x4c   :  { %2043 = vmatprep.subr.bf16.mxu0 %v2898_v15  ;;  %2248 = vmatprep.subr.bf16.mxu1 %v2901_v16  ;;  %v2985_v15 = vld [vmem:[%s4304_s1 + $0x428] ss:$16 sps:$4 sm:$0xff]   ;;  %v2990_v16 = vld [vmem:[%s4304_s1 + $0x444] ss:$16 sps:$4 sm:$0xff]  }
  0x4f   :  { %2044 = vmatpush1.bf16.msra.mxu0 %v2896_v17  ;;  %2249 = vmatpush1.bf16.msra.mxu1 %v2899_v18  ;;  %v2993_v17 = vld [vmem:[%s4304_s1 + $0x44c] ss:$16 sps:$4 sm:$0xff]   ;;  %v2988_v18 = vld [vmem:[%s4304_s1 + $0x440] ss:$16 sps:$4 sm:$0xff]  }
  0x50   :  { %2045 = vmatprep.subr.bf16.mxu0 %v2904_v19  ;;  %2250 = vmatprep.subr.bf16.mxu1 %v2907_v20  ;;  %v2991_v19 = vld [vmem:[%s4304_s1 + $0x448] ss:$16 sps:$4 sm:$0xff]   ;;  %v2996_v20 = vld [vmem:[%s4304_s1 + $0x464] ss:$16 sps:$4 sm:$0xff]  }
  0x53   :  { %2046 = vmatpush1.bf16.msra.mxu0 %v2902_v21  ;;  %2251 = vmatpush1.bf16.msra.mxu1 %v2905_v22  ;;  %v2999_v21 = vld [vmem:[%s4304_s1 + $0x46c] ss:$16 sps:$4 sm:$0xff]   ;;  %v2994_v22 = vld [vmem:[%s4304_s1 + $0x460] ss:$16 sps:$4 sm:$0xff]  }
  0x54   :  { %2047 = vmatprep.subr.bf16.mxu0 %v2910_v23  ;;  %2252 = vmatprep.subr.bf16.mxu1 %v2913_v24  ;;  %v2997_v23 = vld [vmem:[%s4304_s1 + $0x468] ss:$16 sps:$4 sm:$0xff]   ;;  %v3002_v24 = vld [vmem:[%s4304_s1 + $0x484] ss:$16 sps:$4 sm:$0xff]  }
  0x57   :  { %2048 = vmatpush1.bf16.msra.mxu0 %v2908_v25  ;;  %2253 = vmatpush1.bf16.msra.mxu1 %v2911_v26  ;;  %v3005_v25 = vld [vmem:[%s4304_s1 + $0x48c] ss:$16 sps:$4 sm:$0xff]   ;;  %v3000_v26 = vld [vmem:[%s4304_s1 + $0x480] ss:$16 sps:$4 sm:$0xff]  }
  0x58   :  { %2049 = vmatprep.subr.bf16.mxu0 %v2916_v27  ;;  %2254 = vmatprep.subr.bf16.mxu1 %v2919_v28  ;;  %v3003_v27 = vld [vmem:[%s4304_s1 + $0x488] ss:$16 sps:$4 sm:$0xff]   ;;  %v3008_v28 = vld [vmem:[%s4304_s1 + $0x4a4] ss:$16 sps:$4 sm:$0xff]  }
  0x5b   :  { %2050 = vmatpush1.bf16.msra.mxu0 %v2914_v31  ;;  %2255 = vmatpush1.bf16.msra.mxu1 %v2917_v32  ;;  %v3009_v31 = vld [vmem:[%s4304_s1 + $0x4a8] ss:$16 sps:$4 sm:$0xff]   ;;  %v3014_v32 = vld [vmem:[%s4304_s1 + $0x4c4] ss:$16 sps:$4 sm:$0xff]  }
  0x5c   :  { %2051 = vmatprep.subr.bf16.mxu0 %v2922_v33  ;;  %2256 = vmatprep.subr.bf16.mxu1 %v2925_v34  ;;  %v3017_v33 = vld [vmem:[%s4304_s1 + $0x4cc] ss:$16 sps:$4 sm:$0xff]   ;;  %v3012_v34 = vld [vmem:[%s4304_s1 + $0x4c0] ss:$16 sps:$4 sm:$0xff]  }
  0x5f   :  { %2052 = vmatpush1.bf16.msra.mxu0 %v2920_v35  ;;  %2257 = vmatpush1.bf16.msra.mxu1 %v2923_v36  ;;  %v3015_v35 = vld [vmem:[%s4304_s1 + $0x4c8] ss:$16 sps:$4 sm:$0xff]   ;;  %v3020_v36 = vld [vmem:[%s4304_s1 + $0x4e4] ss:$16 sps:$4 sm:$0xff]  }
  0x60   :  { %2053 = vmatprep.subr.bf16.mxu0 %v2928_v37  ;;  %2258 = vmatprep.subr.bf16.mxu1 %v2931_v38  ;;  %v3023_v37 = vld [vmem:[%s4304_s1 + $0x4ec] ss:$16 sps:$4 sm:$0xff]   ;;  %v3018_v38 = vld [vmem:[%s4304_s1 + $0x4e0] ss:$16 sps:$4 sm:$0xff]  }
  0x63   :  { %2054 = vmatpush1.bf16.msra.mxu0 %v2926_v39  ;;  %2259 = vmatpush1.bf16.msra.mxu1 %v2929_v40  ;;  %v3021_v39 = vld [vmem:[%s4304_s1 + $0x4e8] ss:$16 sps:$4 sm:$0xff]   ;;  %v3026_v40 = vld [vmem:[%s4304_s1 + $0x504] ss:$16 sps:$4 sm:$0xff]  }
  0x64   :  { %2055 = vmatprep.subr.bf16.mxu0 %v2934_v41  ;;  %2260 = vmatprep.subr.bf16.mxu1 %v2937_v42  ;;  %v3029_v41 = vld [vmem:[%s4304_s1 + $0x50c] ss:$16 sps:$4 sm:$0xff]   ;;  %v3024_v42 = vld [vmem:[%s4304_s1 + $0x500] ss:$16 sps:$4 sm:$0xff]  }
  0x67   :  { %2056 = vmatpush1.bf16.msra.mxu0 %v2932_v43  ;;  %2261 = vmatpush1.bf16.msra.mxu1 %v2935_v44  ;;  %v3027_v43 = vld [vmem:[%s4304_s1 + $0x508] ss:$16 sps:$4 sm:$0xff]   ;;  %v3032_v44 = vld [vmem:[%s4304_s1 + $0x524] ss:$16 sps:$4 sm:$0xff]  }
  0x68   :  { %2057 = vmatprep.subr.bf16.mxu0 %v2940_v45  ;;  %2262 = vmatprep.subr.bf16.mxu1 %v2943_v46  ;;  %v3035_v45 = vld [vmem:[%s4304_s1 + $0x52c] ss:$16 sps:$4 sm:$0xff]   ;;  %v3030_v46 = vld [vmem:[%s4304_s1 + $0x520] ss:$16 sps:$4 sm:$0xff]  }
  0x6b   :  { %2058 = vmatpush1.bf16.msra.mxu0 %v2938_v47  ;;  %2263 = vmatpush1.bf16.msra.mxu1 %v2941_v48  ;;  %v3033_v47 = vld [vmem:[%s4304_s1 + $0x528] ss:$16 sps:$4 sm:$0xff]   ;;  %v3038_v48 = vld [vmem:[%s4304_s1 + $0x544] ss:$16 sps:$4 sm:$0xff]  }
  0x6c   :  { %2059 = vmatprep.subr.bf16.mxu0 %v2946_v49  ;;  %2264 = vmatprep.subr.bf16.mxu1 %v2949_v50  ;;  %v3041_v49 = vld [vmem:[%s4304_s1 + $0x54c] ss:$16 sps:$4 sm:$0xff]   ;;  %v3036_v50 = vld [vmem:[%s4304_s1 + $0x540] ss:$16 sps:$4 sm:$0xff]  }
  0x6f   :  { %2060 = vmatpush1.bf16.msra.mxu0 %v2944_v51  ;;  %2265 = vmatpush1.bf16.msra.mxu1 %v2947_v52  ;;  %v3039_v51 = vld [vmem:[%s4304_s1 + $0x548] ss:$16 sps:$4 sm:$0xff]   ;;  %v3044_v52 = vld [vmem:[%s4304_s1 + $0x564] ss:$16 sps:$4 sm:$0xff]  }
  0x70   :  { %2061 = vmatprep.subr.bf16.mxu0 %v2952_v53  ;;  %2266 = vmatprep.subr.bf16.mxu1 %v2955_v54  ;;  %v3047_v53 = vld [vmem:[%s4304_s1 + $0x56c] ss:$16 sps:$4 sm:$0xff]   ;;  %v3042_v54 = vld [vmem:[%s4304_s1 + $0x560] ss:$16 sps:$4 sm:$0xff]  }
  0x73   :  { %2062 = vmatpush1.bf16.msra.mxu0 %v2950_v55  ;;  %2267 = vmatpush1.bf16.msra.mxu1 %v2953_v56  ;;  %v3045_v55 = vld [vmem:[%s4304_s1 + $0x568] ss:$16 sps:$4 sm:$0xff]   ;;  %v3050_v56 = vld [vmem:[%s4304_s1 + $0x584] ss:$16 sps:$4 sm:$0xff]  }
  0x74   :  { %2063 = vmatprep.subr.bf16.mxu0 %v2958_v57  ;;  %2268 = vmatprep.subr.bf16.mxu1 %v2961_v58  ;;  %v3053_v57 = vld [vmem:[%s4304_s1 + $0x58c] ss:$16 sps:$4 sm:$0xff]   ;;  %v3048_v58 = vld [vmem:[%s4304_s1 + $0x580] ss:$16 sps:$4 sm:$0xff]  }
  0x77   :  { %2064 = vmatpush1.bf16.msra.mxu0 %v2956_v59  ;;  %2269 = vmatpush1.bf16.msra.mxu1 %v2959_v60  ;;  %v3051_v59 = vld [vmem:[%s4304_s1 + $0x588] ss:$16 sps:$4 sm:$0xff]   ;;  %v3056_v60 = vld [vmem:[%s4304_s1 + $0x5a4] ss:$16 sps:$4 sm:$0xff]  }
  0x78   :  { %2065 = vmatprep.subr.bf16.mxu0 %v2964_v61  ;;  %2270 = vmatprep.subr.bf16.mxu1 %v2967_v62  ;;  %v3059_v61 = vld [vmem:[%s4304_s1 + $0x5ac] ss:$16 sps:$4 sm:$0xff]   ;;  %v3054_v62 = vld [vmem:[%s4304_s1 + $0x5a0] ss:$16 sps:$4 sm:$0xff]  }
  0x7b   :  { %2066 = vmatpush1.bf16.msra.mxu0 %v2962_v63  ;;  %2271 = vmatpush1.bf16.msra.mxu1 %v2965_v0  ;;  %v3057_v63 = vld [vmem:[%s4304_s1 + $0x5a8] ss:$16 sps:$4 sm:$0xff]   ;;  %v3062_v0 = vld [vmem:[%s4304_s1 + $0x5c4] ss:$16 sps:$4 sm:$0xff]  }
  0x7c   :  { %2067 = vmatprep.subr.bf16.mxu0 %v2970_v1  ;;  %2272 = vmatprep.subr.bf16.mxu1 %v2973_v2  ;;  %v3065_v1 = vld [vmem:[%s4304_s1 + $0x5cc] ss:$16 sps:$4 sm:$0xff]   ;;  %v3060_v2 = vld [vmem:[%s4304_s1 + $0x5c0] ss:$16 sps:$4 sm:$0xff]  }
  0x7f   :  { %2068 = vmatpush1.bf16.msra.mxu0 %v2968_v3  ;;  %2273 = vmatpush1.bf16.msra.mxu1 %v2971_v4  ;;  %v3063_v3 = vld [vmem:[%s4304_s1 + $0x5c8] ss:$16 sps:$4 sm:$0xff]   ;;  %v3068_v4 = vld [vmem:[%s4304_s1 + $0x5e4] ss:$16 sps:$4 sm:$0xff]  }
  0x80   :  { %2078 = vmatprep.subr.bf16.mxu0 %v2978_v5  ;;  %2283 = vmatprep.subr.bf16.mxu1 %v2981_v6  ;;  %v3071_v5 = vld [vmem:[%s4304_s1 + $0x5ec] ss:$16 sps:$4 sm:$0xff]   ;;  %v3066_v6 = vld [vmem:[%s4304_s1 + $0x5e0] ss:$16 sps:$4 sm:$0xff]  }
  0x82   :  { %2070 = vmatmul.mubr.bf16.vlgmr.msra.gmra.mrb[0].mxu0 %v2416_v7  ;;  %2275 = vmatmul.mubr.bf16.vlgmr.msra.gmra.mrb[0].mxu1 %v2416_v7  ;;  %v3069_v7 = vld [vmem:[%s4304_s1 + $0x5e8] ss:$16 sps:$4 sm:$0xff]  }
  0x83   :  { %2079 = vmatpush1.bf16.msra.mxu0 %v2976_v8  ;;  %2284 = vmatpush1.bf16.msra.mxu1 %v2979_v9  ;;  %v3076_v8 = vld [vmem:[%s4304_s1 + $0x604] ss:$16 sps:$4 sm:$0xff]   ;;  %v3079_v9 = vld [vmem:[%s4304_s1 + $0x60c] ss:$16 sps:$4 sm:$0xff]  }
  0x84   :  { %2080 = vmatprep.subr.bf16.mxu0 %v2984_v10  ;;  %2285 = vmatprep.subr.bf16.mxu1 %v2987_v12  ;;  %v3074_v10 = vld [vmem:[%s4304_s1 + $0x600] ss:$16 sps:$4 sm:$0xff]   ;;  %v2418_v12 = vcombine.low %v3704_v11, %v3704_v11  ;;  %v3085_v11 = vld [vmem:[%s4304_s1 + $0x62c] ss:$16 sps:$4 sm:$0xff]  }
  0x85   :  { %2110 = vmatprep.mubr.bf16.mxu0 %v2419_v13  ;;  %2315 = vmatprep.mubr.bf16.mxu1 %v2419_v13  ;;  %v3077_v13 = vld [vmem:[%s4304_s1 + $0x608] ss:$16 sps:$4 sm:$0xff]  }
  0x87   :  { %2081 = vmatpush1.bf16.msra.mxu0 %v2982_v14  ;;  %2286 = vmatpush1.bf16.msra.mxu1 %v2985_v15  ;;  %v3902_v14 = vld [vmem:[%s4305_s0 + $0x18] sm:$0xff]  ;;  %v3082_v15 = vld [vmem:[%s4304_s1 + $0x624] ss:$16 sps:$4 sm:$0xff]  }
  0x88   :  { %2082 = vmatprep.subr.bf16.mxu0 %v2990_v16  ;;  %2287 = vmatprep.subr.bf16.mxu1 %v2993_v17  ;;  %v2421_v16 = vcombine.high %v3902_v14, %v3902_v14  ;;  %v3080_v17 = vld [vmem:[%s4304_s1 + $0x620] ss:$16 sps:$4 sm:$0xff]  }
  0x8b   :  { %2083 = vmatpush1.bf16.msra.mxu0 %v2988_v18  ;;  %2288 = vmatpush1.bf16.msra.mxu1 %v2991_v19  ;;  %v3083_v18 = vld [vmem:[%s4304_s1 + $0x628] ss:$16 sps:$4 sm:$0xff]   ;;  %v3088_v19 = vld [vmem:[%s4304_s1 + $0x644] ss:$16 sps:$4 sm:$0xff]  }
  0x8c   :  { %2084 = vmatprep.subr.bf16.mxu0 %v2996_v20  ;;  %2289 = vmatprep.subr.bf16.mxu1 %v2999_v21  ;;  %v3091_v20 = vld [vmem:[%s4304_s1 + $0x64c] ss:$16 sps:$4 sm:$0xff]   ;;  %v3086_v21 = vld [vmem:[%s4304_s1 + $0x640] ss:$16 sps:$4 sm:$0xff]  }
  0x8f   :  { %2085 = vmatpush1.bf16.msra.mxu0 %v2994_v22  ;;  %2290 = vmatpush1.bf16.msra.mxu1 %v2997_v23  ;;  %v3089_v22 = vld [vmem:[%s4304_s1 + $0x648] ss:$16 sps:$4 sm:$0xff]   ;;  %v3094_v23 = vld [vmem:[%s4304_s1 + $0x664] ss:$16 sps:$4 sm:$0xff]  }
  0x90   :  { %2086 = vmatprep.subr.bf16.mxu0 %v3002_v24  ;;  %2291 = vmatprep.subr.bf16.mxu1 %v3005_v25  ;;  %v3097_v24 = vld [vmem:[%s4304_s1 + $0x66c] ss:$16 sps:$4 sm:$0xff]   ;;  %v3092_v25 = vld [vmem:[%s4304_s1 + $0x660] ss:$16 sps:$4 sm:$0xff]  }
  0x93   :  { %2087 = vmatpush1.bf16.msra.mxu0 %v3000_v26  ;;  %2292 = vmatpush1.bf16.msra.mxu1 %v3003_v27  ;;  %v3095_v26 = vld [vmem:[%s4304_s1 + $0x668] ss:$16 sps:$4 sm:$0xff]   ;;  %v3100_v27 = vld [vmem:[%s4304_s1 + $0x684] ss:$16 sps:$4 sm:$0xff]  }
  0x94   :  { %2088 = vmatprep.subr.bf16.mxu0 %v3008_v28  ;;  %2293 = vmatprep.subr.bf16.mxu1 %v3011_v29  ;;  %v3103_v28 = vld [vmem:[%s4304_s1 + $0x68c] ss:$16 sps:$4 sm:$0xff]   ;;  %v3098_v29 = vld [vmem:[%s4304_s1 + $0x680] ss:$16 sps:$4 sm:$0xff]  }
  0x97   :  { %2089 = vmatpush1.bf16.msra.mxu0 %v3006_v30  ;;  %2294 = vmatpush1.bf16.msra.mxu1 %v3009_v31  ;;  %v3101_v30 = vld [vmem:[%s4304_s1 + $0x688] ss:$16 sps:$4 sm:$0xff]   ;;  %v3106_v31 = vld [vmem:[%s4304_s1 + $0x6a4] ss:$16 sps:$4 sm:$0xff]  }
  0x98   :  { %2090 = vmatprep.subr.bf16.mxu0 %v3014_v32  ;;  %2295 = vmatprep.subr.bf16.mxu1 %v3017_v33  ;;  %v3109_v32 = vld [vmem:[%s4304_s1 + $0x6ac] ss:$16 sps:$4 sm:$0xff]   ;;  %v3104_v33 = vld [vmem:[%s4304_s1 + $0x6a0] ss:$16 sps:$4 sm:$0xff]  }
  0x9b   :  { %2091 = vmatpush1.bf16.msra.mxu0 %v3012_v34  ;;  %2296 = vmatpush1.bf16.msra.mxu1 %v3015_v35  ;;  %v3107_v34 = vld [vmem:[%s4304_s1 + $0x6a8] ss:$16 sps:$4 sm:$0xff]   ;;  %v3112_v35 = vld [vmem:[%s4304_s1 + $0x6c4] ss:$16 sps:$4 sm:$0xff]  }
  0x9c   :  { %2092 = vmatprep.subr.bf16.mxu0 %v3020_v36  ;;  %2297 = vmatprep.subr.bf16.mxu1 %v3023_v37  ;;  %v3115_v36 = vld [vmem:[%s4304_s1 + $0x6cc] ss:$16 sps:$4 sm:$0xff]   ;;  %v3110_v37 = vld [vmem:[%s4304_s1 + $0x6c0] ss:$16 sps:$4 sm:$0xff]  }
  0x9f   :  { %2093 = vmatpush1.bf16.msra.mxu0 %v3018_v38  ;;  %2298 = vmatpush1.bf16.msra.mxu1 %v3021_v39  ;;  %v3113_v38 = vld [vmem:[%s4304_s1 + $0x6c8] ss:$16 sps:$4 sm:$0xff]   ;;  %v3118_v39 = vld [vmem:[%s4304_s1 + $0x6e4] ss:$16 sps:$4 sm:$0xff]  }
  0xa0   :  { %2094 = vmatprep.subr.bf16.mxu0 %v3026_v40  ;;  %2299 = vmatprep.subr.bf16.mxu1 %v3029_v41  ;;  %v3121_v40 = vld [vmem:[%s4304_s1 + $0x6ec] ss:$16 sps:$4 sm:$0xff]   ;;  %v3116_v41 = vld [vmem:[%s4304_s1 + $0x6e0] ss:$16 sps:$4 sm:$0xff]  }
  0xa3   :  { %2095 = vmatpush1.bf16.msra.mxu0 %v3024_v42  ;;  %2300 = vmatpush1.bf16.msra.mxu1 %v3027_v43  ;;  %v3119_v42 = vld [vmem:[%s4304_s1 + $0x6e8] ss:$16 sps:$4 sm:$0xff]   ;;  %v3124_v43 = vld [vmem:[%s4304_s1 + $0x704] ss:$16 sps:$4 sm:$0xff]  }
  0xa4   :  { %2096 = vmatprep.subr.bf16.mxu0 %v3032_v44  ;;  %2301 = vmatprep.subr.bf16.mxu1 %v3035_v45  ;;  %v3127_v44 = vld [vmem:[%s4304_s1 + $0x70c] ss:$16 sps:$4 sm:$0xff]   ;;  %v3122_v45 = vld [vmem:[%s4304_s1 + $0x700] ss:$16 sps:$4 sm:$0xff]  }
  0xa7   :  { %2097 = vmatpush1.bf16.msra.mxu0 %v3030_v46  ;;  %2302 = vmatpush1.bf16.msra.mxu1 %v3033_v47  ;;  %v3125_v46 = vld [vmem:[%s4304_s1 + $0x708] ss:$16 sps:$4 sm:$0xff]   ;;  %v3130_v47 = vld [vmem:[%s4304_s1 + $0x724] ss:$16 sps:$4 sm:$0xff]  }
  0xa8   :  { %2098 = vmatprep.subr.bf16.mxu0 %v3038_v48  ;;  %2303 = vmatprep.subr.bf16.mxu1 %v3041_v49  ;;  %v3133_v48 = vld [vmem:[%s4304_s1 + $0x72c] ss:$16 sps:$4 sm:$0xff]   ;;  %v3128_v49 = vld [vmem:[%s4304_s1 + $0x720] ss:$16 sps:$4 sm:$0xff]  }
  0xab   :  { %2099 = vmatpush1.bf16.msra.mxu0 %v3036_v50  ;;  %2304 = vmatpush1.bf16.msra.mxu1 %v3039_v51  ;;  %v3131_v50 = vld [vmem:[%s4304_s1 + $0x728] ss:$16 sps:$4 sm:$0xff]   ;;  %v3136_v51 = vld [vmem:[%s4304_s1 + $0x744] ss:$16 sps:$4 sm:$0xff]  }
  0xac   :  { %2100 = vmatprep.subr.bf16.mxu0 %v3044_v52  ;;  %2305 = vmatprep.subr.bf16.mxu1 %v3047_v53  ;;  %v3139_v52 = vld [vmem:[%s4304_s1 + $0x74c] ss:$16 sps:$4 sm:$0xff]   ;;  %v3134_v53 = vld [vmem:[%s4304_s1 + $0x740] ss:$16 sps:$4 sm:$0xff]  }
  0xaf   :  { %2101 = vmatpush1.bf16.msra.mxu0 %v3042_v54  ;;  %2306 = vmatpush1.bf16.msra.mxu1 %v3045_v55  ;;  %v3137_v54 = vld [vmem:[%s4304_s1 + $0x748] ss:$16 sps:$4 sm:$0xff]   ;;  %v3142_v55 = vld [vmem:[%s4304_s1 + $0x764] ss:$16 sps:$4 sm:$0xff]  }
  0xb0   :  { %2102 = vmatprep.subr.bf16.mxu0 %v3050_v56  ;;  %2307 = vmatprep.subr.bf16.mxu1 %v3053_v57  ;;  %v3145_v56 = vld [vmem:[%s4304_s1 + $0x76c] ss:$16 sps:$4 sm:$0xff]   ;;  %v3140_v57 = vld [vmem:[%s4304_s1 + $0x760] ss:$16 sps:$4 sm:$0xff]  }
  0xb3   :  { %2103 = vmatpush1.bf16.msra.mxu0 %v3048_v58  ;;  %2308 = vmatpush1.bf16.msra.mxu1 %v3051_v59  ;;  %v3143_v58 = vld [vmem:[%s4304_s1 + $0x768] ss:$16 sps:$4 sm:$0xff]   ;;  %v3148_v59 = vld [vmem:[%s4304_s1 + $0x784] ss:$16 sps:$4 sm:$0xff]  }
  0xb4   :  { %2104 = vmatprep.subr.bf16.mxu0 %v3056_v60  ;;  %2309 = vmatprep.subr.bf16.mxu1 %v3059_v61  ;;  %v3151_v60 = vld [vmem:[%s4304_s1 + $0x78c] ss:$16 sps:$4 sm:$0xff]   ;;  %v3146_v61 = vld [vmem:[%s4304_s1 + $0x780] ss:$16 sps:$4 sm:$0xff]  }
  0xb7   :  { %2105 = vmatpush1.bf16.msra.mxu0 %v3054_v62  ;;  %2310 = vmatpush1.bf16.msra.mxu1 %v3057_v63  ;;  %v3149_v62 = vld [vmem:[%s4304_s1 + $0x788] ss:$16 sps:$4 sm:$0xff]   ;;  %v3154_v63 = vld [vmem:[%s4304_s1 + $0x7a4] ss:$16 sps:$4 sm:$0xff]  }
  0xb8   :  { %2106 = vmatprep.subr.bf16.mxu0 %v3062_v0  ;;  %2311 = vmatprep.subr.bf16.mxu1 %v3065_v1  ;;  %v3157_v0 = vld [vmem:[%s4304_s1 + $0x7ac] ss:$16 sps:$4 sm:$0xff]   ;;  %v3152_v1 = vld [vmem:[%s4304_s1 + $0x7a0] ss:$16 sps:$4 sm:$0xff]  }
  0xbb   :  { %2107 = vmatpush1.bf16.msra.mxu0 %v3060_v2  ;;  %2312 = vmatpush1.bf16.msra.mxu1 %v3063_v3  ;;  %v3155_v2 = vld [vmem:[%s4304_s1 + $0x7a8] ss:$16 sps:$4 sm:$0xff]   ;;  %v3160_v3 = vld [vmem:[%s4304_s1 + $0x7c4] ss:$16 sps:$4 sm:$0xff]  }
  0xbc   :  { %2108 = vmatprep.subr.bf16.mxu0 %v3068_v4  ;;  %2313 = vmatprep.subr.bf16.mxu1 %v3071_v5  ;;  %v3163_v4 = vld [vmem:[%s4304_s1 + $0x7cc] ss:$16 sps:$4 sm:$0xff]   ;;  %v3158_v5 = vld [vmem:[%s4304_s1 + $0x7c0] ss:$16 sps:$4 sm:$0xff]  }
  0xbf   :  { %2109 = vmatpush1.bf16.msra.mxu0 %v3066_v6  ;;  %2314 = vmatpush1.bf16.msra.mxu1 %v3069_v7  ;;  %v3161_v6 = vld [vmem:[%s4304_s1 + $0x7c8] ss:$16 sps:$4 sm:$0xff]   ;;  %v3166_v7 = vld [vmem:[%s4304_s1 + $0x7e4] ss:$16 sps:$4 sm:$0xff]  }
  0xc0   :  { %2119 = vmatprep.subr.bf16.mxu0 %v3076_v8  ;;  %2324 = vmatprep.subr.bf16.mxu1 %v3079_v9  ;;  %v3169_v8 = vld [vmem:[%s4304_s1 + $0x7ec] ss:$16 sps:$4 sm:$0xff]   ;;  %v3164_v9 = vld [vmem:[%s4304_s1 + $0x7e0] ss:$16 sps:$4 sm:$0xff]  }
  0xc2   :  { %2111 = vmatmul.mubr.bf16.vlgmr.msra.gmra.mrb[0].mxu0 %v2418_v12  ;;  %2316 = vmatmul.mubr.bf16.vlgmr.msra.gmra.mrb[0].mxu1 %v2418_v12  ;;  %v3174_v12 = vld [vmem:[%s4304_s1 + $0x804] ss:$16 sps:$4 sm:$0xff]  }
  0xc3   :  { %2120 = vmatpush1.bf16.msra.mxu0 %v3074_v10  ;;  %2325 = vmatpush1.bf16.msra.mxu1 %v3077_v13  ;;  %v3167_v10 = vld [vmem:[%s4304_s1 + $0x7e8] ss:$16 sps:$4 sm:$0xff]   ;;  %v3177_v13 = vld [vmem:[%s4304_s1 + $0x80c] ss:$16 sps:$4 sm:$0xff]  }
  0xc4   :  { %2121 = vmatprep.subr.bf16.mxu0 %v3082_v15  ;;  %2326 = vmatprep.subr.bf16.mxu1 %v3085_v11  ;;  %v2420_v15 = vcombine.low %v3902_v14, %v3902_v14  ;;  %v4097_v11 = vld [vmem:[%s4305_s0 + $0x20] sm:$0xff] }
  0xc5   :  { %2151 = vmatprep.mubr.bf16.mxu0 %v2421_v16  ;;  %2356 = vmatprep.mubr.bf16.mxu1 %v2421_v16  ;;  %v3172_v16 = vld [vmem:[%s4304_s1 + $0x800] ss:$16 sps:$4 sm:$0xff]   ;;  %v3180_v14 = vld [vmem:[%s4304_s1 + $0x824] ss:$16 sps:$4 sm:$0xff]  }
  0xc7   :  { %2122 = vmatpush1.bf16.msra.mxu0 %v3080_v17  ;;  %2327 = vmatpush1.bf16.msra.mxu1 %v3083_v18  ;;  %v3175_v17 = vld [vmem:[%s4304_s1 + $0x808] ss:$16 sps:$4 sm:$0xff]   ;;  %v3183_v18 = vld [vmem:[%s4304_s1 + $0x82c] ss:$16 sps:$4 sm:$0xff]  }
  0xc8   :  { %2123 = vmatprep.subr.bf16.mxu0 %v3088_v19  ;;  %2328 = vmatprep.subr.bf16.mxu1 %v3091_v20  ;;  %v2423_v19 = vcombine.high %v4097_v11, %v4097_v11  ;;  %v3178_v20 = vld [vmem:[%s4304_s1 + $0x820] ss:$16 sps:$4 sm:$0xff]  }
  0xcb   :  { %2124 = vmatpush1.bf16.msra.mxu0 %v3086_v21  ;;  %2329 = vmatpush1.bf16.msra.mxu1 %v3089_v22  ;;  %v3181_v21 = vld [vmem:[%s4304_s1 + $0x828] ss:$16 sps:$4 sm:$0xff]   ;;  %v3186_v22 = vld [vmem:[%s4304_s1 + $0x844] ss:$16 sps:$4 sm:$0xff]  }
  0xcc   :  { %2125 = vmatprep.subr.bf16.mxu0 %v3094_v23  ;;  %2330 = vmatprep.subr.bf16.mxu1 %v3097_v24  ;;  %v3189_v23 = vld [vmem:[%s4304_s1 + $0x84c] ss:$16 sps:$4 sm:$0xff]   ;;  %v3184_v24 = vld [vmem:[%s4304_s1 + $0x840] ss:$16 sps:$4 sm:$0xff]  }
  0xcf   :  { %2126 = vmatpush1.bf16.msra.mxu0 %v3092_v25  ;;  %2331 = vmatpush1.bf16.msra.mxu1 %v3095_v26  ;;  %v3187_v25 = vld [vmem:[%s4304_s1 + $0x848] ss:$16 sps:$4 sm:$0xff]   ;;  %v3192_v26 = vld [vmem:[%s4304_s1 + $0x864] ss:$16 sps:$4 sm:$0xff]  }
  0xd0   :  { %2127 = vmatprep.subr.bf16.mxu0 %v3100_v27  ;;  %2332 = vmatprep.subr.bf16.mxu1 %v3103_v28  ;;  %v3195_v27 = vld [vmem:[%s4304_s1 + $0x86c] ss:$16 sps:$4 sm:$0xff]   ;;  %v3190_v28 = vld [vmem:[%s4304_s1 + $0x860] ss:$16 sps:$4 sm:$0xff]  }
  0xd3   :  { %2128 = vmatpush1.bf16.msra.mxu0 %v3098_v29  ;;  %2333 = vmatpush1.bf16.msra.mxu1 %v3101_v30  ;;  %v3193_v29 = vld [vmem:[%s4304_s1 + $0x868] ss:$16 sps:$4 sm:$0xff]   ;;  %v3198_v30 = vld [vmem:[%s4304_s1 + $0x884] ss:$16 sps:$4 sm:$0xff]  }
  0xd4   :  { %2129 = vmatprep.subr.bf16.mxu0 %v3106_v31  ;;  %2334 = vmatprep.subr.bf16.mxu1 %v3109_v32  ;;  %v3201_v31 = vld [vmem:[%s4304_s1 + $0x88c] ss:$16 sps:$4 sm:$0xff]   ;;  %v3196_v32 = vld [vmem:[%s4304_s1 + $0x880] ss:$16 sps:$4 sm:$0xff]  }
  0xd7   :  { %2130 = vmatpush1.bf16.msra.mxu0 %v3104_v33  ;;  %2335 = vmatpush1.bf16.msra.mxu1 %v3107_v34  ;;  %v3199_v33 = vld [vmem:[%s4304_s1 + $0x888] ss:$16 sps:$4 sm:$0xff]   ;;  %v3204_v34 = vld [vmem:[%s4304_s1 + $0x8a4] ss:$16 sps:$4 sm:$0xff]  }
  0xd8   :  { %2131 = vmatprep.subr.bf16.mxu0 %v3112_v35  ;;  %2336 = vmatprep.subr.bf16.mxu1 %v3115_v36  ;;  %v3207_v35 = vld [vmem:[%s4304_s1 + $0x8ac] ss:$16 sps:$4 sm:$0xff]   ;;  %v3202_v36 = vld [vmem:[%s4304_s1 + $0x8a0] ss:$16 sps:$4 sm:$0xff]  }
  0xdb   :  { %2132 = vmatpush1.bf16.msra.mxu0 %v3110_v37  ;;  %2337 = vmatpush1.bf16.msra.mxu1 %v3113_v38  ;;  %v3205_v37 = vld [vmem:[%s4304_s1 + $0x8a8] ss:$16 sps:$4 sm:$0xff]   ;;  %v3210_v38 = vld [vmem:[%s4304_s1 + $0x8c4] ss:$16 sps:$4 sm:$0xff]  }
  0xdc   :  { %2133 = vmatprep.subr.bf16.mxu0 %v3118_v39  ;;  %2338 = vmatprep.subr.bf16.mxu1 %v3121_v40  ;;  %v3213_v39 = vld [vmem:[%s4304_s1 + $0x8cc] ss:$16 sps:$4 sm:$0xff]   ;;  %v3208_v40 = vld [vmem:[%s4304_s1 + $0x8c0] ss:$16 sps:$4 sm:$0xff]  }
  0xdf   :  { %2134 = vmatpush1.bf16.msra.mxu0 %v3116_v41  ;;  %2339 = vmatpush1.bf16.msra.mxu1 %v3119_v42  ;;  %v3211_v41 = vld [vmem:[%s4304_s1 + $0x8c8] ss:$16 sps:$4 sm:$0xff]   ;;  %v3216_v42 = vld [vmem:[%s4304_s1 + $0x8e4] ss:$16 sps:$4 sm:$0xff]  }
  0xe0   :  { %2135 = vmatprep.subr.bf16.mxu0 %v3124_v43  ;;  %2340 = vmatprep.subr.bf16.mxu1 %v3127_v44  ;;  %v3219_v43 = vld [vmem:[%s4304_s1 + $0x8ec] ss:$16 sps:$4 sm:$0xff]   ;;  %v3214_v44 = vld [vmem:[%s4304_s1 + $0x8e0] ss:$16 sps:$4 sm:$0xff]  }
  0xe3   :  { %2136 = vmatpush1.bf16.msra.mxu0 %v3122_v45  ;;  %2341 = vmatpush1.bf16.msra.mxu1 %v3125_v46  ;;  %v3217_v45 = vld [vmem:[%s4304_s1 + $0x8e8] ss:$16 sps:$4 sm:$0xff]   ;;  %v3222_v46 = vld [vmem:[%s4304_s1 + $0x904] ss:$16 sps:$4 sm:$0xff]  }
  0xe4   :  { %2137 = vmatprep.subr.bf16.mxu0 %v3130_v47  ;;  %2342 = vmatprep.subr.bf16.mxu1 %v3133_v48  ;;  %v3225_v47 = vld [vmem:[%s4304_s1 + $0x90c] ss:$16 sps:$4 sm:$0xff]   ;;  %v3220_v48 = vld [vmem:[%s4304_s1 + $0x900] ss:$16 sps:$4 sm:$0xff]  }
  0xe7   :  { %2138 = vmatpush1.bf16.msra.mxu0 %v3128_v49  ;;  %2343 = vmatpush1.bf16.msra.mxu1 %v3131_v50  ;;  %v3223_v49 = vld [vmem:[%s4304_s1 + $0x908] ss:$16 sps:$4 sm:$0xff]   ;;  %v3228_v50 = vld [vmem:[%s4304_s1 + $0x924] ss:$16 sps:$4 sm:$0xff]  }
  0xe8   :  { %2139 = vmatprep.subr.bf16.mxu0 %v3136_v51  ;;  %2344 = vmatprep.subr.bf16.mxu1 %v3139_v52  ;;  %v3231_v51 = vld [vmem:[%s4304_s1 + $0x92c] ss:$16 sps:$4 sm:$0xff]   ;;  %v3226_v52 = vld [vmem:[%s4304_s1 + $0x920] ss:$16 sps:$4 sm:$0xff]  }
  0xeb   :  { %2140 = vmatpush1.bf16.msra.mxu0 %v3134_v53  ;;  %2345 = vmatpush1.bf16.msra.mxu1 %v3137_v54  ;;  %v3229_v53 = vld [vmem:[%s4304_s1 + $0x928] ss:$16 sps:$4 sm:$0xff]   ;;  %v3234_v54 = vld [vmem:[%s4304_s1 + $0x944] ss:$16 sps:$4 sm:$0xff]  }
  0xec   :  { %2141 = vmatprep.subr.bf16.mxu0 %v3142_v55  ;;  %2346 = vmatprep.subr.bf16.mxu1 %v3145_v56  ;;  %v3237_v55 = vld [vmem:[%s4304_s1 + $0x94c] ss:$16 sps:$4 sm:$0xff]   ;;  %v3232_v56 = vld [vmem:[%s4304_s1 + $0x940] ss:$16 sps:$4 sm:$0xff]  }
  0xef   :  { %2142 = vmatpush1.bf16.msra.mxu0 %v3140_v57  ;;  %2347 = vmatpush1.bf16.msra.mxu1 %v3143_v58  ;;  %v3235_v57 = vld [vmem:[%s4304_s1 + $0x948] ss:$16 sps:$4 sm:$0xff]   ;;  %v3240_v58 = vld [vmem:[%s4304_s1 + $0x964] ss:$16 sps:$4 sm:$0xff]  }
  0xf0   :  { %2143 = vmatprep.subr.bf16.mxu0 %v3148_v59  ;;  %2348 = vmatprep.subr.bf16.mxu1 %v3151_v60  ;;  %v3243_v59 = vld [vmem:[%s4304_s1 + $0x96c] ss:$16 sps:$4 sm:$0xff]   ;;  %v3238_v60 = vld [vmem:[%s4304_s1 + $0x960] ss:$16 sps:$4 sm:$0xff]  }
  0xf3   :  { %2144 = vmatpush1.bf16.msra.mxu0 %v3146_v61  ;;  %2349 = vmatpush1.bf16.msra.mxu1 %v3149_v62  ;;  %v3241_v61 = vld [vmem:[%s4304_s1 + $0x968] ss:$16 sps:$4 sm:$0xff]   ;;  %v3246_v62 = vld [vmem:[%s4304_s1 + $0x984] ss:$16 sps:$4 sm:$0xff]  }
  0xf4   :  { %2145 = vmatprep.subr.bf16.mxu0 %v3154_v63  ;;  %2350 = vmatprep.subr.bf16.mxu1 %v3157_v0  ;;  %v3249_v63 = vld [vmem:[%s4304_s1 + $0x98c] ss:$16 sps:$4 sm:$0xff]   ;;  %v3244_v0 = vld [vmem:[%s4304_s1 + $0x980] ss:$16 sps:$4 sm:$0xff]  }
  0xf7   :  { %2146 = vmatpush1.bf16.msra.mxu0 %v3152_v1  ;;  %2351 = vmatpush1.bf16.msra.mxu1 %v3155_v2  ;;  %v3247_v1 = vld [vmem:[%s4304_s1 + $0x988] ss:$16 sps:$4 sm:$0xff]   ;;  %v3252_v2 = vld [vmem:[%s4304_s1 + $0x9a4] ss:$16 sps:$4 sm:$0xff]  }
  0xf8   :  { %2147 = vmatprep.subr.bf16.mxu0 %v3160_v3  ;;  %2352 = vmatprep.subr.bf16.mxu1 %v3163_v4  ;;  %v3255_v3 = vld [vmem:[%s4304_s1 + $0x9ac] ss:$16 sps:$4 sm:$0xff]   ;;  %v3250_v4 = vld [vmem:[%s4304_s1 + $0x9a0] ss:$16 sps:$4 sm:$0xff]  }
  0xfb   :  { %2148 = vmatpush1.bf16.msra.mxu0 %v3158_v5  ;;  %2353 = vmatpush1.bf16.msra.mxu1 %v3161_v6  ;;  %v3253_v5 = vld [vmem:[%s4304_s1 + $0x9a8] ss:$16 sps:$4 sm:$0xff]   ;;  %v3258_v6 = vld [vmem:[%s4304_s1 + $0x9c4] ss:$16 sps:$4 sm:$0xff]  }
  0xfc   :  { %2149 = vmatprep.subr.bf16.mxu0 %v3166_v7  ;;  %2354 = vmatprep.subr.bf16.mxu1 %v3169_v8  ;;  %v3261_v7 = vld [vmem:[%s4304_s1 + $0x9cc] ss:$16 sps:$4 sm:$0xff]   ;;  %v3256_v8 = vld [vmem:[%s4304_s1 + $0x9c0] ss:$16 sps:$4 sm:$0xff]  }
  0xff   :  { %2150 = vmatpush1.bf16.msra.mxu0 %v3164_v9  ;;  %2355 = vmatpush1.bf16.msra.mxu1 %v3167_v10  ;;  %v3259_v9 = vld [vmem:[%s4304_s1 + $0x9c8] ss:$16 sps:$4 sm:$0xff]   ;;  %v3264_v10 = vld [vmem:[%s4304_s1 + $0x9e4] ss:$16 sps:$4 sm:$0xff]  }
 0x100   :  { %2160 = vmatprep.subr.bf16.mxu0 %v3174_v12  ;;  %2365 = vmatprep.subr.bf16.mxu1 %v3177_v13  ;;  %v3267_v12 = vld [vmem:[%s4304_s1 + $0x9ec] ss:$16 sps:$4 sm:$0xff]   ;;  %v3262_v13 = vld [vmem:[%s4304_s1 + $0x9e0] ss:$16 sps:$4 sm:$0xff]  }
 0x102   :  { %2152 = vmatmul.mubr.bf16.vlgmr.msra.gmra.mrb[0].mxu0 %v2420_v15  ;;  %2357 = vmatmul.mubr.bf16.vlgmr.msra.gmra.mrb[0].mxu1 %v2420_v15  ;;  %v3265_v15 = vld [vmem:[%s4304_s1 + $0x9e8] ss:$16 sps:$4 sm:$0xff]  }
 0x103   :  { %2161 = vmatpush1.bf16.msra.mxu0 %v3172_v16  ;;  %2366 = vmatpush1.bf16.msra.mxu1 %v3175_v17  ;;  %v2422_v16 = vcombine.low %v4097_v11, %v4097_v11  ;;  %v341_v17 = vlaneseq }
 0x104   :  { %2162 = vmatprep.subr.bf16.mxu0 %v3180_v14  ;;  %2367 = vmatprep.subr.bf16.mxu1 %v3183_v18 }
 0x105   :  { %2192 = vmatprep.mubr.bf16.mxu0 %v2423_v19  ;;  %2397 = vmatprep.mubr.bf16.mxu1 %v2423_v19  ;;  %v342_v14 = vshrl.u32 %v341_v17, 7 }
 0x107   :  { %2163 = vmatpush1.bf16.msra.mxu0 %v3178_v20  ;;  %2368 = vmatpush1.bf16.msra.mxu1 %v3181_v21  ;;  %v343_v18 = vsub.s32 0, %v342_v14  ;;  %v351_v19 = vsub.s32 2, %v342_v14  ;;  %v339_v20 = vld [vmem:[%s4306_s2] sm:$0xf]  ;;  %v347_v21 = vsub.s32 1, %v342_v14 }
 0x108   :  { %2164 = vmatprep.subr.bf16.mxu0 %v3186_v22  ;;  %2369 = vmatprep.subr.bf16.mxu1 %v3189_v23  ;;  %v355_v22 = vsub.s32 3, %v342_v14 }
 0x109   :  { %v344_v23 = vrot.slane %v339_v20, %v343_v18 }
 0x10b   :  { %2165 = vmatpush1.bf16.msra.mxu0 %v3184_v24  ;;  %2370 = vmatpush1.bf16.msra.mxu1 %v3187_v25  ;;  %v352_v24 = vrot.slane %v339_v20, %v351_v19  ;;  %v348_v25 = vrot.slane %v339_v20, %v347_v21 }
 0x10c   :  { %2166 = vmatprep.subr.bf16.mxu0 %v3192_v26  ;;  %2371 = vmatprep.subr.bf16.mxu1 %v3195_v27  ;;  %v356_v26 = vrot.slane %v339_v20, %v355_v22 }
 0x10f   :  { %2167 = vmatpush1.bf16.msra.mxu0 %v3190_v28  ;;  %2372 = vmatpush1.bf16.msra.mxu1 %v3193_v29 }
 0x110   :  { %2168 = vmatprep.subr.bf16.mxu0 %v3198_v30  ;;  %2373 = vmatprep.subr.bf16.mxu1 %v3201_v31 }
 0x113   :  { %2169 = vmatpush1.bf16.msra.mxu0 %v3196_v32  ;;  %2374 = vmatpush1.bf16.msra.mxu1 %v3199_v33 }
 0x114   :  { %2170 = vmatprep.subr.bf16.mxu0 %v3204_v34  ;;  %2375 = vmatprep.subr.bf16.mxu1 %v3207_v35 }
 0x117   :  { %2171 = vmatpush1.bf16.msra.mxu0 %v3202_v36  ;;  %2376 = vmatpush1.bf16.msra.mxu1 %v3205_v37 }
 0x118   :  { %2172 = vmatprep.subr.bf16.mxu0 %v3210_v38  ;;  %2377 = vmatprep.subr.bf16.mxu1 %v3213_v39 }
 0x11b   :  { %2173 = vmatpush1.bf16.msra.mxu0 %v3208_v40  ;;  %2378 = vmatpush1.bf16.msra.mxu1 %v3211_v41 }
 0x11c   :  { %2174 = vmatprep.subr.bf16.mxu0 %v3216_v42  ;;  %2379 = vmatprep.subr.bf16.mxu1 %v3219_v43 }
 0x11f   :  { %2175 = vmatpush1.bf16.msra.mxu0 %v3214_v44  ;;  %2380 = vmatpush1.bf16.msra.mxu1 %v3217_v45 }
 0x120   :  { %2176 = vmatprep.subr.bf16.mxu0 %v3222_v46  ;;  %2381 = vmatprep.subr.bf16.mxu1 %v3225_v47 }
 0x123   :  { %2177 = vmatpush1.bf16.msra.mxu0 %v3220_v48  ;;  %2382 = vmatpush1.bf16.msra.mxu1 %v3223_v49 }
 0x124   :  { %2178 = vmatprep.subr.bf16.mxu0 %v3228_v50  ;;  %2383 = vmatprep.subr.bf16.mxu1 %v3231_v51 }
 0x127   :  { %2179 = vmatpush1.bf16.msra.mxu0 %v3226_v52  ;;  %2384 = vmatpush1.bf16.msra.mxu1 %v3229_v53 }
 0x128   :  { %2180 = vmatprep.subr.bf16.mxu0 %v3234_v54  ;;  %2385 = vmatprep.subr.bf16.mxu1 %v3237_v55 }
 0x12b   :  { %2181 = vmatpush1.bf16.msra.mxu0 %v3232_v56  ;;  %2386 = vmatpush1.bf16.msra.mxu1 %v3235_v57 }
 0x12c   :  { %2182 = vmatprep.subr.bf16.mxu0 %v3240_v58  ;;  %2387 = vmatprep.subr.bf16.mxu1 %v3243_v59 }
 0x12f   :  { %2183 = vmatpush1.bf16.msra.mxu0 %v3238_v60  ;;  %2388 = vmatpush1.bf16.msra.mxu1 %v3241_v61 }
 0x130   :  { %2184 = vmatprep.subr.bf16.mxu0 %v3246_v62  ;;  %2389 = vmatprep.subr.bf16.mxu1 %v3249_v63 }
 0x133   :  { %2185 = vmatpush1.bf16.msra.mxu0 %v3244_v0  ;;  %2390 = vmatpush1.bf16.msra.mxu1 %v3247_v1 }
 0x134   :  { %2186 = vmatprep.subr.bf16.mxu0 %v3252_v2  ;;  %2391 = vmatprep.subr.bf16.mxu1 %v3255_v3 }
 0x137   :  { %2187 = vmatpush1.bf16.msra.mxu0 %v3250_v4  ;;  %2392 = vmatpush1.bf16.msra.mxu1 %v3253_v5 }
 0x138   :  { %2188 = vmatprep.subr.bf16.mxu0 %v3258_v6  ;;  %2393 = vmatprep.subr.bf16.mxu1 %v3261_v7 }
 0x13b   :  { %2189 = vmatpush1.bf16.msra.mxu0 %v3256_v8  ;;  %2394 = vmatpush1.bf16.msra.mxu1 %v3259_v9 }
 0x13c   :  { %2190 = vmatprep.subr.bf16.mxu0 %v3264_v10  ;;  %2395 = vmatprep.subr.bf16.mxu1 %v3267_v12 }
 0x13f   :  { %2191 = vmatpush1.bf16.msra.mxu0 %v3262_v13  ;;  %2396 = vmatpush1.bf16.msra.mxu1 %v3265_v15 }
 0x142   :  { %2193 = vmatmul.mubr.bf16.vlgmr.msra.gmra.mrb[0].mxu0 %v2422_v16  ;;  %2398 = vmatmul.mubr.bf16.vlgmr.msra.gmra.mrb[0].mxu1 %v2422_v16 }
 0x215   :  { %v2194_v27 = vpop.f32.mrb[0].mxu0  ;;  %v2399_v11 = vpop.f32.mrb[0].mxu1 }
 0x216   :  { %v2744_v28 = vadd.f32 %v2194_v27, %v344_v23  ;;  %v2746_v29 = vadd.f32 %v2399_v11, %v352_v24  ;;  %v2196_v30 = vpop.f32.mrb[1].mxu0  ;;  %v2401_v31 = vpop.f32.mrb[1].mxu1 }
 0x217   :  { %v2745_v32 = vadd.f32 %v2196_v30, %v348_v25  ;;  %v2747_v33 = vadd.f32 %v2401_v31, %v356_v26  ;;  %v2198_v34 = vpop.f32.mrb[2].mxu0  ;;  %v2403_v35 = vpop.f32.mrb[2].mxu1 }
 0x218   :  { %2406 = vst [vmem:[%s4307_s3] sm:$0xff] %v2744_v28  ;;  %2408 = vst [vmem:[%s4307_s3 + $0x10] sm:$0xff] %v2746_v29  ;;  %v2199_v36 = vpop.f32.mrb[3].mxu0  ;;  %v2404_v37 = vpop.f32.mrb[3].mxu1 }
 0x219   :  { %2407 = vst [vmem:[%s4307_s3 + $0x8] sm:$0xff] %v2745_v32  ;;  %2409 = vst [vmem:[%s4307_s3 + $0x18] sm:$0xff] %v2747_v33 }

</bundles_post_ra>
